<compile_context>
chip_gen: v6e
topology: v6e:2x2x1
jax: 0.10.0
libtpu: 0.0.40
codegen_flags: <defaults>
</compile_context>

<pallas_src>
import functools

import jax
import jax.numpy as jnp
from jax.experimental import pallas as pl
from jax.experimental.pallas import tpu as pltpu


# ------------------------------ helpers ------------------------------------ #

def _round_up(a, b):
    return (a + b - 1) // b * b


def _pick_tile(dim, pref):
    """Largest 128-multiple tile <= pref that divides dim, else the full dim."""
    if dim <= pref:
        return dim
    t = pref
    while t >= 128:
        if dim % t == 0:
            return t
        t -= 128
    return dim


@functools.lru_cache(maxsize=None)
def _physical_vmem_bytes():
    try:
        info = pltpu.get_tpu_info()
        return int(getattr(info, "vmem_capacity_bytes", 128 * 2**20))
    except Exception:
        return 128 * 2**20


def _default_tiles():
    cap = _physical_vmem_bytes()
    if cap <= 64 * 2**20:          # v7x-class: 64 MiB/TC -> smaller N tiles
        return 256, 256, 512
    return 512, 1024, 512          # v5e/v6e: 128 MiB -> bigger tiles, less re-streaming


# ------------------------ fused linear (matmul) kernel ---------------------- #

def _linear_kernel(*refs, act, has_ln, has_bias, has_res, eps):
    """out = act(LN(x) @ w + b) + residual, with every piece optional."""
    it = iter(refs)
    x_ref = next(it)
    w_ref = next(it)
    g_ref = next(it) if has_ln else None
    be_ref = next(it) if has_ln else None
    b_ref = next(it) if has_bias else None
    r_ref = next(it) if has_res else None
    o_ref = next(it)
    acc_ref = next(it)
    xn_ref = next(it) if has_ln else None

    @pl.when(pl.program_id(2) == 0)
    def _():
        acc_ref[...] = jnp.zeros_like(acc_ref)

    if has_ln:
        # LN fusion requires the K axis untiled (tk == K).  It is hoisted out of
        # the N loop: compute normalized x once per M tile (j == 0) into a bf16
        # VMEM scratch and reuse it for all N tiles.
        @pl.when(pl.program_id(1) == 0)
        def _():
            xf = x_ref[...].astype(jnp.float32)
            mu = jnp.mean(xf, axis=-1, keepdims=True)
            var = jnp.mean(jnp.square(xf - mu), axis=-1, keepdims=True)
            xf = (xf - mu) * jax.lax.rsqrt(var + eps)
            xn_ref[...] = (xf * g_ref[...].astype(jnp.float32)
                           + be_ref[...].astype(jnp.float32)).astype(xn_ref.dtype)
        x = xn_ref[...]                                  # bf16
    else:
        x = x_ref[...].astype(jnp.bfloat16)              # bf16 into the MXU

    acc_ref[...] += jnp.dot(x, w_ref[...], preferred_element_type=jnp.float32)

    @pl.when(pl.program_id(2) == pl.num_programs(2) - 1)
    def _():
        acc = acc_ref[...]
        if has_bias:
            acc = acc + b_ref[...].astype(jnp.float32)
        if act == "quick_gelu":                          # CLIP QuickGELU
            acc = acc * jax.nn.sigmoid(1.702 * acc)
        if has_res:
            acc = acc + r_ref[...].astype(jnp.float32)
        o_ref[...] = acc.astype(o_ref.dtype)


def pallas_linear(x, w, bias=None, residual=None, ln=None, act=None, eps=1e-5,
                  tm=None, tn=None, tk=None):
    """y = act(LN(x) @ w + bias) + residual.  x: (M, K), w: (K, N) pre-transposed."""
    M, K = x.shape
    K2, N = w.shape
    assert K == K2
    if w.dtype != jnp.bfloat16:
        w = w.astype(jnp.bfloat16)          # bf16 weights into the MXU
    has_ln = ln is not None
    has_bias = bias is not None
    has_res = residual is not None

    d_tm, d_tn, d_tk = _default_tiles()
    tm = tm or d_tm
    tn = tn or d_tn
    tk = tk or d_tk

    # --- M tiling: pad with zero rows instead of exploding to a full-M block ---
    tm = min(tm, _round_up(M, 8))
    Mp = _round_up(M, tm)
    if Mp != M:
        x = jnp.pad(x, ((0, Mp - M), (0, 0)))
        if has_res:
            residual = jnp.pad(residual, ((0, Mp - M), (0, 0)))

    tn = _pick_tile(N, tn)
    tk = K if has_ln else _pick_tile(K, tk)   # LN fusion needs the full K per tile
    grid = (Mp // tm, N // tn, K // tk)

    in_specs = [pl.BlockSpec((tm, tk), lambda i, j, k: (i, k)),
                pl.BlockSpec((tk, tn), lambda i, j, k: (k, j))]
    args = [x, w]
    if has_ln:
        g, be = ln
        in_specs += [pl.BlockSpec((1, tk), lambda i, j, k: (0, k)),
                     pl.BlockSpec((1, tk), lambda i, j, k: (0, k))]
        args += [g.reshape(1, K), be.reshape(1, K)]
    if has_bias:
        in_specs.append(pl.BlockSpec((1, tn), lambda i, j, k: (0, j)))
        args.append(bias.reshape(1, N))
    if has_res:
        in_specs.append(pl.BlockSpec((tm, tn), lambda i, j, k: (i, j)))
        args.append(residual)

    scratch = [pltpu.VMEM((tm, tn), jnp.float32)]
    if has_ln:
        scratch.append(pltpu.VMEM((tm, K), jnp.bfloat16))   # hoisted LN result

    ib = jnp.dtype(x.dtype).itemsize
    wb = jnp.dtype(w.dtype).itemsize
    est = (2 * tm * tk * ib           # x (double-buffered)
           + 2 * tk * tn * wb         # w
           + tm * tn * 4              # f32 accumulator
           + 2 * tm * tn * ib)        # output
    if has_res:
        est += 2 * tm * tn * ib
    if has_ln:
        est += tm * K * 2 + 4 * 2 * K * 4
    if has_bias:
        est += 2 * tn * 4
    cap = _physical_vmem_bytes()
    vmem_limit = int(min(int(0.75 * cap), max(32 * 2**20, 2 * est)))

    # With the LN hoist, only the M axis may be core-split (a core must always
    # see j == 0 for each of its M tiles).
    dims = ("parallel", "arbitrary", "arbitrary") if has_ln \
        else ("parallel", "parallel", "arbitrary")

    kernel = functools.partial(_linear_kernel, act=act, has_ln=has_ln,
                               has_bias=has_bias, has_res=has_res, eps=eps)
    out = pl.pallas_call(
        kernel,
        out_shape=jax.ShapeDtypeStruct((Mp, N), x.dtype),
        grid=grid,
        in_specs=in_specs,
        out_specs=pl.BlockSpec((tm, tn), lambda i, j, k: (i, j)),
        scratch_shapes=scratch,
        compiler_params=pltpu.CompilerParams(
            dimension_semantics=dims, vmem_limit_bytes=vmem_limit),
    )(*args)
    return out[:M] if Mp != M else out


# --------------- fused class-token + pos-embedding + ln_pre ----------------- #

def _embed_ln_kernel(tok_ref, cls_ref, pos_ref, g_ref, b_ref, o_ref, *, eps):
    x = jnp.concatenate([cls_ref[...], tok_ref[0]], axis=0).astype(jnp.float32)
    x = x + pos_ref[...].astype(jnp.float32)
    mu = jnp.mean(x, axis=-1, keepdims=True)
    var = jnp.mean(jnp.square(x - mu), axis=-1, keepdims=True)
    y = (x - mu) * jax.lax.rsqrt(var + eps)
    o_ref[0] = (y * g_ref[...].astype(jnp.float32)
                + b_ref[...].astype(jnp.float32)).astype(o_ref.dtype)


def pallas_embed_ln(tok, cls_emb, pos_emb, gamma, beta, eps=1e-5):
    """(B, P, E) patch tokens -> (B, P+1, E) = ln_pre([cls; tok] + pos)."""
    B, P, E = tok.shape
    S = P + 1
    return pl.pallas_call(
        functools.partial(_embed_ln_kernel, eps=eps),
        out_shape=jax.ShapeDtypeStruct((B, S, E), tok.dtype),
        grid=(B,),
        in_specs=[pl.BlockSpec((1, P, E), lambda b: (b, 0, 0)),
                  pl.BlockSpec((1, E), lambda b: (0, 0)),
                  pl.BlockSpec((S, E), lambda b: (0, 0)),
                  pl.BlockSpec((1, E), lambda b: (0, 0)),
                  pl.BlockSpec((1, E), lambda b: (0, 0))],
        out_specs=pl.BlockSpec((1, S, E), lambda b: (b, 0, 0)),
        compiler_params=pltpu.CompilerParams(dimension_semantics=("parallel",)),
    )(tok, cls_emb.reshape(1, E), pos_emb, gamma.reshape(1, E), beta.reshape(1, E))


# ------------------------------- attention ---------------------------------- #

def _head_attention(qh, kh, vh, scale):
    """One head: qh/kh/vh (S, Dh) bf16 -> (S, Dh) f32."""
    # q @ k^T via dot_general: no materialized transpose through the XLU.
    s = jax.lax.dot_general(qh, kh, (((1,), (1,)), ((), ())),
                            preferred_element_type=jnp.float32) * scale
    m = jnp.max(s, axis=-1, keepdims=True)
    p = jnp.exp(s - m)
    p = p * pl.reciprocal(jnp.sum(p, axis=-1, keepdims=True), approx=True)
    return jnp.dot(p.astype(jnp.bfloat16), vh, preferred_element_type=jnp.float32)


def _attn_grouped_kernel(q_ref, k_ref, v_ref, o_ref, *, group, dh, scale):
    """q/k/v refs: (1, S, group*dh) aligned slabs; per-head direct store (no concat)."""
    for h in range(group):
        lo = h * dh
        oh = _head_attention(q_ref[0, :, lo:lo + dh].astype(jnp.bfloat16),
                             k_ref[0, :, lo:lo + dh].astype(jnp.bfloat16),
                             v_ref[0, :, lo:lo + dh].astype(jnp.bfloat16), scale)
        o_ref[0, :, lo:lo + dh] = oh.astype(o_ref.dtype)


def _attn_packed_kernel(qkv_ref, o_ref, *, heads, dh, scale):
    """Fallback for widths with no 128-aligned head grouping: whole (S, 3E) slab."""
    E = heads * dh
    for h in range(heads):
        lo = h * dh
        oh = _head_attention(qkv_ref[0, :, lo:lo + dh].astype(jnp.bfloat16),
                             qkv_ref[0, :, E + lo:E + lo + dh].astype(jnp.bfloat16),
                             qkv_ref[0, :, 2 * E + lo:2 * E + lo + dh].astype(jnp.bfloat16),
                             scale)
        o_ref[0, :, lo:lo + dh] = oh.astype(o_ref.dtype)


def _head_group(heads, dh):
    """Smallest divisor g of heads with (g*dh) % 128 == 0 (lane-aligned blocks)."""
    for g in range(1, heads + 1):
        if heads % g == 0 and (g * dh) % 128 == 0:
            return g
    return None


def pallas_attention(qkv, heads):
    """qkv: (B, S, 3E) packed projections -> (B, S, E) attention output."""
    B, S, E3 = qkv.shape
    E = E3 // 3
    dh = E // heads
    scale = 1.0 / (dh ** 0.5)
    group = _head_group(heads, dh)

    if group is None:
        kernel = functools.partial(_attn_packed_kernel, heads=heads, dh=dh, scale=scale)
        return pl.pallas_call(
            kernel,
            out_shape=jax.ShapeDtypeStruct((B, S, E), qkv.dtype),
            grid=(B,),
            in_specs=[pl.BlockSpec((1, S, E3), lambda b: (b, 0, 0))],
            out_specs=pl.BlockSpec((1, S, E), lambda b: (b, 0, 0)),
            compiler_params=pltpu.CompilerParams(dimension_semantics=("parallel",)),
        )(qkv)

    GW = group * dh                     # lane-aligned group width (e.g. 2 heads * 64)
    ng = heads // group
    koff = E // GW                      # block offset of the K region along 3E
    kernel = functools.partial(_attn_grouped_kernel, group=group, dh=dh, scale=scale)
    # Three views of the same packed QKV slab, one aligned block per head group.
    return pl.pallas_call(
        kernel,
        out_shape=jax.ShapeDtypeStruct((B, S, E), qkv.dtype),
        grid=(B, ng),
        in_specs=[pl.BlockSpec((1, S, GW), lambda b, g: (b, 0, g)),
                  pl.BlockSpec((1, S, GW), lambda b, g: (b, 0, koff + g)),
                  pl.BlockSpec((1, S, GW), lambda b, g: (b, 0, 2 * koff + g))],
        out_specs=pl.BlockSpec((1, S, GW), lambda b, g: (b, 0, g)),
        compiler_params=pltpu.CompilerParams(
            dimension_semantics=("parallel", "parallel")),
    )(qkv, qkv, qkv)


# ------------------------- parameters & forward ----------------------------- #

def init_params(key, *, width=256, patch=8, in_ch=3, seq=5, layers=2, out_dim=128):
    ks = iter(jax.random.split(key, 4 + layers * 8 + 4))

    def nrm(shape, scale=0.02, dtype=jnp.bfloat16):
        return (scale * jax.random.normal(next(ks), shape, dtype=jnp.float32)).astype(dtype)

    hidden = width * 4
    # Matmul weights stored pre-transposed (K, N) and in bf16 for the MXU.
    params = dict(
        conv1_w=nrm((in_ch * patch * patch, width)),     # Conv2d(in_ch, width, patch, patch, bias=False)
        class_embedding=nrm((width,), dtype=jnp.float32),
        positional_embedding=nrm((seq, width), dtype=jnp.float32),
        ln_pre_w=jnp.ones((width,), jnp.float32), ln_pre_b=jnp.zeros((width,), jnp.float32),
        ln_post_w=jnp.ones((width,), jnp.float32), ln_post_b=jnp.zeros((width,), jnp.float32),
        proj=nrm((width, out_dim)),
        layers=[],
    )
    for _ in range(layers):
        params["layers"].append(dict(
            ln1_w=jnp.ones((width,), jnp.float32), ln1_b=jnp.zeros((width,), jnp.float32),
            in_proj_w=nrm((width, 3 * width)), in_proj_b=nrm((3 * width,), dtype=jnp.float32),
            out_proj_w=nrm((width, width)), out_proj_b=nrm((width,), dtype=jnp.float32),
            ln2_w=jnp.ones((width,), jnp.float32), ln2_b=jnp.zeros((width,), jnp.float32),
            fc_w=nrm((width, hidden)), fc_b=nrm((hidden,), dtype=jnp.float32),
            cproj_w=nrm((hidden, width)), cproj_b=nrm((width,), dtype=jnp.float32),
        ))
    return params


def image_encoder_forward(x, knowledge_pool, params, *, patch=8, heads=4):
    # TODO(synk): knowledge_pool is only consumed by MultiheadAttentionCLoRA, whose
    # implementation is not part of the reference module; the standard MHA residual
    # block path (`x + attention(ln_1(x))`) is implemented and knowledge_pool is unused.
    del knowledge_pool
    B, C, H, W = x.shape
    gh, gw = H // patch, W // patch
    width = params["class_embedding"].shape[0]

    # conv1 with stride == kernel  ==  matmul over flattened (C, ph, pw) patches
    patches = x.reshape(B, C, gh, patch, gw, patch).transpose(0, 2, 4, 1, 3, 5)
    patches = patches.reshape(B * gh * gw, C * patch * patch)
    tok = pallas_linear(patches, params["conv1_w"]).reshape(B, gh * gw, width)

    # class-token concat + positional embedding + ln_pre fused (one HBM pass)
    xt = pallas_embed_ln(tok, params["class_embedding"], params["positional_embedding"],
                         params["ln_pre_w"], params["ln_pre_b"])           # (B, S, E)
    _, S, E = xt.shape
    x2 = xt.reshape(B * S, E)

    for lp in params["layers"]:
        # --- attention block: x = x + out_proj(MHA(ln_1(x))) ---
        res = x2
        qkv = pallas_linear(res, lp["in_proj_w"], bias=lp["in_proj_b"],
                            ln=(lp["ln1_w"], lp["ln1_b"]))                 # (B*S, 3E)
        attn = pallas_attention(qkv.reshape(B, S, 3 * E), heads=heads)     # (B, S, E)
        x2 = pallas_linear(attn.reshape(B * S, E), lp["out_proj_w"],
                           bias=lp["out_proj_b"], residual=res)

        # --- MLP block: x = x + c_proj(quick_gelu(c_fc(ln_2(x)))) ---
        res2 = x2
        h = pallas_linear(res2, lp["fc_w"], bias=lp["fc_b"],
                          ln=(lp["ln2_w"], lp["ln2_b"]), act="quick_gelu")
        x2 = pallas_linear(h, lp["cproj_w"], bias=lp["cproj_b"], residual=res2)

    # ln_post on the CLS token fused into the final projection
    cls_tok = x2.reshape(B, S, E)[:, 0, :]
    out = pallas_linear(cls_tok, params["proj"],
                        ln=(params["ln_post_w"], params["ln_post_b"]))
    return out


if __name__ == "__main__":
    key = jax.random.PRNGKey(0)
    kx, kp, kk = jax.random.split(key, 3)

    B, C, H, W = 2, 3, 16, 16          # patch=8 -> 2x2=4 patches, seq = 5
    patch = 8
    width, heads, layers, out_dim = 256, 4, 2, 128   # Dh=64 -> aligned head pairs
    seq = (H // patch) * (W // patch) + 1

    x = jax.random.normal(kx, (B, C, H, W), dtype=jnp.float32)
    knowledge_pool = jax.random.normal(kk, (4, width), dtype=jnp.float32)
    params = init_params(kp, width=width, patch=patch, in_ch=C, seq=seq,
                         layers=layers, out_dim=out_dim)

    fwd = jax.jit(functools.partial(image_encoder_forward, patch=patch, heads=heads))
    out = fwd(x, knowledge_pool, params)
    jax.block_until_ready(out)
    assert out.shape == (B, out_dim) and out.dtype == jnp.float32
    print("KERNEL_OK")
</pallas_src>

<mosaic_0001>
module attributes {stable_mosaic.version = 11 : i64} {
  func.func @_linear_kernel(%arg0: i32, %arg1: i32, %arg2: i32, %arg3: memref<8x192xf32, #tpu.memory_space<vmem>>, %arg4: memref<192x256xbf16, #tpu.memory_space<vmem>>, %arg5: memref<8x256xf32, #tpu.memory_space<vmem>>, %arg6: memref<8x256xf32, #tpu.memory_space<vmem>>) attributes {dimension_semantics = [#tpu.dimension_semantics<parallel>, #tpu.dimension_semantics<parallel>, #tpu.dimension_semantics<arbitrary>], iteration_bounds = array<i64: 1, 1, 1>, scalar_prefetch = 0 : i64, scratch_operands = 1 : i64, tpu.core_type = #tpu.core_type<tc>, window_params = [{transform_indices = @transform_0, window_bounds = array<i64: 8, 192>}, {transform_indices = @transform_1, window_bounds = array<i64: 192, 256>}, {transform_indices = @transform_2, window_bounds = array<i64: 8, 256>}]} {
    %c0_i32 = arith.constant 0 : i32
    %0 = arith.cmpi eq, %arg2, %c0_i32 : i32
    %1 = arith.extui %0 : i1 to i32
    %c0_i32_0 = arith.constant 0 : i32
    %2 = arith.cmpi ne, %1, %c0_i32_0 : i32
    scf.if %2 {
      %cst_10 = arith.constant 0.000000e+00 : f32
      %13 = vector.broadcast %cst_10 : f32 to vector<8x256xf32>
      %c0_11 = arith.constant 0 : index
      %c0_12 = arith.constant 0 : index
      %14 = vector.load %arg6[%c0_11, %c0_12] : memref<8x256xf32, #tpu.memory_space<vmem>>, vector<8x256xf32>
      tpu.vector_store %arg6[%c0_11, %c0_12], %13 {strides = array<i32>} : memref<8x256xf32, #tpu.memory_space<vmem>>, vector<8x256xf32>,
    } else {
    }
    %c0 = arith.constant 0 : index
    %c0_1 = arith.constant 0 : index
    %3 = vector.load %arg3[%c0, %c0_1] : memref<8x192xf32, #tpu.memory_space<vmem>>, vector<8x192xf32>
    %4 = arith.truncf %3 : vector<8x192xf32> to vector<8x192xbf16>
    %c0_2 = arith.constant 0 : index
    %c0_3 = arith.constant 0 : index
    %5 = vector.load %arg6[%c0_2, %c0_3] : memref<8x256xf32, #tpu.memory_space<vmem>>, vector<8x256xf32>
    %c0_4 = arith.constant 0 : index
    %c0_5 = arith.constant 0 : index
    %6 = vector.load %arg4[%c0_4, %c0_5] : memref<192x256xbf16, #tpu.memory_space<vmem>>, vector<192x256xbf16>
    %cst = arith.constant dense<0.000000e+00> : vector<8x256xf32>
    %7 = tpu.matmul %4, %6, %cst {dimension_numbers = #tpu.dot_dimension_numbers<[1], [0], [0], [1], [0, 0, 1, 1], [], []>} : vector<8x192xbf16>, vector<192x256xbf16>, vector<8x256xf32> -> vector<8x256xf32>
    %8 = arith.addf %5, %7 : vector<8x256xf32>
    %c0_6 = arith.constant 0 : index
    %c0_7 = arith.constant 0 : index
    %9 = vector.load %arg6[%c0_6, %c0_7] : memref<8x256xf32, #tpu.memory_space<vmem>>, vector<8x256xf32>
    tpu.vector_store %arg6[%c0_6, %c0_7], %8 {strides = array<i32>} : memref<8x256xf32, #tpu.memory_space<vmem>>, vector<8x256xf32>,
    %c0_i32_8 = arith.constant 0 : i32
    %10 = arith.cmpi eq, %arg2, %c0_i32_8 : i32
    %11 = arith.extui %10 : i1 to i32
    %c0_i32_9 = arith.constant 0 : i32
    %12 = arith.cmpi ne, %11, %c0_i32_9 : i32
    scf.if %12 {
      %c0_10 = arith.constant 0 : index
      %c0_11 = arith.constant 0 : index
      %13 = vector.load %arg6[%c0_10, %c0_11] : memref<8x256xf32, #tpu.memory_space<vmem>>, vector<8x256xf32>
      %c0_12 = arith.constant 0 : index
      %c0_13 = arith.constant 0 : index
      %14 = vector.load %arg5[%c0_12, %c0_13] : memref<8x256xf32, #tpu.memory_space<vmem>>, vector<8x256xf32>
      tpu.vector_store %arg5[%c0_12, %c0_13], %13 {strides = array<i32>} : memref<8x256xf32, #tpu.memory_space<vmem>>, vector<8x256xf32>,
    } else {
    }
    return
  }
  func.func @transform_0(%arg0: i32, %arg1: i32, %arg2: i32) -> (i32, i32) {
    %c0_i32 = arith.constant 0 : i32
    return %arg0, %arg2 : i32, i32
  }
  func.func @transform_1(%arg0: i32, %arg1: i32, %arg2: i32) -> (i32, i32) {
    %c0_i32 = arith.constant 0 : i32
    return %arg2, %arg1 : i32, i32
  }
  func.func @transform_2(%arg0: i32, %arg1: i32, %arg2: i32) -> (i32, i32) {
    %c0_i32 = arith.constant 0 : i32
    return %arg0, %arg1 : i32, i32
  }
}

module attributes {stable_mosaic.version = 11 : i64} {
  func.func @_embed_ln_kernel(%arg0: i32, %arg1: memref<1x4x256xf32, #tpu.memory_space<vmem>>, %arg2: memref<1x256xf32, #tpu.memory_space<vmem>>, %arg3: memref<5x256xf32, #tpu.memory_space<vmem>>, %arg4: memref<1x256xf32, #tpu.memory_space<vmem>>, %arg5: memref<1x256xf32, #tpu.memory_space<vmem>>, %arg6: memref<1x5x256xf32, #tpu.memory_space<vmem>>) attributes {dimension_semantics = [#tpu.dimension_semantics<parallel>], iteration_bounds = array<i64: 2>, scalar_prefetch = 0 : i64, scratch_operands = 0 : i64, tpu.core_type = #tpu.core_type<tc>, window_params = [{transform_indices = @transform_0, window_bounds = array<i64: 1, 4, 256>}, {pipeline_mode = #tpu.pipeline_mode<synchronous>, transform_indices = @transform_1, window_bounds = array<i64: 1, 256>}, {pipeline_mode = #tpu.pipeline_mode<synchronous>, transform_indices = @transform_2, window_bounds = array<i64: 5, 256>}, {pipeline_mode = #tpu.pipeline_mode<synchronous>, transform_indices = @transform_3, window_bounds = array<i64: 1, 256>}, {pipeline_mode = #tpu.pipeline_mode<synchronous>, transform_indices = @transform_4, window_bounds = array<i64: 1, 256>}, {transform_indices = @transform_5, window_bounds = array<i64: 1, 5, 256>}]} {
    %c0 = arith.constant 0 : index
    %c0_0 = arith.constant 0 : index
    %0 = vector.load %arg2[%c0, %c0_0] : memref<1x256xf32, #tpu.memory_space<vmem>>, vector<1x256xf32>
    %c0_1 = arith.constant 0 : index
    %c0_2 = arith.constant 0 : index
    %c0_3 = arith.constant 0 : index
    %1 = vector.load %arg1[%c0_1, %c0_2, %c0_3] : memref<1x4x256xf32, #tpu.memory_space<vmem>>, vector<1x4x256xf32>
    %2 = vector.shape_cast %1 : vector<1x4x256xf32> to vector<4x256xf32>
    %3 = tpu.concatenate %0, %2 in 0 : vector<1x256xf32>, vector<4x256xf32> -> vector<5x256xf32>
    %c0_4 = arith.constant 0 : index
    %c0_5 = arith.constant 0 : index
    %4 = vector.load %arg3[%c0_4, %c0_5] : memref<5x256xf32, #tpu.memory_space<vmem>>, vector<5x256xf32>
    %5 = arith.addf %3, %4 : vector<5x256xf32>
    %cst = arith.constant dense<0.000000e+00> : vector<5xf32>
    %6 = vector.multi_reduction <add>, %5, %cst [1] : vector<5x256xf32> to vector<5xf32>
    %7 = vector.shape_cast %6 : vector<5xf32> to vector<5x1xf32>
    %cst_6 = arith.constant 2.560000e+02 : f32
    %8 = vector.broadcast %cst_6 : f32 to vector<5x1xf32>
    %9 = arith.divf %7, %8 : vector<5x1xf32>
    %10 = vector.broadcast %9 : vector<5x1xf32> to vector<5x256xf32>
    %11 = arith.subf %5, %10 : vector<5x256xf32>
    %12 = arith.mulf %11, %11 : vector<5x256xf32>
    %cst_7 = arith.constant dense<0.000000e+00> : vector<5xf32>
    %13 = vector.multi_reduction <add>, %12, %cst_7 [1] : vector<5x256xf32> to vector<5xf32>
    %14 = vector.shape_cast %13 : vector<5xf32> to vector<5x1xf32>
    %cst_8 = arith.constant 2.560000e+02 : f32
    %15 = vector.broadcast %cst_8 : f32 to vector<5x1xf32>
    %16 = arith.divf %14, %15 : vector<5x1xf32>
    %17 = vector.broadcast %9 : vector<5x1xf32> to vector<5x256xf32>
    %18 = arith.subf %5, %17 : vector<5x256xf32>
    %cst_9 = arith.constant 9.99999974E-6 : f32
    %19 = vector.broadcast %cst_9 : f32 to vector<5x1xf32>
    %20 = arith.addf %16, %19 : vector<5x1xf32>
    %21 = math.rsqrt %20 : vector<5x1xf32>
    %22 = vector.broadcast %21 : vector<5x1xf32> to vector<5x256xf32>
    %23 = arith.mulf %18, %22 : vector<5x256xf32>
    %c0_10 = arith.constant 0 : index
    %c0_11 = arith.constant 0 : index
    %24 = vector.load %arg4[%c0_10, %c0_11] : memref<1x256xf32, #tpu.memory_space<vmem>>, vector<1x256xf32>
    %25 = vector.broadcast %24 : vector<1x256xf32> to vector<5x256xf32>
    %26 = arith.mulf %23, %25 : vector<5x256xf32>
    %c0_12 = arith.constant 0 : index
    %c0_13 = arith.constant 0 : index
    %27 = vector.load %arg5[%c0_12, %c0_13] : memref<1x256xf32, #tpu.memory_space<vmem>>, vector<1x256xf32>
    %28 = vector.broadcast %27 : vector<1x256xf32> to vector<5x256xf32>
    %29 = arith.addf %26, %28 : vector<5x256xf32>
    %c0_14 = arith.constant 0 : index
    %c0_15 = arith.constant 0 : index
    %c0_16 = arith.constant 0 : index
    %30 = vector.load %arg6[%c0_14, %c0_15, %c0_16] : memref<1x5x256xf32, #tpu.memory_space<vmem>>, vector<1x5x256xf32>
    %31 = vector.shape_cast %30 : vector<1x5x256xf32> to vector<5x256xf32>
    %32 = vector.shape_cast %29 : vector<5x256xf32> to vector<1x5x256xf32>
    tpu.vector_store %arg6[%c0_14, %c0_15, %c0_16], %32 {strides = array<i32>} : memref<1x5x256xf32, #tpu.memory_space<vmem>>, vector<1x5x256xf32>,
    return
  }
  func.func @transform_0(%arg0: i32) -> (i32, i32, i32) {
    %c0_i32 = arith.constant 0 : i32
    %c0_i32_0 = arith.constant 0 : i32
    %c0_i32_1 = arith.constant 0 : i32
    return %arg0, %c0_i32, %c0_i32_0 : i32, i32, i32
  }
  func.func @transform_1(%arg0: i32) -> (i32, i32) {
    %c0_i32 = arith.constant 0 : i32
    %c0_i32_0 = arith.constant 0 : i32
    %c0_i32_1 = arith.constant 0 : i32
    return %c0_i32, %c0_i32_0 : i32, i32
  }
  func.func @transform_2(%arg0: i32) -> (i32, i32) {
    %c0_i32 = arith.constant 0 : i32
    %c0_i32_0 = arith.constant 0 : i32
    %c0_i32_1 = arith.constant 0 : i32
    return %c0_i32, %c0_i32_0 : i32, i32
  }
  func.func @transform_3(%arg0: i32) -> (i32, i32) {
    %c0_i32 = arith.constant 0 : i32
    %c0_i32_0 = arith.constant 0 : i32
    %c0_i32_1 = arith.constant 0 : i32
    return %c0_i32, %c0_i32_0 : i32, i32
  }
  func.func @transform_4(%arg0: i32) -> (i32, i32) {
    %c0_i32 = arith.constant 0 : i32
    %c0_i32_0 = arith.constant 0 : i32
    %c0_i32_1 = arith.constant 0 : i32
    return %c0_i32, %c0_i32_0 : i32, i32
  }
  func.func @transform_5(%arg0: i32) -> (i32, i32, i32) {
    %c0_i32 = arith.constant 0 : i32
    %c0_i32_0 = arith.constant 0 : i32
    %c0_i32_1 = arith.constant 0 : i32
    return %arg0, %c0_i32, %c0_i32_0 : i32, i32, i32
  }
}

module attributes {stable_mosaic.version = 11 : i64} {
  func.func @_attn_grouped_kernel(%arg0: i32, %arg1: i32, %arg2: memref<1x5x128xf32, #tpu.memory_space<vmem>>, %arg3: memref<1x5x128xf32, #tpu.memory_space<vmem>>, %arg4: memref<1x5x128xf32, #tpu.memory_space<vmem>>, %arg5: memref<1x5x128xf32, #tpu.memory_space<vmem>>) attributes {dimension_semantics = [#tpu.dimension_semantics<parallel>, #tpu.dimension_semantics<parallel>], iteration_bounds = array<i64: 2, 2>, scalar_prefetch = 0 : i64, scratch_operands = 0 : i64, tpu.core_type = #tpu.core_type<tc>, window_params = [{transform_indices = @transform_0, window_bounds = array<i64: 1, 5, 128>}, {transform_indices = @transform_1, window_bounds = array<i64: 1, 5, 128>}, {transform_indices = @transform_2, window_bounds = array<i64: 1, 5, 128>}, {transform_indices = @transform_3, window_bounds = array<i64: 1, 5, 128>}]} {
    %c0 = arith.constant 0 : index
    %c0_0 = arith.constant 0 : index
    %c0_1 = arith.constant 0 : index
    %0 = vector.load %arg2[%c0, %c0_0, %c0_1] : memref<1x5x128xf32, #tpu.memory_space<vmem>>, vector<1x5x64xf32>
    %1 = vector.shape_cast %0 : vector<1x5x64xf32> to vector<5x64xf32>
    %2 = arith.truncf %1 : vector<5x64xf32> to vector<5x64xbf16>
    %c0_2 = arith.constant 0 : index
    %c0_3 = arith.constant 0 : index
    %c0_4 = arith.constant 0 : index
    %3 = vector.load %arg3[%c0_2, %c0_3, %c0_4] : memref<1x5x128xf32, #tpu.memory_space<vmem>>, vector<1x5x64xf32>
    %4 = vector.shape_cast %3 : vector<1x5x64xf32> to vector<5x64xf32>
    %5 = arith.truncf %4 : vector<5x64xf32> to vector<5x64xbf16>
    %c0_5 = arith.constant 0 : index
    %c0_6 = arith.constant 0 : index
    %c0_7 = arith.constant 0 : index
    %6 = vector.load %arg4[%c0_5, %c0_6, %c0_7] : memref<1x5x128xf32, #tpu.memory_space<vmem>>, vector<1x5x64xf32>
    %7 = vector.shape_cast %6 : vector<1x5x64xf32> to vector<5x64xf32>
    %8 = arith.truncf %7 : vector<5x64xf32> to vector<5x64xbf16>
    %cst = arith.constant dense<0.000000e+00> : vector<5x5xf32>
    %9 = tpu.matmul %2, %5, %cst {dimension_numbers = #tpu.dot_dimension_numbers<[1], [1], [0], [0], [0, 0, 1, 0], [], []>} : vector<5x64xbf16>, vector<5x64xbf16>, vector<5x5xf32> -> vector<5x5xf32>
    %cst_8 = arith.constant 1.250000e-01 : f32
    %10 = vector.broadcast %cst_8 : f32 to vector<5x5xf32>
    %11 = arith.mulf %9, %10 : vector<5x5xf32>
    %cst_9 = arith.constant dense<0xFF800000> : vector<5xf32>
    %12 = vector.multi_reduction <maximumf>, %11, %cst_9 [1] : vector<5x5xf32> to vector<5xf32>
    %13 = vector.shape_cast %12 : vector<5xf32> to vector<5x1xf32>
    %14 = vector.broadcast %13 : vector<5x1xf32> to vector<5x5xf32>
    %15 = arith.subf %11, %14 : vector<5x5xf32>
    %16 = math.exp %15 : vector<5x5xf32>
    %cst_10 = arith.constant dense<0.000000e+00> : vector<5xf32>
    %17 = vector.multi_reduction <add>, %16, %cst_10 [1] : vector<5x5xf32> to vector<5xf32>
    %18 = vector.shape_cast %17 : vector<5xf32> to vector<5x1xf32>
    %19 = tpu.reciprocal %18 {approx = true} : vector<5x1xf32> -> vector<5x1xf32>
    %20 = vector.broadcast %19 : vector<5x1xf32> to vector<5x5xf32>
    %21 = arith.mulf %16, %20 : vector<5x5xf32>
    %22 = arith.truncf %21 : vector<5x5xf32> to vector<5x5xbf16>
    %cst_11 = arith.constant dense<0.000000e+00> : vector<5x64xf32>
    %23 = tpu.matmul %22, %8, %cst_11 {dimension_numbers = #tpu.dot_dimension_numbers<[1], [0], [0], [1], [0, 0, 1, 1], [], []>} : vector<5x5xbf16>, vector<5x64xbf16>, vector<5x64xf32> -> vector<5x64xf32>
    %c0_12 = arith.constant 0 : index
    %c0_13 = arith.constant 0 : index
    %c0_14 = arith.constant 0 : index
    %24 = vector.load %arg5[%c0_12, %c0_13, %c0_14] : memref<1x5x128xf32, #tpu.memory_space<vmem>>, vector<1x5x64xf32>
    %25 = vector.shape_cast %24 : vector<1x5x64xf32> to vector<5x64xf32>
    %26 = vector.shape_cast %23 : vector<5x64xf32> to vector<1x5x64xf32>
    tpu.vector_store %arg5[%c0_12, %c0_13, %c0_14], %26 {strides = array<i32>} : memref<1x5x128xf32, #tpu.memory_space<vmem>>, vector<1x5x64xf32>,
    %c0_15 = arith.constant 0 : index
    %c0_16 = arith.constant 0 : index
    %c64 = arith.constant 64 : index
    %27 = vector.load %arg2[%c0_15, %c0_16, %c64] : memref<1x5x128xf32, #tpu.memory_space<vmem>>, vector<1x5x64xf32>
    %28 = vector.shape_cast %27 : vector<1x5x64xf32> to vector<5x64xf32>
    %29 = arith.truncf %28 : vector<5x64xf32> to vector<5x64xbf16>
    %c0_17 = arith.constant 0 : index
    %c0_18 = arith.constant 0 : index
    %c64_19 = arith.constant 64 : index
    %30 = vector.load %arg3[%c0_17, %c0_18, %c64_19] : memref<1x5x128xf32, #tpu.memory_space<vmem>>, vector<1x5x64xf32>
    %31 = vector.shape_cast %30 : vector<1x5x64xf32> to vector<5x64xf32>
    %32 = arith.truncf %31 : vector<5x64xf32> to vector<5x64xbf16>
    %c0_20 = arith.constant 0 : index
    %c0_21 = arith.constant 0 : index
    %c64_22 = arith.constant 64 : index
    %33 = vector.load %arg4[%c0_20, %c0_21, %c64_22] : memref<1x5x128xf32, #tpu.memory_space<vmem>>, vector<1x5x64xf32>
    %34 = vector.shape_cast %33 : vector<1x5x64xf32> to vector<5x64xf32>
    %35 = arith.truncf %34 : vector<5x64xf32> to vector<5x64xbf16>
    %cst_23 = arith.constant dense<0.000000e+00> : vector<5x5xf32>
    %36 = tpu.matmul %29, %32, %cst_23 {dimension_numbers = #tpu.dot_dimension_numbers<[1], [1], [0], [0], [0, 0, 1, 0], [], []>} : vector<5x64xbf16>, vector<5x64xbf16>, vector<5x5xf32> -> vector<5x5xf32>
    %cst_24 = arith.constant 1.250000e-01 : f32
    %37 = vector.broadcast %cst_24 : f32 to vector<5x5xf32>
    %38 = arith.mulf %36, %37 : vector<5x5xf32>
    %cst_25 = arith.constant dense<0xFF800000> : vector<5xf32>
    %39 = vector.multi_reduction <maximumf>, %38, %cst_25 [1] : vector<5x5xf32> to vector<5xf32>
    %40 = vector.shape_cast %39 : vector<5xf32> to vector<5x1xf32>
    %41 = vector.broadcast %40 : vector<5x1xf32> to vector<5x5xf32>
    %42 = arith.subf %38, %41 : vector<5x5xf32>
    %43 = math.exp %42 : vector<5x5xf32>
    %cst_26 = arith.constant dense<0.000000e+00> : vector<5xf32>
    %44 = vector.multi_reduction <add>, %43, %cst_26 [1] : vector<5x5xf32> to vector<5xf32>
    %45 = vector.shape_cast %44 : vector<5xf32> to vector<5x1xf32>
    %46 = tpu.reciprocal %45 {approx = true} : vector<5x1xf32> -> vector<5x1xf32>
    %47 = vector.broadcast %46 : vector<5x1xf32> to vector<5x5xf32>
    %48 = arith.mulf %43, %47 : vector<5x5xf32>
    %49 = arith.truncf %48 : vector<5x5xf32> to vector<5x5xbf16>
    %cst_27 = arith.constant dense<0.000000e+00> : vector<5x64xf32>
    %50 = tpu.matmul %49, %35, %cst_27 {dimension_numbers = #tpu.dot_dimension_numbers<[1], [0], [0], [1], [0, 0, 1, 1], [], []>} : vector<5x5xbf16>, vector<5x64xbf16>, vector<5x64xf32> -> vector<5x64xf32>
    %c0_28 = arith.constant 0 : index
    %c0_29 = arith.constant 0 : index
    %c64_30 = arith.constant 64 : index
    %51 = vector.load %arg5[%c0_28, %c0_29, %c64_30] : memref<1x5x128xf32, #tpu.memory_space<vmem>>, vector<1x5x64xf32>
    %52 = vector.shape_cast %51 : vector<1x5x64xf32> to vector<5x64xf32>
    %53 = vector.shape_cast %50 : vector<5x64xf32> to vector<1x5x64xf32>
    tpu.vector_store %arg5[%c0_28, %c0_29, %c64_30], %53 {strides = array<i32>} : memref<1x5x128xf32, #tpu.memory_space<vmem>>, vector<1x5x64xf32>,
    return
  }
  func.func @transform_0(%arg0: i32, %arg1: i32) -> (i32, i32, i32) {
    %c0_i32 = arith.constant 0 : i32
    %c0_i32_0 = arith.constant 0 : i32
    return %arg0, %c0_i32, %arg1 : i32, i32, i32
  }
  func.func @transform_1(%arg0: i32, %arg1: i32) -> (i32, i32, i32) {
    %c2_i32 = arith.constant 2 : i32
    %0 = arith.addi %c2_i32, %arg1 : i32
    %c0_i32 = arith.constant 0 : i32
    %c0_i32_0 = arith.constant 0 : i32
    return %arg0, %c0_i32, %0 : i32, i32, i32
  }
  func.func @transform_2(%arg0: i32, %arg1: i32) -> (i32, i32, i32) {
    %c4_i32 = arith.constant 4 : i32
    %0 = arith.addi %c4_i32, %arg1 : i32
    %c0_i32 = arith.constant 0 : i32
    %c0_i32_0 = arith.constant 0 : i32
    return %arg0, %c0_i32, %0 : i32, i32, i32
  }
  func.func @transform_3(%arg0: i32, %arg1: i32) -> (i32, i32, i32) {
    %c0_i32 = arith.constant 0 : i32
    %c0_i32_0 = arith.constant 0 : i32
    return %arg0, %c0_i32, %arg1 : i32, i32, i32
  }
}

module attributes {stable_mosaic.version = 11 : i64} {
  func.func @_linear_kernel(%arg0: i32, %arg1: i32, %arg2: i32, %arg3: memref<16x256xf32, #tpu.memory_space<vmem>>, %arg4: memref<256x768xbf16, #tpu.memory_space<vmem>>, %arg5: memref<1x256xf32, #tpu.memory_space<vmem>>, %arg6: memref<1x256xf32, #tpu.memory_space<vmem>>, %arg7: memref<1x768xf32, #tpu.memory_space<vmem>>, %arg8: memref<16x768xf32, #tpu.memory_space<vmem>>, %arg9: memref<16x768xf32, #tpu.memory_space<vmem>>, %arg10: memref<16x256xbf16, #tpu.memory_space<vmem>>) attributes {dimension_semantics = [#tpu.dimension_semantics<parallel>, #tpu.dimension_semantics<arbitrary>, #tpu.dimension_semantics<arbitrary>], iteration_bounds = array<i64: 1, 1, 1>, scalar_prefetch = 0 : i64, scratch_operands = 2 : i64, tpu.core_type = #tpu.core_type<tc>, window_params = [{transform_indices = @transform_0, window_bounds = array<i64: 16, 256>}, {transform_indices = @transform_1, window_bounds = array<i64: 256, 768>}, {transform_indices = @transform_2, window_bounds = array<i64: 1, 256>}, {transform_indices = @transform_3, window_bounds = array<i64: 1, 256>}, {transform_indices = @transform_4, window_bounds = array<i64: 1, 768>}, {transform_indices = @transform_5, window_bounds = array<i64: 16, 768>}]} {
    %c0_i32 = arith.constant 0 : i32
    %0 = arith.cmpi eq, %arg2, %c0_i32 : i32
    %1 = arith.extui %0 : i1 to i32
    %c0_i32_0 = arith.constant 0 : i32
    %2 = arith.cmpi ne, %1, %c0_i32_0 : i32
    scf.if %2 {
      %cst_12 = arith.constant 0.000000e+00 : f32
      %15 = vector.broadcast %cst_12 : f32 to vector<16x768xf32>
      %c0_13 = arith.constant 0 : index
      %c0_14 = arith.constant 0 : index
      %16 = vector.load %arg9[%c0_13, %c0_14] : memref<16x768xf32, #tpu.memory_space<vmem>>, vector<16x768xf32>
      tpu.vector_store %arg9[%c0_13, %c0_14], %15 {strides = array<i32>} : memref<16x768xf32, #tpu.memory_space<vmem>>, vector<16x768xf32>,
    } else {
    }
    %c0_i32_1 = arith.constant 0 : i32
    %3 = arith.cmpi eq, %arg1, %c0_i32_1 : i32
    %4 = arith.extui %3 : i1 to i32
    %c0_i32_2 = arith.constant 0 : i32
    %5 = arith.cmpi ne, %4, %c0_i32_2 : i32
    scf.if %5 {
      %c0_12 = arith.constant 0 : index
      %c0_13 = arith.constant 0 : index
      %15 = vector.load %arg3[%c0_12, %c0_13] : memref<16x256xf32, #tpu.memory_space<vmem>>, vector<16x256xf32>
      %cst_14 = arith.constant dense<0.000000e+00> : vector<16xf32>
      %16 = vector.multi_reduction <add>, %15, %cst_14 [1] : vector<16x256xf32> to vector<16xf32>
      %17 = vector.shape_cast %16 : vector<16xf32> to vector<16x1xf32>
      %cst_15 = arith.constant 2.560000e+02 : f32
      %18 = vector.broadcast %cst_15 : f32 to vector<16x1xf32>
      %19 = arith.divf %17, %18 : vector<16x1xf32>
      %20 = vector.broadcast %19 : vector<16x1xf32> to vector<16x256xf32>
      %21 = arith.subf %15, %20 : vector<16x256xf32>
      %22 = arith.mulf %21, %21 : vector<16x256xf32>
      %cst_16 = arith.constant dense<0.000000e+00> : vector<16xf32>
      %23 = vector.multi_reduction <add>, %22, %cst_16 [1] : vector<16x256xf32> to vector<16xf32>
      %24 = vector.shape_cast %23 : vector<16xf32> to vector<16x1xf32>
      %cst_17 = arith.constant 2.560000e+02 : f32
      %25 = vector.broadcast %cst_17 : f32 to vector<16x1xf32>
      %26 = arith.divf %24, %25 : vector<16x1xf32>
      %27 = vector.broadcast %19 : vector<16x1xf32> to vector<16x256xf32>
      %28 = arith.subf %15, %27 : vector<16x256xf32>
      %cst_18 = arith.constant 9.99999974E-6 : f32
      %29 = vector.broadcast %cst_18 : f32 to vector<16x1xf32>
      %30 = arith.addf %26, %29 : vector<16x1xf32>
      %31 = math.rsqrt %30 : vector<16x1xf32>
      %32 = vector.broadcast %31 : vector<16x1xf32> to vector<16x256xf32>
      %33 = arith.mulf %28, %32 : vector<16x256xf32>
      %c0_19 = arith.constant 0 : index
      %c0_20 = arith.constant 0 : index
      %34 = vector.load %arg5[%c0_19, %c0_20] : memref<1x256xf32, #tpu.memory_space<vmem>>, vector<1x256xf32>
      %35 = vector.broadcast %34 : vector<1x256xf32> to vector<16x256xf32>
      %36 = arith.mulf %33, %35 : vector<16x256xf32>
      %c0_21 = arith.constant 0 : index
      %c0_22 = arith.constant 0 : index
      %37 = vector.load %arg6[%c0_21, %c0_22] : memref<1x256xf32, #tpu.memory_space<vmem>>, vector<1x256xf32>
      %38 = vector.broadcast %37 : vector<1x256xf32> to vector<16x256xf32>
      %39 = arith.addf %36, %38 : vector<16x256xf32>
      %40 = arith.truncf %39 : vector<16x256xf32> to vector<16x256xbf16>
      %c0_23 = arith.constant 0 : index
      %c0_24 = arith.constant 0 : index
      %41 = vector.load %arg10[%c0_23, %c0_24] : memref<16x256xbf16, #tpu.memory_space<vmem>>, vector<16x256xbf16>
      tpu.vector_store %arg10[%c0_23, %c0_24], %40 {strides = array<i32>} : memref<16x256xbf16, #tpu.memory_space<vmem>>, vector<16x256xbf16>,
    } else {
    }
    %c0 = arith.constant 0 : index
    %c0_3 = arith.constant 0 : index
    %6 = vector.load %arg10[%c0, %c0_3] : memref<16x256xbf16, #tpu.memory_space<vmem>>, vector<16x256xbf16>
    %c0_4 = arith.constant 0 : index
    %c0_5 = arith.constant 0 : index
    %7 = vector.load %arg9[%c0_4, %c0_5] : memref<16x768xf32, #tpu.memory_space<vmem>>, vector<16x768xf32>
    %c0_6 = arith.constant 0 : index
    %c0_7 = arith.constant 0 : index
    %8 = vector.load %arg4[%c0_6, %c0_7] : memref<256x768xbf16, #tpu.memory_space<vmem>>, vector<256x768xbf16>
    %cst = arith.constant dense<0.000000e+00> : vector<16x768xf32>
    %9 = tpu.matmul %6, %8, %cst {dimension_numbers = #tpu.dot_dimension_numbers<[1], [0], [0], [1], [0, 0, 1, 1], [], []>} : vector<16x256xbf16>, vector<256x768xbf16>, vector<16x768xf32> -> vector<16x768xf32>
    %10 = arith.addf %7, %9 : vector<16x768xf32>
    %c0_8 = arith.constant 0 : index
    %c0_9 = arith.constant 0 : index
    %11 = vector.load %arg9[%c0_8, %c0_9] : memref<16x768xf32, #tpu.memory_space<vmem>>, vector<16x768xf32>
    tpu.vector_store %arg9[%c0_8, %c0_9], %10 {strides = array<i32>} : memref<16x768xf32, #tpu.memory_space<vmem>>, vector<16x768xf32>,
    %c0_i32_10 = arith.constant 0 : i32
    %12 = arith.cmpi eq, %arg2, %c0_i32_10 : i32
    %13 = arith.extui %12 : i1 to i32
    %c0_i32_11 = arith.constant 0 : i32
    %14 = arith.cmpi ne, %13, %c0_i32_11 : i32
    scf.if %14 {
      %c0_12 = arith.constant 0 : index
      %c0_13 = arith.constant 0 : index
      %15 = vector.load %arg9[%c0_12, %c0_13] : memref<16x768xf32, #tpu.memory_space<vmem>>, vector<16x768xf32>
      %c0_14 = arith.constant 0 : index
      %c0_15 = arith.constant 0 : index
      %16 = vector.load %arg7[%c0_14, %c0_15] : memref<1x768xf32, #tpu.memory_space<vmem>>, vector<1x768xf32>
      %17 = vector.broadcast %16 : vector<1x768xf32> to vector<16x768xf32>
      %18 = arith.addf %15, %17 : vector<16x768xf32>
      %c0_16 = arith.constant 0 : index
      %c0_17 = arith.constant 0 : index
      %19 = vector.load %arg8[%c0_16, %c0_17] : memref<16x768xf32, #tpu.memory_space<vmem>>, vector<16x768xf32>
      tpu.vector_store %arg8[%c0_16, %c0_17], %18 {strides = array<i32>} : memref<16x768xf32, #tpu.memory_space<vmem>>, vector<16x768xf32>,
    } else {
    }
    return
  }
  func.func @transform_0(%arg0: i32, %arg1: i32, %arg2: i32) -> (i32, i32) {
    %c0_i32 = arith.constant 0 : i32
    return %arg0, %arg2 : i32, i32
  }
  func.func @transform_1(%arg0: i32, %arg1: i32, %arg2: i32) -> (i32, i32) {
    %c0_i32 = arith.constant 0 : i32
    return %arg2, %arg1 : i32, i32
  }
  func.func @transform_2(%arg0: i32, %arg1: i32, %arg2: i32) -> (i32, i32) {
    %c0_i32 = arith.constant 0 : i32
    %c0_i32_0 = arith.constant 0 : i32
    return %c0_i32, %arg2 : i32, i32
  }
  func.func @transform_3(%arg0: i32, %arg1: i32, %arg2: i32) -> (i32, i32) {
    %c0_i32 = arith.constant 0 : i32
    %c0_i32_0 = arith.constant 0 : i32
    return %c0_i32, %arg2 : i32, i32
  }
  func.func @transform_4(%arg0: i32, %arg1: i32, %arg2: i32) -> (i32, i32) {
    %c0_i32 = arith.constant 0 : i32
    %c0_i32_0 = arith.constant 0 : i32
    return %c0_i32, %arg1 : i32, i32
  }
  func.func @transform_5(%arg0: i32, %arg1: i32, %arg2: i32) -> (i32, i32) {
    %c0_i32 = arith.constant 0 : i32
    return %arg0, %arg1 : i32, i32
  }
}

module attributes {stable_mosaic.version = 11 : i64} {
  func.func @_linear_kernel(%arg0: i32, %arg1: i32, %arg2: i32, %arg3: memref<16x256xf32, #tpu.memory_space<vmem>>, %arg4: memref<256x256xbf16, #tpu.memory_space<vmem>>, %arg5: memref<1x256xf32, #tpu.memory_space<vmem>>, %arg6: memref<16x256xf32, #tpu.memory_space<vmem>>, %arg7: memref<16x256xf32, #tpu.memory_space<vmem>>, %arg8: memref<16x256xf32, #tpu.memory_space<vmem>>) attributes {dimension_semantics = [#tpu.dimension_semantics<parallel>, #tpu.dimension_semantics<parallel>, #tpu.dimension_semantics<arbitrary>], iteration_bounds = array<i64: 1, 1, 1>, scalar_prefetch = 0 : i64, scratch_operands = 1 : i64, tpu.core_type = #tpu.core_type<tc>, window_params = [{transform_indices = @transform_0, window_bounds = array<i64: 16, 256>}, {transform_indices = @transform_1, window_bounds = array<i64: 256, 256>}, {transform_indices = @transform_2, window_bounds = array<i64: 1, 256>}, {transform_indices = @transform_3, window_bounds = array<i64: 16, 256>}, {transform_indices = @transform_4, window_bounds = array<i64: 16, 256>}]} {
    %c0_i32 = arith.constant 0 : i32
    %0 = arith.cmpi eq, %arg2, %c0_i32 : i32
    %1 = arith.extui %0 : i1 to i32
    %c0_i32_0 = arith.constant 0 : i32
    %2 = arith.cmpi ne, %1, %c0_i32_0 : i32
    scf.if %2 {
      %cst_10 = arith.constant 0.000000e+00 : f32
      %13 = vector.broadcast %cst_10 : f32 to vector<16x256xf32>
      %c0_11 = arith.constant 0 : index
      %c0_12 = arith.constant 0 : index
      %14 = vector.load %arg8[%c0_11, %c0_12] : memref<16x256xf32, #tpu.memory_space<vmem>>, vector<16x256xf32>
      tpu.vector_store %arg8[%c0_11, %c0_12], %13 {strides = array<i32>} : memref<16x256xf32, #tpu.memory_space<vmem>>, vector<16x256xf32>,
    } else {
    }
    %c0 = arith.constant 0 : index
    %c0_1 = arith.constant 0 : index
    %3 = vector.load %arg3[%c0, %c0_1] : memref<16x256xf32, #tpu.memory_space<vmem>>, vector<16x256xf32>
    %4 = arith.truncf %3 : vector<16x256xf32> to vector<16x256xbf16>
    %c0_2 = arith.constant 0 : index
    %c0_3 = arith.constant 0 : index
    %5 = vector.load %arg8[%c0_2, %c0_3] : memref<16x256xf32, #tpu.memory_space<vmem>>, vector<16x256xf32>
    %c0_4 = arith.constant 0 : index
    %c0_5 = arith.constant 0 : index
    %6 = vector.load %arg4[%c0_4, %c0_5] : memref<256x256xbf16, #tpu.memory_space<vmem>>, vector<256x256xbf16>
    %cst = arith.constant dense<0.000000e+00> : vector<16x256xf32>
    %7 = tpu.matmul %4, %6, %cst {dimension_numbers = #tpu.dot_dimension_numbers<[1], [0], [0], [1], [0, 0, 1, 1], [], []>} : vector<16x256xbf16>, vector<256x256xbf16>, vector<16x256xf32> -> vector<16x256xf32>
    %8 = arith.addf %5, %7 : vector<16x256xf32>
    %c0_6 = arith.constant 0 : index
    %c0_7 = arith.constant 0 : index
    %9 = vector.load %arg8[%c0_6, %c0_7] : memref<16x256xf32, #tpu.memory_space<vmem>>, vector<16x256xf32>
    tpu.vector_store %arg8[%c0_6, %c0_7], %8 {strides = array<i32>} : memref<16x256xf32, #tpu.memory_space<vmem>>, vector<16x256xf32>,
    %c0_i32_8 = arith.constant 0 : i32
    %10 = arith.cmpi eq, %arg2, %c0_i32_8 : i32
    %11 = arith.extui %10 : i1 to i32
    %c0_i32_9 = arith.constant 0 : i32
    %12 = arith.cmpi ne, %11, %c0_i32_9 : i32
    scf.if %12 {
      %c0_10 = arith.constant 0 : index
      %c0_11 = arith.constant 0 : index
      %13 = vector.load %arg8[%c0_10, %c0_11] : memref<16x256xf32, #tpu.memory_space<vmem>>, vector<16x256xf32>
      %c0_12 = arith.constant 0 : index
      %c0_13 = arith.constant 0 : index
      %14 = vector.load %arg5[%c0_12, %c0_13] : memref<1x256xf32, #tpu.memory_space<vmem>>, vector<1x256xf32>
      %15 = vector.broadcast %14 : vector<1x256xf32> to vector<16x256xf32>
      %16 = arith.addf %13, %15 : vector<16x256xf32>
      %c0_14 = arith.constant 0 : index
      %c0_15 = arith.constant 0 : index
      %17 = vector.load %arg6[%c0_14, %c0_15] : memref<16x256xf32, #tpu.memory_space<vmem>>, vector<16x256xf32>
      %18 = arith.addf %16, %17 : vector<16x256xf32>
      %c0_16 = arith.constant 0 : index
      %c0_17 = arith.constant 0 : index
      %19 = vector.load %arg7[%c0_16, %c0_17] : memref<16x256xf32, #tpu.memory_space<vmem>>, vector<16x256xf32>
      tpu.vector_store %arg7[%c0_16, %c0_17], %18 {strides = array<i32>} : memref<16x256xf32, #tpu.memory_space<vmem>>, vector<16x256xf32>,
    } else {
    }
    return
  }
  func.func @transform_0(%arg0: i32, %arg1: i32, %arg2: i32) -> (i32, i32) {
    %c0_i32 = arith.constant 0 : i32
    return %arg0, %arg2 : i32, i32
  }
  func.func @transform_1(%arg0: i32, %arg1: i32, %arg2: i32) -> (i32, i32) {
    %c0_i32 = arith.constant 0 : i32
    return %arg2, %arg1 : i32, i32
  }
  func.func @transform_2(%arg0: i32, %arg1: i32, %arg2: i32) -> (i32, i32) {
    %c0_i32 = arith.constant 0 : i32
    %c0_i32_0 = arith.constant 0 : i32
    return %c0_i32, %arg1 : i32, i32
  }
  func.func @transform_3(%arg0: i32, %arg1: i32, %arg2: i32) -> (i32, i32) {
    %c0_i32 = arith.constant 0 : i32
    return %arg0, %arg1 : i32, i32
  }
  func.func @transform_4(%arg0: i32, %arg1: i32, %arg2: i32) -> (i32, i32) {
    %c0_i32 = arith.constant 0 : i32
    return %arg0, %arg1 : i32, i32
  }
}

module attributes {stable_mosaic.version = 11 : i64} {
  func.func @_linear_kernel(%arg0: i32, %arg1: i32, %arg2: i32, %arg3: memref<16x256xf32, #tpu.memory_space<vmem>>, %arg4: memref<256x1024xbf16, #tpu.memory_space<vmem>>, %arg5: memref<1x256xf32, #tpu.memory_space<vmem>>, %arg6: memref<1x256xf32, #tpu.memory_space<vmem>>, %arg7: memref<1x1024xf32, #tpu.memory_space<vmem>>, %arg8: memref<16x1024xf32, #tpu.memory_space<vmem>>, %arg9: memref<16x1024xf32, #tpu.memory_space<vmem>>, %arg10: memref<16x256xbf16, #tpu.memory_space<vmem>>) attributes {dimension_semantics = [#tpu.dimension_semantics<parallel>, #tpu.dimension_semantics<arbitrary>, #tpu.dimension_semantics<arbitrary>], iteration_bounds = array<i64: 1, 1, 1>, scalar_prefetch = 0 : i64, scratch_operands = 2 : i64, tpu.core_type = #tpu.core_type<tc>, window_params = [{transform_indices = @transform_0, window_bounds = array<i64: 16, 256>}, {transform_indices = @transform_1, window_bounds = array<i64: 256, 1024>}, {transform_indices = @transform_2, window_bounds = array<i64: 1, 256>}, {transform_indices = @transform_3, window_bounds = array<i64: 1, 256>}, {transform_indices = @transform_4, window_bounds = array<i64: 1, 1024>}, {transform_indices = @transform_5, window_bounds = array<i64: 16, 1024>}]} {
    %c0_i32 = arith.constant 0 : i32
    %0 = arith.cmpi eq, %arg2, %c0_i32 : i32
    %1 = arith.extui %0 : i1 to i32
    %c0_i32_0 = arith.constant 0 : i32
    %2 = arith.cmpi ne, %1, %c0_i32_0 : i32
    scf.if %2 {
      %cst_12 = arith.constant 0.000000e+00 : f32
      %15 = vector.broadcast %cst_12 : f32 to vector<16x1024xf32>
      %c0_13 = arith.constant 0 : index
      %c0_14 = arith.constant 0 : index
      %16 = vector.load %arg9[%c0_13, %c0_14] : memref<16x1024xf32, #tpu.memory_space<vmem>>, vector<16x1024xf32>
      tpu.vector_store %arg9[%c0_13, %c0_14], %15 {strides = array<i32>} : memref<16x1024xf32, #tpu.memory_space<vmem>>, vector<16x1024xf32>,
    } else {
    }
    %c0_i32_1 = arith.constant 0 : i32
    %3 = arith.cmpi eq, %arg1, %c0_i32_1 : i32
    %4 = arith.extui %3 : i1 to i32
    %c0_i32_2 = arith.constant 0 : i32
    %5 = arith.cmpi ne, %4, %c0_i32_2 : i32
    scf.if %5 {
      %c0_12 = arith.constant 0 : index
      %c0_13 = arith.constant 0 : index
      %15 = vector.load %arg3[%c0_12, %c0_13] : memref<16x256xf32, #tpu.memory_space<vmem>>, vector<16x256xf32>
      %cst_14 = arith.constant dense<0.000000e+00> : vector<16xf32>
      %16 = vector.multi_reduction <add>, %15, %cst_14 [1] : vector<16x256xf32> to vector<16xf32>
      %17 = vector.shape_cast %16 : vector<16xf32> to vector<16x1xf32>
      %cst_15 = arith.constant 2.560000e+02 : f32
      %18 = vector.broadcast %cst_15 : f32 to vector<16x1xf32>
      %19 = arith.divf %17, %18 : vector<16x1xf32>
      %20 = vector.broadcast %19 : vector<16x1xf32> to vector<16x256xf32>
      %21 = arith.subf %15, %20 : vector<16x256xf32>
      %22 = arith.mulf %21, %21 : vector<16x256xf32>
      %cst_16 = arith.constant dense<0.000000e+00> : vector<16xf32>
      %23 = vector.multi_reduction <add>, %22, %cst_16 [1] : vector<16x256xf32> to vector<16xf32>
      %24 = vector.shape_cast %23 : vector<16xf32> to vector<16x1xf32>
      %cst_17 = arith.constant 2.560000e+02 : f32
      %25 = vector.broadcast %cst_17 : f32 to vector<16x1xf32>
      %26 = arith.divf %24, %25 : vector<16x1xf32>
      %27 = vector.broadcast %19 : vector<16x1xf32> to vector<16x256xf32>
      %28 = arith.subf %15, %27 : vector<16x256xf32>
      %cst_18 = arith.constant 9.99999974E-6 : f32
      %29 = vector.broadcast %cst_18 : f32 to vector<16x1xf32>
      %30 = arith.addf %26, %29 : vector<16x1xf32>
      %31 = math.rsqrt %30 : vector<16x1xf32>
      %32 = vector.broadcast %31 : vector<16x1xf32> to vector<16x256xf32>
      %33 = arith.mulf %28, %32 : vector<16x256xf32>
      %c0_19 = arith.constant 0 : index
      %c0_20 = arith.constant 0 : index
      %34 = vector.load %arg5[%c0_19, %c0_20] : memref<1x256xf32, #tpu.memory_space<vmem>>, vector<1x256xf32>
      %35 = vector.broadcast %34 : vector<1x256xf32> to vector<16x256xf32>
      %36 = arith.mulf %33, %35 : vector<16x256xf32>
      %c0_21 = arith.constant 0 : index
      %c0_22 = arith.constant 0 : index
      %37 = vector.load %arg6[%c0_21, %c0_22] : memref<1x256xf32, #tpu.memory_space<vmem>>, vector<1x256xf32>
      %38 = vector.broadcast %37 : vector<1x256xf32> to vector<16x256xf32>
      %39 = arith.addf %36, %38 : vector<16x256xf32>
      %40 = arith.truncf %39 : vector<16x256xf32> to vector<16x256xbf16>
      %c0_23 = arith.constant 0 : index
      %c0_24 = arith.constant 0 : index
      %41 = vector.load %arg10[%c0_23, %c0_24] : memref<16x256xbf16, #tpu.memory_space<vmem>>, vector<16x256xbf16>
      tpu.vector_store %arg10[%c0_23, %c0_24], %40 {strides = array<i32>} : memref<16x256xbf16, #tpu.memory_space<vmem>>, vector<16x256xbf16>,
    } else {
    }
    %c0 = arith.constant 0 : index
    %c0_3 = arith.constant 0 : index
    %6 = vector.load %arg10[%c0, %c0_3] : memref<16x256xbf16, #tpu.memory_space<vmem>>, vector<16x256xbf16>
    %c0_4 = arith.constant 0 : index
    %c0_5 = arith.constant 0 : index
    %7 = vector.load %arg9[%c0_4, %c0_5] : memref<16x1024xf32, #tpu.memory_space<vmem>>, vector<16x1024xf32>
    %c0_6 = arith.constant 0 : index
    %c0_7 = arith.constant 0 : index
    %8 = vector.load %arg4[%c0_6, %c0_7] : memref<256x1024xbf16, #tpu.memory_space<vmem>>, vector<256x1024xbf16>
    %cst = arith.constant dense<0.000000e+00> : vector<16x1024xf32>
    %9 = tpu.matmul %6, %8, %cst {dimension_numbers = #tpu.dot_dimension_numbers<[1], [0], [0], [1], [0, 0, 1, 1], [], []>} : vector<16x256xbf16>, vector<256x1024xbf16>, vector<16x1024xf32> -> vector<16x1024xf32>
    %10 = arith.addf %7, %9 : vector<16x1024xf32>
    %c0_8 = arith.constant 0 : index
    %c0_9 = arith.constant 0 : index
    %11 = vector.load %arg9[%c0_8, %c0_9] : memref<16x1024xf32, #tpu.memory_space<vmem>>, vector<16x1024xf32>
    tpu.vector_store %arg9[%c0_8, %c0_9], %10 {strides = array<i32>} : memref<16x1024xf32, #tpu.memory_space<vmem>>, vector<16x1024xf32>,
    %c0_i32_10 = arith.constant 0 : i32
    %12 = arith.cmpi eq, %arg2, %c0_i32_10 : i32
    %13 = arith.extui %12 : i1 to i32
    %c0_i32_11 = arith.constant 0 : i32
    %14 = arith.cmpi ne, %13, %c0_i32_11 : i32
    scf.if %14 {
      %c0_12 = arith.constant 0 : index
      %c0_13 = arith.constant 0 : index
      %15 = vector.load %arg9[%c0_12, %c0_13] : memref<16x1024xf32, #tpu.memory_space<vmem>>, vector<16x1024xf32>
      %c0_14 = arith.constant 0 : index
      %c0_15 = arith.constant 0 : index
      %16 = vector.load %arg7[%c0_14, %c0_15] : memref<1x1024xf32, #tpu.memory_space<vmem>>, vector<1x1024xf32>
      %17 = vector.broadcast %16 : vector<1x1024xf32> to vector<16x1024xf32>
      %18 = arith.addf %15, %17 : vector<16x1024xf32>
      %cst_16 = arith.constant 1.702000e+00 : f32
      %19 = vector.broadcast %cst_16 : f32 to vector<16x1024xf32>
      %20 = arith.mulf %19, %18 : vector<16x1024xf32>
      %21 = arith.negf %20 : vector<16x1024xf32>
      %22 = math.exp %21 : vector<16x1024xf32>
      %cst_17 = arith.constant 1.000000e+00 : f32
      %23 = vector.broadcast %cst_17 : f32 to vector<16x1024xf32>
      %24 = arith.addf %23, %22 : vector<16x1024xf32>
      %25 = arith.divf %23, %24 : vector<16x1024xf32>
      %26 = arith.mulf %18, %25 : vector<16x1024xf32>
      %c0_18 = arith.constant 0 : index
      %c0_19 = arith.constant 0 : index
      %27 = vector.load %arg8[%c0_18, %c0_19] : memref<16x1024xf32, #tpu.memory_space<vmem>>, vector<16x1024xf32>
      tpu.vector_store %arg8[%c0_18, %c0_19], %26 {strides = array<i32>} : memref<16x1024xf32, #tpu.memory_space<vmem>>, vector<16x1024xf32>,
    } else {
    }
    return
  }
  func.func @transform_0(%arg0: i32, %arg1: i32, %arg2: i32) -> (i32, i32) {
    %c0_i32 = arith.constant 0 : i32
    return %arg0, %arg2 : i32, i32
  }
  func.func @transform_1(%arg0: i32, %arg1: i32, %arg2: i32) -> (i32, i32) {
    %c0_i32 = arith.constant 0 : i32
    return %arg2, %arg1 : i32, i32
  }
  func.func @transform_2(%arg0: i32, %arg1: i32, %arg2: i32) -> (i32, i32) {
    %c0_i32 = arith.constant 0 : i32
    %c0_i32_0 = arith.constant 0 : i32
    return %c0_i32, %arg2 : i32, i32
  }
  func.func @transform_3(%arg0: i32, %arg1: i32, %arg2: i32) -> (i32, i32) {
    %c0_i32 = arith.constant 0 : i32
    %c0_i32_0 = arith.constant 0 : i32
    return %c0_i32, %arg2 : i32, i32
  }
  func.func @transform_4(%arg0: i32, %arg1: i32, %arg2: i32) -> (i32, i32) {
    %c0_i32 = arith.constant 0 : i32
    %c0_i32_0 = arith.constant 0 : i32
    return %c0_i32, %arg1 : i32, i32
  }
  func.func @transform_5(%arg0: i32, %arg1: i32, %arg2: i32) -> (i32, i32) {
    %c0_i32 = arith.constant 0 : i32
    return %arg0, %arg1 : i32, i32
  }
}

module attributes {stable_mosaic.version = 11 : i64} {
  func.func @_linear_kernel(%arg0: i32, %arg1: i32, %arg2: i32, %arg3: memref<16x512xf32, #tpu.memory_space<vmem>>, %arg4: memref<512x256xbf16, #tpu.memory_space<vmem>>, %arg5: memref<1x256xf32, #tpu.memory_space<vmem>>, %arg6: memref<16x256xf32, #tpu.memory_space<vmem>>, %arg7: memref<16x256xf32, #tpu.memory_space<vmem>>, %arg8: memref<16x256xf32, #tpu.memory_space<vmem>>) attributes {dimension_semantics = [#tpu.dimension_semantics<parallel>, #tpu.dimension_semantics<parallel>, #tpu.dimension_semantics<arbitrary>], iteration_bounds = array<i64: 1, 1, 2>, scalar_prefetch = 0 : i64, scratch_operands = 1 : i64, tpu.core_type = #tpu.core_type<tc>, window_params = [{transform_indices = @transform_0, window_bounds = array<i64: 16, 512>}, {transform_indices = @transform_1, window_bounds = array<i64: 512, 256>}, {transform_indices = @transform_2, window_bounds = array<i64: 1, 256>}, {transform_indices = @transform_3, window_bounds = array<i64: 16, 256>}, {transform_indices = @transform_4, window_bounds = array<i64: 16, 256>}]} {
    %c0_i32 = arith.constant 0 : i32
    %0 = arith.cmpi eq, %arg2, %c0_i32 : i32
    %1 = arith.extui %0 : i1 to i32
    %c0_i32_0 = arith.constant 0 : i32
    %2 = arith.cmpi ne, %1, %c0_i32_0 : i32
    scf.if %2 {
      %cst_9 = arith.constant 0.000000e+00 : f32
      %13 = vector.broadcast %cst_9 : f32 to vector<16x256xf32>
      %c0_10 = arith.constant 0 : index
      %c0_11 = arith.constant 0 : index
      %14 = vector.load %arg8[%c0_10, %c0_11] : memref<16x256xf32, #tpu.memory_space<vmem>>, vector<16x256xf32>
      tpu.vector_store %arg8[%c0_10, %c0_11], %13 {strides = array<i32>} : memref<16x256xf32, #tpu.memory_space<vmem>>, vector<16x256xf32>,
    } else {
    }
    %c0 = arith.constant 0 : index
    %c0_1 = arith.constant 0 : index
    %3 = vector.load %arg3[%c0, %c0_1] : memref<16x512xf32, #tpu.memory_space<vmem>>, vector<16x512xf32>
    %4 = arith.truncf %3 : vector<16x512xf32> to vector<16x512xbf16>
    %c0_2 = arith.constant 0 : index
    %c0_3 = arith.constant 0 : index
    %5 = vector.load %arg8[%c0_2, %c0_3] : memref<16x256xf32, #tpu.memory_space<vmem>>, vector<16x256xf32>
    %c0_4 = arith.constant 0 : index
    %c0_5 = arith.constant 0 : index
    %6 = vector.load %arg4[%c0_4, %c0_5] : memref<512x256xbf16, #tpu.memory_space<vmem>>, vector<512x256xbf16>
    %cst = arith.constant dense<0.000000e+00> : vector<16x256xf32>
    %7 = tpu.matmul %4, %6, %cst {dimension_numbers = #tpu.dot_dimension_numbers<[1], [0], [0], [1], [0, 0, 1, 1], [], []>} : vector<16x512xbf16>, vector<512x256xbf16>, vector<16x256xf32> -> vector<16x256xf32>
    %8 = arith.addf %5, %7 : vector<16x256xf32>
    %c0_6 = arith.constant 0 : index
    %c0_7 = arith.constant 0 : index
    %9 = vector.load %arg8[%c0_6, %c0_7] : memref<16x256xf32, #tpu.memory_space<vmem>>, vector<16x256xf32>
    tpu.vector_store %arg8[%c0_6, %c0_7], %8 {strides = array<i32>} : memref<16x256xf32, #tpu.memory_space<vmem>>, vector<16x256xf32>,
    %c1_i32 = arith.constant 1 : i32
    %10 = arith.cmpi eq, %arg2, %c1_i32 : i32
    %11 = arith.extui %10 : i1 to i32
    %c0_i32_8 = arith.constant 0 : i32
    %12 = arith.cmpi ne, %11, %c0_i32_8 : i32
    scf.if %12 {
      %c0_9 = arith.constant 0 : index
      %c0_10 = arith.constant 0 : index
      %13 = vector.load %arg8[%c0_9, %c0_10] : memref<16x256xf32, #tpu.memory_space<vmem>>, vector<16x256xf32>
      %c0_11 = arith.constant 0 : index
      %c0_12 = arith.constant 0 : index
      %14 = vector.load %arg5[%c0_11, %c0_12] : memref<1x256xf32, #tpu.memory_space<vmem>>, vector<1x256xf32>
      %15 = vector.broadcast %14 : vector<1x256xf32> to vector<16x256xf32>
      %16 = arith.addf %13, %15 : vector<16x256xf32>
      %c0_13 = arith.constant 0 : index
      %c0_14 = arith.constant 0 : index
      %17 = vector.load %arg6[%c0_13, %c0_14] : memref<16x256xf32, #tpu.memory_space<vmem>>, vector<16x256xf32>
      %18 = arith.addf %16, %17 : vector<16x256xf32>
      %c0_15 = arith.constant 0 : index
      %c0_16 = arith.constant 0 : index
      %19 = vector.load %arg7[%c0_15, %c0_16] : memref<16x256xf32, #tpu.memory_space<vmem>>, vector<16x256xf32>
      tpu.vector_store %arg7[%c0_15, %c0_16], %18 {strides = array<i32>} : memref<16x256xf32, #tpu.memory_space<vmem>>, vector<16x256xf32>,
    } else {
    }
    return
  }
  func.func @transform_0(%arg0: i32, %arg1: i32, %arg2: i32) -> (i32, i32) {
    %c0_i32 = arith.constant 0 : i32
    return %arg0, %arg2 : i32, i32
  }
  func.func @transform_1(%arg0: i32, %arg1: i32, %arg2: i32) -> (i32, i32) {
    %c0_i32 = arith.constant 0 : i32
    return %arg2, %arg1 : i32, i32
  }
  func.func @transform_2(%arg0: i32, %arg1: i32, %arg2: i32) -> (i32, i32) {
    %c0_i32 = arith.constant 0 : i32
    %c0_i32_0 = arith.constant 0 : i32
    return %c0_i32, %arg1 : i32, i32
  }
  func.func @transform_3(%arg0: i32, %arg1: i32, %arg2: i32) -> (i32, i32) {
    %c0_i32 = arith.constant 0 : i32
    return %arg0, %arg1 : i32, i32
  }
  func.func @transform_4(%arg0: i32, %arg1: i32, %arg2: i32) -> (i32, i32) {
    %c0_i32 = arith.constant 0 : i32
    return %arg0, %arg1 : i32, i32
  }
}

module attributes {stable_mosaic.version = 11 : i64} {
  func.func @_linear_kernel(%arg0: i32, %arg1: i32, %arg2: i32, %arg3: memref<8x256xf32, #tpu.memory_space<vmem>>, %arg4: memref<256x128xbf16, #tpu.memory_space<vmem>>, %arg5: memref<1x256xf32, #tpu.memory_space<vmem>>, %arg6: memref<1x256xf32, #tpu.memory_space<vmem>>, %arg7: memref<8x128xf32, #tpu.memory_space<vmem>>, %arg8: memref<8x128xf32, #tpu.memory_space<vmem>>, %arg9: memref<8x256xbf16, #tpu.memory_space<vmem>>) attributes {dimension_semantics = [#tpu.dimension_semantics<parallel>, #tpu.dimension_semantics<arbitrary>, #tpu.dimension_semantics<arbitrary>], iteration_bounds = array<i64: 1, 1, 1>, scalar_prefetch = 0 : i64, scratch_operands = 2 : i64, tpu.core_type = #tpu.core_type<tc>, window_params = [{transform_indices = @transform_0, window_bounds = array<i64: 8, 256>}, {transform_indices = @transform_1, window_bounds = array<i64: 256, 128>}, {transform_indices = @transform_2, window_bounds = array<i64: 1, 256>}, {transform_indices = @transform_3, window_bounds = array<i64: 1, 256>}, {transform_indices = @transform_4, window_bounds = array<i64: 8, 128>}]} {
    %c0_i32 = arith.constant 0 : i32
    %0 = arith.cmpi eq, %arg2, %c0_i32 : i32
    %1 = arith.extui %0 : i1 to i32
    %c0_i32_0 = arith.constant 0 : i32
    %2 = arith.cmpi ne, %1, %c0_i32_0 : i32
    scf.if %2 {
      %cst_12 = arith.constant 0.000000e+00 : f32
      %15 = vector.broadcast %cst_12 : f32 to vector<8x128xf32>
      %c0_13 = arith.constant 0 : index
      %c0_14 = arith.constant 0 : index
      %16 = vector.load %arg8[%c0_13, %c0_14] : memref<8x128xf32, #tpu.memory_space<vmem>>, vector<8x128xf32>
      tpu.vector_store %arg8[%c0_13, %c0_14], %15 {strides = array<i32>} : memref<8x128xf32, #tpu.memory_space<vmem>>, vector<8x128xf32>,
    } else {
    }
    %c0_i32_1 = arith.constant 0 : i32
    %3 = arith.cmpi eq, %arg1, %c0_i32_1 : i32
    %4 = arith.extui %3 : i1 to i32
    %c0_i32_2 = arith.constant 0 : i32
    %5 = arith.cmpi ne, %4, %c0_i32_2 : i32
    scf.if %5 {
      %c0_12 = arith.constant 0 : index
      %c0_13 = arith.constant 0 : index
      %15 = vector.load %arg3[%c0_12, %c0_13] : memref<8x256xf32, #tpu.memory_space<vmem>>, vector<8x256xf32>
      %cst_14 = arith.constant dense<0.000000e+00> : vector<8xf32>
      %16 = vector.multi_reduction <add>, %15, %cst_14 [1] : vector<8x256xf32> to vector<8xf32>
      %17 = vector.shape_cast %16 : vector<8xf32> to vector<8x1xf32>
      %cst_15 = arith.constant 2.560000e+02 : f32
      %18 = vector.broadcast %cst_15 : f32 to vector<8x1xf32>
      %19 = arith.divf %17, %18 : vector<8x1xf32>
      %20 = vector.broadcast %19 : vector<8x1xf32> to vector<8x256xf32>
      %21 = arith.subf %15, %20 : vector<8x256xf32>
      %22 = arith.mulf %21, %21 : vector<8x256xf32>
      %cst_16 = arith.constant dense<0.000000e+00> : vector<8xf32>
      %23 = vector.multi_reduction <add>, %22, %cst_16 [1] : vector<8x256xf32> to vector<8xf32>
      %24 = vector.shape_cast %23 : vector<8xf32> to vector<8x1xf32>
      %cst_17 = arith.constant 2.560000e+02 : f32
      %25 = vector.broadcast %cst_17 : f32 to vector<8x1xf32>
      %26 = arith.divf %24, %25 : vector<8x1xf32>
      %27 = vector.broadcast %19 : vector<8x1xf32> to vector<8x256xf32>
      %28 = arith.subf %15, %27 : vector<8x256xf32>
      %cst_18 = arith.constant 9.99999974E-6 : f32
      %29 = vector.broadcast %cst_18 : f32 to vector<8x1xf32>
      %30 = arith.addf %26, %29 : vector<8x1xf32>
      %31 = math.rsqrt %30 : vector<8x1xf32>
      %32 = vector.broadcast %31 : vector<8x1xf32> to vector<8x256xf32>
      %33 = arith.mulf %28, %32 : vector<8x256xf32>
      %c0_19 = arith.constant 0 : index
      %c0_20 = arith.constant 0 : index
      %34 = vector.load %arg5[%c0_19, %c0_20] : memref<1x256xf32, #tpu.memory_space<vmem>>, vector<1x256xf32>
      %35 = vector.broadcast %34 : vector<1x256xf32> to vector<8x256xf32>
      %36 = arith.mulf %33, %35 : vector<8x256xf32>
      %c0_21 = arith.constant 0 : index
      %c0_22 = arith.constant 0 : index
      %37 = vector.load %arg6[%c0_21, %c0_22] : memref<1x256xf32, #tpu.memory_space<vmem>>, vector<1x256xf32>
      %38 = vector.broadcast %37 : vector<1x256xf32> to vector<8x256xf32>
      %39 = arith.addf %36, %38 : vector<8x256xf32>
      %40 = arith.truncf %39 : vector<8x256xf32> to vector<8x256xbf16>
      %c0_23 = arith.constant 0 : index
      %c0_24 = arith.constant 0 : index
      %41 = vector.load %arg9[%c0_23, %c0_24] : memref<8x256xbf16, #tpu.memory_space<vmem>>, vector<8x256xbf16>
      tpu.vector_store %arg9[%c0_23, %c0_24], %40 {strides = array<i32>} : memref<8x256xbf16, #tpu.memory_space<vmem>>, vector<8x256xbf16>,
    } else {
    }
    %c0 = arith.constant 0 : index
    %c0_3 = arith.constant 0 : index
    %6 = vector.load %arg9[%c0, %c0_3] : memref<8x256xbf16, #tpu.memory_space<vmem>>, vector<8x256xbf16>
    %c0_4 = arith.constant 0 : index
    %c0_5 = arith.constant 0 : index
    %7 = vector.load %arg8[%c0_4, %c0_5] : memref<8x128xf32, #tpu.memory_space<vmem>>, vector<8x128xf32>
    %c0_6 = arith.constant 0 : index
    %c0_7 = arith.constant 0 : index
    %8 = vector.load %arg4[%c0_6, %c0_7] : memref<256x128xbf16, #tpu.memory_space<vmem>>, vector<256x128xbf16>
    %cst = arith.constant dense<0.000000e+00> : vector<8x128xf32>
    %9 = tpu.matmul %6, %8, %cst {dimension_numbers = #tpu.dot_dimension_numbers<[1], [0], [0], [1], [0, 0, 1, 1], [], []>} : vector<8x256xbf16>, vector<256x128xbf16>, vector<8x128xf32> -> vector<8x128xf32>
    %10 = arith.addf %7, %9 : vector<8x128xf32>
    %c0_8 = arith.constant 0 : index
    %c0_9 = arith.constant 0 : index
    %11 = vector.load %arg8[%c0_8, %c0_9] : memref<8x128xf32, #tpu.memory_space<vmem>>, vector<8x128xf32>
    tpu.vector_store %arg8[%c0_8, %c0_9], %10 {strides = array<i32>} : memref<8x128xf32, #tpu.memory_space<vmem>>, vector<8x128xf32>,
    %c0_i32_10 = arith.constant 0 : i32
    %12 = arith.cmpi eq, %arg2, %c0_i32_10 : i32
    %13 = arith.extui %12 : i1 to i32
    %c0_i32_11 = arith.constant 0 : i32
    %14 = arith.cmpi ne, %13, %c0_i32_11 : i32
    scf.if %14 {
      %c0_12 = arith.constant 0 : index
      %c0_13 = arith.constant 0 : index
      %15 = vector.load %arg8[%c0_12, %c0_13] : memref<8x128xf32, #tpu.memory_space<vmem>>, vector<8x128xf32>
      %c0_14 = arith.constant 0 : index
      %c0_15 = arith.constant 0 : index
      %16 = vector.load %arg7[%c0_14, %c0_15] : memref<8x128xf32, #tpu.memory_space<vmem>>, vector<8x128xf32>
      tpu.vector_store %arg7[%c0_14, %c0_15], %15 {strides = array<i32>} : memref<8x128xf32, #tpu.memory_space<vmem>>, vector<8x128xf32>,
    } else {
    }
    return
  }
  func.func @transform_0(%arg0: i32, %arg1: i32, %arg2: i32) -> (i32, i32) {
    %c0_i32 = arith.constant 0 : i32
    return %arg0, %arg2 : i32, i32
  }
  func.func @transform_1(%arg0: i32, %arg1: i32, %arg2: i32) -> (i32, i32) {
    %c0_i32 = arith.constant 0 : i32
    return %arg2, %arg1 : i32, i32
  }
  func.func @transform_2(%arg0: i32, %arg1: i32, %arg2: i32) -> (i32, i32) {
    %c0_i32 = arith.constant 0 : i32
    %c0_i32_0 = arith.constant 0 : i32
    return %c0_i32, %arg2 : i32, i32
  }
  func.func @transform_3(%arg0: i32, %arg1: i32, %arg2: i32) -> (i32, i32) {
    %c0_i32 = arith.constant 0 : i32
    %c0_i32_0 = arith.constant 0 : i32
    return %c0_i32, %arg2 : i32, i32
  }
  func.func @transform_4(%arg0: i32, %arg1: i32, %arg2: i32) -> (i32, i32) {
    %c0_i32 = arith.constant 0 : i32
    return %arg0, %arg1 : i32, i32
  }
}

</mosaic_0001>

<bundles_post_ra>
// kernel: image_encoder_forward.13
= control target key start
LH: loop header
LB: loop body
LE: loop exit
PB: predicated region body
PF: predicated region fallthrough
CT: control target
= control target key end

     0   :  { %vm168_vm0 = vcmask 523264   ;;  %s388_s1 = inlined_call_operand.vmem [shape: bf16[192,256], index: 1, kind: input, shape index: {}]   ;;  %s389_s0 = inlined_call_operand.vmem [shape: f32[8,192], index: 0, kind: input, shape index: {}]   ;;  %s390_s2 = inlined_call_operand.vmem [shape: f32[8,256], index: 2, kind: output, shape index: {}]  }
   0x1   :  { %v253_v0 = vld [vmem:[%s388_s1 + $0x74] ss:$8 sps:$4 sm:$0xff]   ;;  %v255_v1 = vld [vmem:[%s388_s1 + $0x70] ss:$8 sps:$4 sm:$0xff]   ;;  %v256_v2 = vld [vmem:[%s388_s1 + $0x64] ss:$8 sps:$4 sm:$0xff]  }
   0x2   :  { %172 = vmatprep.subr.bf16.mxu0 %v253_v0  ;;  %v258_v3 = vld [vmem:[%s388_s1 + $0x60] ss:$8 sps:$4 sm:$0xff]   ;;  %v259_v4 = vld [vmem:[%s388_s1 + $0x54] ss:$8 sps:$4 sm:$0xff]   ;;  %v261_v5 = vld [vmem:[%s388_s1 + $0x50] ss:$8 sps:$4 sm:$0xff]  }
   0x3   :  { %173 = vmatpush1.bf16.msra.mxu0 %v255_v1  ;;  %v262_v6 = vld [vmem:[%s388_s1 + $0x44] ss:$8 sps:$4 sm:$0xff]   ;;  %v264_v7 = vld [vmem:[%s388_s1 + $0x40] ss:$8 sps:$4 sm:$0xff]   ;;  %v265_v8 = vld [vmem:[%s388_s1 + $0x34] ss:$8 sps:$4 sm:$0xff]  }
   0x4   :  { %174 = vmatprep.subr.bf16.mxu0 %v256_v2  ;;  %v267_v9 = vld [vmem:[%s388_s1 + $0x30] ss:$8 sps:$4 sm:$0xff]   ;;  %v268_v10 = vld [vmem:[%s388_s1 + $0x24] ss:$8 sps:$4 sm:$0xff]   ;;  %v270_v13 = vld [vmem:[%s388_s1 + $0x20] ss:$8 sps:$4 sm:$0xff]  }
   0x5   :  { %v19_v11 = vld [vmem:[%s389_s0 + $0x8] sm:$0xff]  ;;  %v271_v14 = vld [vmem:[%s388_s1 + $0x14] ss:$8 sps:$4 sm:$0xff]   ;;  %v273_v15 = vld [vmem:[%s388_s1 + $0x10] ss:$8 sps:$4 sm:$0xff]  }
   0x6   :  { %v21_v12 = vpack.c.bf16 %v19_v11, %v19_v11  ;;  %v274_v16 = vld [vmem:[%s388_s1 + $0x4] ss:$8 sps:$4 sm:$0xff]   ;;  %v276_v17 = vld [vmem:[%s388_s1] ss:$8 sps:$4 sm:$0xff]   ;;  %v277_v18 = vld [vmem:[%s388_s1 + $0xb4] ss:$8 sps:$4 sm:$0xff]  }
   0x7   :  { %175 = vmatpush1.bf16.msra.mxu0 %v258_v3  ;;  %v279_v19 = vld [vmem:[%s388_s1 + $0xb0] ss:$8 sps:$4 sm:$0xff]   ;;  %v280_v20 = vld [vmem:[%s388_s1 + $0xa4] ss:$8 sps:$4 sm:$0xff]   ;;  %v282_v21 = vld [vmem:[%s388_s1 + $0xa0] ss:$8 sps:$4 sm:$0xff]  }
   0x8   :  { %176 = vmatprep.subr.bf16.mxu0 %v259_v4  ;;  %252 = vmatprep.mubr.msk.bf16.mxu0 %vm168_vm0, %v21_v12  ;;  %v283_v22 = vld [vmem:[%s388_s1 + $0x94] ss:$8 sps:$4 sm:$0xff]   ;;  %v285_v23 = vld [vmem:[%s388_s1 + $0x90] ss:$8 sps:$4 sm:$0xff]   ;;  %v286_v24 = vld [vmem:[%s388_s1 + $0x84] ss:$8 sps:$4 sm:$0xff]  }
   0x9   :  { %v288_v25 = vld [vmem:[%s388_s1 + $0x80] ss:$8 sps:$4 sm:$0xff]  }
   0xa   :  { %v18_v26 = vld [vmem:[%s389_s0] sm:$0xff] }
   0xb   :  { %177 = vmatpush1.bf16.msra.mxu0 %v261_v5  ;;  %v20_v27 = vpack.c.bf16 %v18_v26, %v18_v26 }
   0xc   :  { %178 = vmatprep.subr.bf16.mxu0 %v262_v6 }
   0xf   :  { %179 = vmatpush1.bf16.msra.mxu0 %v264_v7 }
  0x10   :  { %180 = vmatprep.subr.bf16.mxu0 %v265_v8 }
  0x13   :  { %181 = vmatpush1.bf16.msra.mxu0 %v267_v9 }
  0x14   :  { %182 = vmatprep.subr.bf16.mxu0 %v268_v10 }
  0x17   :  { %183 = vmatpush1.bf16.msra.mxu0 %v270_v13 }
  0x18   :  { %184 = vmatprep.subr.bf16.mxu0 %v271_v14 }
  0x1b   :  { %185 = vmatpush1.bf16.msra.mxu0 %v273_v15 }
  0x1c   :  { %186 = vmatprep.subr.bf16.mxu0 %v274_v16 }
  0x1f   :  { %187 = vmatpush1.bf16.msra.mxu0 %v276_v17 }
  0x20   :  { %196 = vmatprep.subr.bf16.mxu0 %v277_v18 }
  0x23   :  { %197 = vmatpush2.bf16.msra.mxu0 %v279_v19 }
  0x24   :  { %198 = vmatprep.subr.bf16.mxu0 %v280_v20 }
  0x27   :  { %199 = vmatpush2.bf16.msra.mxu0 %v282_v21 }
  0x28   :  { %200 = vmatprep.subr.bf16.mxu0 %v283_v22 }
  0x2b   :  { %201 = vmatpush2.bf16.msra.mxu0 %v285_v23 }
  0x2c   :  { %202 = vmatprep.subr.bf16.mxu0 %v286_v24 }
  0x2f   :  { %203 = vmatpush2.bf16.msra.mxu0 %v288_v25 }
  0x32   :  { %205 = vmatmul.mubr.bf16.vlgmr.msra.gmra.mxu0 %v20_v27 }
  0xf2   :  { %v206_v28 = vpop.f32.mrf.mxu0 }
  0xf3   :  { %222 = vst [vmem:[%s390_s2] sm:$0xff] %v206_v28 }
  0xf4   :  { %v208_v29 = vpop.f32.mrf.mxu0 }
  0xf5   :  { %223 = vst [vmem:[%s390_s2 + $0x8] sm:$0xff] %v208_v29 }
  0xf6   :  { %v210_v30 = vpop.f32.mrf.mxu0 }
  0xf8   :  { %v211_v31 = vpop.f32.mrf.mxu0 }

// kernel: image_encoder_forward.14
= control target key start
LH: loop header
LB: loop body
LE: loop exit
PB: predicated region body
PF: predicated region fallthrough
CT: control target
= control target key end

     0   :  { %s420_s18 = smov 0   ;;  %s456_s0 = inlined_call_operand.vmem [shape: f32[2,4,256], index: 0, kind: input, shape index: {}]   ;;  %s457_s1 = inlined_call_operand.vmem [shape: f32[1,256], index: 1, kind: input, shape index: {}]   ;;  %s458_s2 = inlined_call_operand.vmem [shape: f32[5,256], index: 2, kind: input, shape index: {}]   ;;  %s459_s3 = inlined_call_operand.vmem [shape: f32[1,256], index: 3, kind: input, shape index: {}]   ;;  %s460_s4 = inlined_call_operand.vmem [shape: f32[1,256], index: 4, kind: input, shape index: {}]   ;;  %s461_s5 = inlined_call_operand.vmem [shape: f32[2,5,256], index: 5, kind: output, shape index: {}]  }
   0x1 LB: > { %s358_s19 = sadd.s32 4294967295, %s388_s18   ;;  %p362_p0 = scmp.ge.s32.totalorder %s388_s18, 1  ;;  %s388_s18 = sphi %s420_s18, %s15_s18  }
   0x2   : > { %p187_p1 = scmp.lt.s32.totalorder %s388_s18, 3 }
   0x4   : > { %p188_p2 = pnand %p362_p0, %p187_p1 }
   0x5   : > { %p215_p3 = scmp.lt.s32.totalorder (!%p188_p2), %s358_s19, 1 }
   0x6   : > { %191 = sbr.rel (%p188_p2) target bundleno = 335 (0x14f), region = 40 }
   0xb   : > { %v228_v0 = vlaneseq  ;;  %s463_s19 = smov (!%p215_p3, %s358_s19), 1  ;;  %v225_v2 = vld [vmem:[%s457_s1] sm:$0x3]  ;;  %vm244_vm0 = vcmask 1040384   ;;  %v248_v13 = vld [vmem:[%s458_s2 + $0x8] sm:$0x1f] }
   0xc   : > { %s369_s22 = sshll.u32 %s463_s19, 3  ;;  %v247_v10 = vld [vmem:[%s458_s2] sm:$0x1f]  ;;  %vm251_vm1 = vcmask 1044480   ;;  %s370_s9 = sshll.u32 %s463_s19, 4 }
   0xd   : > { %v229_v1 = vshrl.u32 %v228_v0, 7  ;;  %s219_s25 = scalar_lea.vmem %s456_s0, %s369_s22  ;;  %v273_v32 = vld [vmem:[%s459_s3] sm:$0x3]  ;;  %s224_s12 = scalar_lea.vmem %s461_s5, %s370_s9 }
   0xe   : > { %v226_v5 = vld [vmem:[%s219_s25] sm:$0xff] }
   0xf   : > { %v230_v3 = vsub.s32 0, %v229_v1  ;;  %v234_v4 = vsub.s32 1, %v229_v1  ;;  %v239_v8 = vcombine.high %v226_v5, %v226_v5  ;;  %v240_v9 = vrot.slane %v226_v5, 7  ;;  %v287_v33 = vld [vmem:[%s460_s4] sm:$0x3] }
  0x11   : > { %v231_v6 = vrot.slane %v225_v2, %v230_v3  ;;  %v235_v7 = vrot.slane %v225_v2, %v234_v4  ;;  %v241_v11 = vrot.slane %v239_v8, 7  ;;  %v278_v34 = vrot.slane %v273_v32, %v230_v3 }
  0x12   : > { %v282_v35 = vrot.slane %v273_v32, %v234_v4  ;;  %v292_v37 = vrot.slane %v287_v33, %v230_v3  ;;  %v296_v38 = vrot.slane %v287_v33, %v234_v4 }
  0x13   : > { %v245_v12 = vsel %vm244_vm0, %v231_v6, %v240_v9  ;;  %v246_v15 = vsel %vm244_vm0, %v235_v7, %v241_v11 }
  0x14   : > { %v249_v14 = vadd.f32 %v247_v10, %v245_v12  ;;  %v250_v16 = vadd.f32 %v248_v13, %v246_v15 }
  0x16   : > { %v252_v17 = vsel %vm251_vm1, %v249_v14, 0.0  ;;  %v253_v18 = vsel %vm251_vm1, %v250_v16, 0.0 }
  0x17   : > { %v254_v19 = vadd.f32 %v253_v18, %v252_v17 }
  0x19   : > { %255 = vadd.xlane.f32.xlu0 %v254_v19 }
  0xa2   : > { %v256_v20 = vpop.xlane.xlu0 %255 }
  0xa3   : > { %v258_v21 = vmul.f32 0.00390625, %v256_v20 }
  0xa5   : > { %v259_v22 = vsub.f32 %v249_v14, %v258_v21  ;;  %v260_v23 = vsub.f32 %v250_v16, %v258_v21 }
  0xa7   : > { %v261_v24 = vmul.f32 %v259_v22, %v259_v22  ;;  %v262_v25 = vmul.f32 %v260_v23, %v260_v23 }
  0xa9   : > { %v263_v26 = vsel %vm251_vm1, %v261_v24, 0.0  ;;  %v264_v27 = vsel %vm251_vm1, %v262_v25, 0.0 }
  0xaa   : > { %v265_v28 = vadd.f32 %v264_v27, %v263_v26 }
  0xac   : > { %266 = vadd.xlane.f32.xlu0 %v265_v28 }
 0x135   : > { %v267_v29 = vpop.xlane.xlu0 %266 }
 0x136   : > { %v268_v30 = vmul.f32 0.00390625, %v267_v29 }
 0x138   : > { %v269_v31 = vadd.f32 1e-05, %v268_v30 }
 0x13a   : > { %380 = vrsqrt.f32 %v269_v31 }
 0x147   : > { %v381_v36 = vpop.eup %380 }
 0x148   : > { %v271_v39 = vmul.f32 %v381_v36, %v259_v22  ;;  %v272_v40 = vmul.f32 %v381_v36, %v260_v23 }
 0x14a   : > { %v285_v41 = vmul.f32 %v278_v34, %v271_v39  ;;  %v286_v42 = vmul.f32 %v282_v35, %v272_v40 }
 0x14c   : > { %v299_v43 = vadd.f32 %v292_v37, %v285_v41  ;;  %v300_v44 = vadd.f32 %v296_v38, %v286_v42 }
 0x14e   : > { %301 = vst [vmem:[%s224_s12] sm:$0x1f] %v299_v43  ;;  %302 = vst [vmem:[%s224_s12 + $0x8] sm:$0x1f] %v300_v44 }
 0x14f PF: > { %s15_s18 = sadd.s32 1, %s388_s18  }
 0x150   : > { %p12_p4 = scmp.ge.s32.totalorder %s15_s18, 4  }
 0x152   :  { %14 = sbr.rel (!%p12_p4) target bundleno = 1 (0x1), region = 70 }

// kernel: image_encoder_forward.16
= control target key start
LH: loop header
LB: loop body
LE: loop exit
PB: predicated region body
PF: predicated region fallthrough
CT: control target
= control target key end

     0   :  { %s812_s12 = smov 0   ;;  %s814_s13 = smov 0   ;;  %s920_s0 = inlined_call_operand.vmem [shape: f32[2,5,768], index: 0, kind: input, shape index: {}, may-alias: {0,1,2}]   ;;  %s921_s1 = inlined_call_operand.vmem [shape: f32[2,5,768], index: 1, kind: input, shape index: {}, may-alias: {0,1,2}]   ;;  %s922_s2 = inlined_call_operand.vmem [shape: f32[2,5,768], index: 2, kind: input, shape index: {}, may-alias: {0,1,2}]   ;;  %s923_s3 = inlined_call_operand.vmem [shape: f32[2,5,256], index: 3, kind: output, shape index: {}]  }
   0x1   :  { %s816_s14 = smov 0   ;;  %s818_s15 = smov 0  }
   0x2   :  { %s820_s16 = smov 0  }
   0x3 LB: > { %s22_s17 = sadd.s32 1, %s778_s14  ;;  %s25_s18 = sadd.s32 1, %s782_s15  ;;  %s786_s16 = sphi %s820_s16, %s13_s16   ;;  %s782_s15 = sphi %s818_s15, %s927_s15   ;;  %s778_s14 = sphi %s816_s14, %s926_s14   ;;  %s774_s13 = sphi %s814_s13, %s925_s13   ;;  %s770_s12 = sphi %s812_s12, %s924_s12  }
   0x4   : > { %p23_p0 = scmp.ge.s32.totalorder %s22_s17, 2  ;;  %p651_p1 = scmp.ge.s32.totalorder %s786_s16, 1 }
   0x5   : > { %p194_p2 = scmp.lt.s32.totalorder %s786_s16, 5 }
   0x6   : > { %s929_s17 = smov (%p23_p0, %s22_s17), 0  ;;  %s931_s18 = smov (!%p23_p0, %s25_s18), %s782_s15 }
   0x7   : > { %p195_p3 = pnand %p651_p1, %p194_p2  ;;  %p27_p4 = scmp.ge.s32.totalorder %s931_s18, 2 }
   0x8   : > { %p242_p5 = scmp.lt.s32.totalorder (!%p195_p3), %s774_s13, 1  ;;  %s250_s19 = sadd.s32 (!%p195_p3), 2, %s770_s12 }
   0x9   : > { %s933_s18 = smov (%p27_p4, %s931_s18), 0  ;;  %198 = sbr.rel (%p195_p3) target bundleno = 1366 (0x556), region = 32 }
   0xa   : > { %p253_p6 = scmp.lt.s32.totalorder (!%p195_p3), %s250_s19, 5  ;;  %p244_p7 = scmp.lt.s32.totalorder (!%p195_p3), %s770_s12, 5 }
   0xb   : > { %s790_s5 = smov (!%p195_p3), 64   ;;  %s260_s6 = sadd.s32 (!%p195_p3), 4, %s770_s12 }
   0xc   : > { %p263_p8 = scmp.lt.s32.totalorder (!%p195_p3), %s260_s6, 5  ;;  %p272_p9 = scmp.lt.s32.totalorder (!%p195_p3), %s770_s12, 1 }
   0xe   : > { %v788_v0 = vmov 0.0   ;;  %vm789_vm0 = vmmov 0   ;;  %s935_s13 = smov (!%p242_p5, %s774_s13), 1  ;;  %s937_s19 = smov (!%p253_p6, %s250_s19), 5  ;;  %vm285_vm1 = vcmask 523264   ;;  %vm333_vm2 = vcmask 36864  }
   0xf   : > { %671 = vmatprep.subr.bf16.mxu0 %v788_v0  ;;  %673 = vmatprep.mubr.msk.bf16.mxu0 %vm789_vm0, %v788_v0  ;;  %s855_s20 = smul.u32 6, %s935_s13  ;;  %vm350_vm3 = vcmask 1041408   ;;  %s939_s6 = smov (!%p263_p8, %s260_s6), 5  ;;  %vm351_vm4 = vcmask 1042432   ;;  %v791_v21 = vmov 65535   ;;  %vm346_vm5 = vcmask 39936  }
  0x10   : > { %677 = vmatprep.subr.bf16.mxu1 %v788_v0  ;;  %679 = vmatprep.mubr.msk.bf16.mxu1 %vm789_vm0, %v788_v0  ;;  %s245_s21 = scalar_select %p244_p7, %s770_s12, 5  ;;  %v352_v22 = vsel %vm350_vm3, 4294967295, %v791_v21  ;;  %vm397_vm6 = vcmask 520192   ;;  %vm523_vm7 = vcmask 1044992  }
  0x11   : > { %s256_s22 = sadd.s32 %s855_s20, %s937_s19  ;;  %s266_s7 = sadd.s32 %s855_s20, %s939_s6  ;;  %v353_v24 = vsel %vm351_vm4, %v352_v22, 0 }
  0x12   : > { %s653_s23 = sshll.u32 %s256_s22, 3  ;;  %s247_s24 = sadd.s32 %s855_s20, %s245_s21 }
  0x13   : > { %s258_s27 = scalar_lea.vmem %s921_s1, %s653_s23  ;;  %s652_s28 = sshll.u32 %s247_s24, 3 }
  0x14   : > { %v281_v1 = vld [vmem:[%s258_s27] sm:$0x1f]  ;;  %s249_s4 = scalar_lea.vmem %s920_s0, %s652_s28  ;;  %s654_s8 = sshll.u32 %s266_s7, 3 }
  0x15   : > { %v282_v2 = vpack.c.bf16 %v281_v1, %v281_v1  ;;  %v279_v4 = vld [vmem:[%s249_s4] sm:$0x1f]  ;;  %s880_s11 = scalar_lea.vmem %s922_s2, %s654_s8  ;;  %s941_s12 = smov (!%p272_p9, %s770_s12), 1 }
  0x16   : > { %v280_v5 = vpack.c.bf16 %v279_v4, %v279_v4  ;;  %v401_v12 = vld [vmem:[%s258_s27] sm:$0x1f]  ;;  %s655_s19 = sshll.u32 %s935_s13, 1 }
  0x17   : > { %v290_v3 = vsel %vm285_vm1, %v282_v2, 0  ;;  %v399_v13 = vld [vmem:[%s249_s4] sm:$0x1f]  ;;  %v402_v14 = vpack.c.bf16 %v401_v12, %v401_v12  ;;  %s275_s20 = sadd.s32 %s655_s19, %s941_s12 }
  0x18   : > { %672 = vmatpush3.bf16.xpose.msra.mxu0 %v290_v3  ;;  %v400_v15 = vpack.c.bf16 %v399_v13, %v399_v13  ;;  %v283_v23 = vld [vmem:[%s880_s11] sm:$0x1f]  ;;  %s656_s21 = sshll.u32 %s275_s20, 3 }
  0x19   : > { %689 = vmatprep.subr.bf16.mxu0 %v788_v0  ;;  %409 = vrot.lane.b32.xlu1 %v402_v14, %s790_s5  ;;  %v284_v25 = vpack.c.bf16 %v283_v23, %v283_v23  ;;  %s895_s24 = scalar_lea.vmem %s923_s3, %s656_s21  ;;  %v403_v44 = vld [vmem:[%s880_s11] sm:$0x1f] }
  0x1a   : > { %v404_v45 = vpack.c.bf16 %v403_v44, %v403_v44 }
  0x1b   : > { %v355_v26 = vand.u32 %v353_v24, %v284_v25 }
  0x1d   : > { %406 = vrot.lane.b32.xlu1 %v400_v15, %s790_s5  ;;  %678 = vmatpush3.bf16.msra.mxu1 %v355_v26 }
  0x1e   : > { %683 = vmatprep.subr.bf16.mxu1 %v788_v0 }
  0x1f   : > { %674 = vmatmul.mubr.msk.bf16.vlgmr.msra.gmra.mxu0 %vm285_vm1, %v280_v5 }
  0x20   : > { %691 = vmatprep.mubr.msk.bf16.mxu0 %vm789_vm0, %v788_v0 }
  0x8b   : > { %v410_v29 = vpop.permute.xlu1 %409 }
  0x8c   : > { %v415_v31 = vsel %vm285_vm1, %v410_v29, 0 }
  0x8f   : > { %v407_v33 = vpop.permute.xlu1 %406 }
  0xdf   : > { %v326_v6 = vpop.f32.mrf.mxu0 }
  0xe0   : > { %v332_v7 = vmul.f32 0.125, %v326_v6 }
  0xe1   : > { %v675_v8 = vpop.f32.mrf.mxu0 }
  0xe2   : > { %v334_v9 = vsel %vm333_vm2, %v332_v7, -inf }
  0xe3   : > { %335 = vmax.xlane.f32.xlu0 %v334_v9  ;;  %v329_v10 = vpop.f32.mrf.mxu0 }
  0xe5   : > { %v676_v11 = vpop.f32.mrf.mxu0 }
 0x16c   : > { %v336_v16 = vpop.xlane.xlu0 %335 }
 0x16d   : > { %v337_v17 = vsub.f32 %v332_v7, %v336_v16 }
 0x16f   : > { %v338_v18 = vmul.f32 1.442695, %v337_v17 }
 0x171   : > { %740 = vpow2.f32 %v338_v18 }
 0x17e   : > { %v741_v19 = vpop.eup %740 }
 0x17f   : > { %v340_v20 = vsel %vm333_vm2, %v741_v19, 0.0 }
 0x180   : > { %341 = vadd.xlane.f32.xlu0 %v340_v20 }
 0x209   : > { %v342_v27 = vpop.xlane.xlu0 %341 }
 0x20a   : > { %742 = vrcp.f32 %v342_v27 }
 0x217   : > { %v743_v28 = vpop.eup %742 }
 0x218   : > { %v344_v30 = vmul.f32 %v743_v28, %v741_v19 }
 0x21a   : > { %v345_v32 = vpack.c.bf16 %v344_v30, %v344_v30 }
 0x21c   : > { %680 = vmatmul.mubr.msk.bf16.vlgmr.msra.gmra.mxu1 %vm346_vm5, %v345_v32 }
 0x21d   : > { %684 = vmatpush3.bf16.xpose.msra.mxu1 %v415_v31  ;;  %685 = vmatprep.mubr.msk.bf16.mxu1 %vm789_vm0, %v788_v0 }
 0x224   : > { %686 = vmatmul.mubr.msk.bf16.vlgmr.msra.gmra.mxu1 %vm285_vm1, %v407_v33 }
 0x2dc   : > { %v391_v34 = vpop.f32.mrf.mxu1 }
 0x2dd   : > { %398 = vst.msk [vmem:[%s895_s24] sm:$0x1f] %vm397_vm6, %v391_v34 }
 0x2de   : > { %v681_v35 = vpop.f32.mrf.mxu1 }
 0x2e0   : > { %v394_v36 = vpop.f32.mrf.mxu1 }
 0x2e2   : > { %v682_v37 = vpop.f32.mrf.mxu1 }
 0x2e4   : > { %v451_v38 = vpop.f32.mrf.mxu1 }
 0x2e5   : > { %v457_v39 = vmul.f32 0.125, %v451_v38 }
 0x2e6   : > { %v687_v40 = vpop.f32.mrf.mxu1 }
 0x2e7   : > { %v458_v41 = vsel %vm333_vm2, %v457_v39, -inf }
 0x2e8   : > { %459 = vmax.xlane.f32.xlu0 %v458_v41  ;;  %v454_v42 = vpop.f32.mrf.mxu1 }
 0x2ea   : > { %v688_v43 = vpop.f32.mrf.mxu1 }
 0x2fe   : > { %471 = vrot.lane.b32.xlu0 %v404_v45, %s790_s5 }
 0x371   : > { %v460_v46 = vpop.xlane.xlu0 %459 }
 0x372   : > { %v461_v47 = vsub.f32 %v457_v39, %v460_v46 }
 0x374   : > { %v462_v48 = vmul.f32 1.442695, %v461_v47 }
 0x375   : > { %v472_v51 = vpop.permute.xlu0 %471 }
 0x376   : > { %744 = vpow2.f32 %v462_v48  ;;  %v477_v52 = vand.u32 %v472_v51, %v353_v24 }
 0x378   : > { %690 = vmatpush3.bf16.msra.mxu0 %v477_v52 }
 0x383   : > { %v745_v49 = vpop.eup %744 }
 0x384   : > { %v464_v50 = vsel %vm333_vm2, %v745_v49, 0.0 }
 0x385   : > { %465 = vadd.xlane.f32.xlu1 %v464_v50 }
 0x40e   : > { %v466_v53 = vpop.xlane.xlu1 %465 }
 0x40f   : > { %746 = vrcp.f32 %v466_v53 }
 0x41c   : > { %v747_v54 = vpop.eup %746 }
 0x41d   : > { %v468_v55 = vmul.f32 %v747_v54, %v745_v49 }
 0x41f   : > { %v469_v56 = vpack.c.bf16 %v468_v55, %v468_v55 }
 0x421   : > { %692 = vmatmul.mubr.msk.bf16.vlgmr.msra.gmra.mxu0 %vm346_vm5, %v469_v56 }
 0x4e1   : > { %v513_v57 = vpop.f32.mrf.mxu0 }
 0x4e2   : > { %520 = vrot.lane.b32.xlu0 %v513_v57, %s790_s5 }
 0x4e3   : > { %v693_v58 = vpop.f32.mrf.mxu0 }
 0x4e5   : > { %v516_v59 = vpop.f32.mrf.mxu0 }
 0x4e7   : > { %v694_v60 = vpop.f32.mrf.mxu0 }
 0x554   : > { %v521_v61 = vpop.permute.xlu0 %520 }
 0x555   : > { %524 = vst.msk [vmem:[%s895_s24] sm:$0x1f] %vm523_vm7, %v521_v61 }
 0x556 PF: > { %s13_s16 = sadd.s32 1, %s786_s16   ;;  %s924_s12 = smov %s778_s14 }
 0x557   : > { %p10_p10 = scmp.ge.s32.totalorder %s13_s16, 6   ;;  %s925_s13 = smov %s782_s15 }
 0x558   : > { %s926_s14 = smov %s929_s17  ;;  %s927_s15 = smov %s933_s18 }
 0x559   :  { %12 = sbr.rel (!%p10_p10) target bundleno = 3 (0x3), region = 68 }

// kernel: image_encoder_forward.15
= control target key start
LH: loop header
LB: loop body
LE: loop exit
PB: predicated region body
PF: predicated region fallthrough
CT: control target
= control target key end

     0   :  { %s1637_s0 = inlined_call_operand.vmem [shape: f32[16,256], index: 0, kind: input, shape index: {}]   ;;  %s1638_s1 = inlined_call_operand.vmem [shape: bf16[256,768], index: 1, kind: input, shape index: {}]   ;;  %s1639_s2 = inlined_call_operand.vmem [shape: f32[1,256], index: 2, kind: input, shape index: {}]   ;;  %s1640_s3 = inlined_call_operand.vmem [shape: f32[1,256], index: 3, kind: input, shape index: {}]   ;;  %s1641_s4 = inlined_call_operand.vmem [shape: f32[1,768], index: 4, kind: input, shape index: {}]   ;;  %s1642_s5 = inlined_call_operand.vmem [shape: f32[16,768], index: 5, kind: output, shape index: {}]  }
   0x1   :  { %v1236_v0 = vld [vmem:[%s1637_s0] sm:$0xff]  ;;  %v1241_v1 = vld [vmem:[%s1637_s0 + $0x8] sm:$0xff]  ;;  %v1246_v2 = vld [vmem:[%s1637_s0 + $0x10] sm:$0xff] }
   0x2   :  { %v44_v3 = vadd.f32 %v1241_v1, %v1236_v0  ;;  %v1253_v4 = vld [vmem:[%s1637_s0 + $0x18] sm:$0xff]  ;;  %v1055_v6 = vld [vmem:[%s1638_s1 + $0x154] ss:$24 sps:$4 sm:$0xff]   ;;  %v1057_v7 = vld [vmem:[%s1638_s1 + $0x150] ss:$24 sps:$4 sm:$0xff]  }
   0x3   :  { %v47_v5 = vadd.f32 %v1253_v4, %v1246_v2  ;;  %723 = vmatprep.subr.bf16.mxu0 %v1055_v6  ;;  %v1058_v8 = vld [vmem:[%s1638_s1 + $0x15c] ss:$24 sps:$4 sm:$0xff]   ;;  %v1060_v9 = vld [vmem:[%s1638_s1 + $0x158] ss:$24 sps:$4 sm:$0xff]   ;;  %v1064_v12 = vld [vmem:[%s1638_s1 + $0x12c] ss:$24 sps:$4 sm:$0xff]  }
   0x4   :  { %45 = vadd.xlane.f32.xlu0 %v44_v3  ;;  %724 = vmatpush1.bf16.msra.mxu0 %v1057_v7  ;;  %v1061_v10 = vld [vmem:[%s1638_s1 + $0x124] ss:$24 sps:$4 sm:$0xff]   ;;  %v1063_v11 = vld [vmem:[%s1638_s1 + $0x120] ss:$24 sps:$4 sm:$0xff]   ;;  %v1067_v14 = vld [vmem:[%s1638_s1 + $0xf4] ss:$24 sps:$4 sm:$0xff]  }
   0x5   :  { %766 = vmatprep.subr.bf16.mxu1 %v1058_v8  ;;  %725 = vmatprep.subr.bf16.mxu0 %v1061_v10  ;;  %v1066_v13 = vld [vmem:[%s1638_s1 + $0x128] ss:$24 sps:$4 sm:$0xff]   ;;  %v1070_v16 = vld [vmem:[%s1638_s1 + $0xfc] ss:$24 sps:$4 sm:$0xff]   ;;  %v1072_v18 = vld [vmem:[%s1638_s1 + $0xf8] ss:$24 sps:$4 sm:$0xff]  }
   0x6   :  { %767 = vmatpush1.bf16.msra.mxu1 %v1060_v9  ;;  %v1069_v15 = vld [vmem:[%s1638_s1 + $0xf0] ss:$24 sps:$4 sm:$0xff]   ;;  %v1073_v17 = vld [vmem:[%s1638_s1 + $0xc4] ss:$24 sps:$4 sm:$0xff]   ;;  %v1075_v20 = vld [vmem:[%s1638_s1 + $0xc0] ss:$24 sps:$4 sm:$0xff]  }
   0x7   :  { %768 = vmatprep.subr.bf16.mxu1 %v1064_v12  ;;  %v1076_v19 = vld [vmem:[%s1638_s1 + $0xcc] ss:$24 sps:$4 sm:$0xff]   ;;  %v1078_v22 = vld [vmem:[%s1638_s1 + $0xc8] ss:$24 sps:$4 sm:$0xff]   ;;  %v1082_v23 = vld [vmem:[%s1638_s1 + $0x9c] ss:$24 sps:$4 sm:$0xff]  }
   0x8   :  { %48 = vadd.xlane.f32.xlu0 %v47_v5  ;;  %726 = vmatpush1.bf16.msra.mxu0 %v1063_v11  ;;  %v1079_v21 = vld [vmem:[%s1638_s1 + $0x94] ss:$24 sps:$4 sm:$0xff]   ;;  %v1081_v24 = vld [vmem:[%s1638_s1 + $0x90] ss:$24 sps:$4 sm:$0xff]   ;;  %v1085_v25 = vld [vmem:[%s1638_s1 + $0x64] ss:$24 sps:$4 sm:$0xff]  }
   0x9   :  { %727 = vmatprep.subr.bf16.mxu0 %v1067_v14  ;;  %v1084_v26 = vld [vmem:[%s1638_s1 + $0x98] ss:$24 sps:$4 sm:$0xff]   ;;  %v1088_v27 = vld [vmem:[%s1638_s1 + $0x6c] ss:$24 sps:$4 sm:$0xff]   ;;  %v1090_v30 = vld [vmem:[%s1638_s1 + $0x68] ss:$24 sps:$4 sm:$0xff]  }
   0xa   :  { %769 = vmatpush1.bf16.msra.mxu1 %v1066_v13  ;;  %v1087_v28 = vld [vmem:[%s1638_s1 + $0x60] ss:$24 sps:$4 sm:$0xff]   ;;  %v1091_v29 = vld [vmem:[%s1638_s1 + $0x34] ss:$24 sps:$4 sm:$0xff]   ;;  %v1093_v31 = vld [vmem:[%s1638_s1 + $0x30] ss:$24 sps:$4 sm:$0xff]  }
   0xb   :  { %770 = vmatprep.subr.bf16.mxu1 %v1070_v16  ;;  %v1094_v32 = vld [vmem:[%s1638_s1 + $0x3c] ss:$24 sps:$4 sm:$0xff]   ;;  %v1096_v33 = vld [vmem:[%s1638_s1 + $0x38] ss:$24 sps:$4 sm:$0xff]   ;;  %v1100_v35 = vld [vmem:[%s1638_s1 + $0xc] ss:$24 sps:$4 sm:$0xff]  }
   0xc   :  { %728 = vmatpush1.bf16.msra.mxu0 %v1069_v15  ;;  %v1097_v34 = vld [vmem:[%s1638_s1 + $0x4] ss:$24 sps:$4 sm:$0xff]   ;;  %v1099_v36 = vld [vmem:[%s1638_s1] ss:$24 sps:$4 sm:$0xff]   ;;  %v1103_v37 = vld [vmem:[%s1638_s1 + $0x2d4] ss:$24 sps:$4 sm:$0xff]  }
   0xd   :  { %729 = vmatprep.subr.bf16.mxu0 %v1073_v17  ;;  %v1102_v38 = vld [vmem:[%s1638_s1 + $0x8] ss:$24 sps:$4 sm:$0xff]   ;;  %v1106_v39 = vld [vmem:[%s1638_s1 + $0x2dc] ss:$24 sps:$4 sm:$0xff]   ;;  %v1108_v55 = vld [vmem:[%s1638_s1 + $0x2d8] ss:$24 sps:$4 sm:$0xff]  }
   0xe   :  { %771 = vmatpush1.bf16.msra.mxu1 %v1072_v18  ;;  %v1105_v40 = vld [vmem:[%s1638_s1 + $0x2d0] ss:$24 sps:$4 sm:$0xff]   ;;  %v1109_v56 = vld [vmem:[%s1638_s1 + $0x2a4] ss:$24 sps:$4 sm:$0xff]   ;;  %v1111_v57 = vld [vmem:[%s1638_s1 + $0x2a0] ss:$24 sps:$4 sm:$0xff]  }
   0xf   :  { %772 = vmatprep.subr.bf16.mxu1 %v1076_v19  ;;  %v1112_v58 = vld [vmem:[%s1638_s1 + $0x2ac] ss:$24 sps:$4 sm:$0xff]   ;;  %v1114_v59 = vld [vmem:[%s1638_s1 + $0x2a8] ss:$24 sps:$4 sm:$0xff]   ;;  %v1118_v62 = vld [vmem:[%s1638_s1 + $0x27c] ss:$24 sps:$4 sm:$0xff]  }
  0x10   :  { %730 = vmatpush1.bf16.msra.mxu0 %v1075_v20  ;;  %v1115_v60 = vld [vmem:[%s1638_s1 + $0x274] ss:$24 sps:$4 sm:$0xff]   ;;  %v1117_v61 = vld [vmem:[%s1638_s1 + $0x270] ss:$24 sps:$4 sm:$0xff]   ;;  %v1133_v8 = vld [vmem:[%s1638_s1 + $0x1e4] ss:$24 sps:$4 sm:$0xff]  }
  0x11   :  { %731 = vmatprep.subr.bf16.mxu0 %v1079_v21  ;;  %v1120_v63 = vld [vmem:[%s1638_s1 + $0x278] ss:$24 sps:$4 sm:$0xff]   ;;  %v1126_v3 = vld [vmem:[%s1638_s1 + $0x248] ss:$24 sps:$4 sm:$0xff]   ;;  %v1130_v5 = vld [vmem:[%s1638_s1 + $0x21c] ss:$24 sps:$4 sm:$0xff]  }
  0x12   :  { %773 = vmatpush1.bf16.msra.mxu1 %v1078_v22  ;;  %v1129_v6 = vld [vmem:[%s1638_s1 + $0x210] ss:$24 sps:$4 sm:$0xff]   ;;  %v1136_v9 = vld [vmem:[%s1638_s1 + $0x1ec] ss:$24 sps:$4 sm:$0xff]   ;;  %v1135_v10 = vld [vmem:[%s1638_s1 + $0x1e0] ss:$24 sps:$4 sm:$0xff]  }
  0x13   :  { %774 = vmatprep.subr.bf16.mxu1 %v1082_v23  ;;  %v1132_v7 = vld [vmem:[%s1638_s1 + $0x218] ss:$24 sps:$4 sm:$0xff]   ;;  %v1138_v11 = vld [vmem:[%s1638_s1 + $0x1e8] ss:$24 sps:$4 sm:$0xff]   ;;  %v1139_v12 = vld [vmem:[%s1638_s1 + $0x1b4] ss:$24 sps:$4 sm:$0xff]  }
  0x14   :  { %732 = vmatpush1.bf16.msra.mxu0 %v1081_v24  ;;  %v1142_v13 = vld [vmem:[%s1638_s1 + $0x1bc] ss:$24 sps:$4 sm:$0xff]   ;;  %v1141_v14 = vld [vmem:[%s1638_s1 + $0x1b0] ss:$24 sps:$4 sm:$0xff]   ;;  %v1148_v17 = vld [vmem:[%s1638_s1 + $0x18c] ss:$24 sps:$4 sm:$0xff]  }
  0x15   :  { %733 = vmatprep.subr.bf16.mxu0 %v1085_v25  ;;  %v1144_v15 = vld [vmem:[%s1638_s1 + $0x1b8] ss:$24 sps:$4 sm:$0xff]   ;;  %v1145_v16 = vld [vmem:[%s1638_s1 + $0x184] ss:$24 sps:$4 sm:$0xff]   ;;  %v1150_v19 = vld [vmem:[%s1638_s1 + $0x188] ss:$24 sps:$4 sm:$0xff]  }
  0x16   :  { %775 = vmatpush1.bf16.msra.mxu1 %v1084_v26  ;;  %v1147_v18 = vld [vmem:[%s1638_s1 + $0x180] ss:$24 sps:$4 sm:$0xff]   ;;  %v1153_v20 = vld [vmem:[%s1638_s1 + $0x164] ss:$24 sps:$4 sm:$0xff]  }
  0x17   :  { %776 = vmatprep.subr.bf16.mxu1 %v1088_v27  ;;  %v79_v27 = vlaneseq }
  0x18   :  { %734 = vmatpush1.bf16.msra.mxu0 %v1087_v28 }
  0x19   :  { %735 = vmatprep.subr.bf16.mxu0 %v1091_v29  ;;  %v1472_v28 = vshrl.u32 %v79_v27, 7 }
  0x1a   :  { %777 = vmatpush1.bf16.msra.mxu1 %v1090_v30 }
  0x1b   :  { %778 = vmatprep.subr.bf16.mxu1 %v1094_v32  ;;  %v1475_v29 = vsub.s32 1, %v1472_v28  ;;  %v1478_v30 = vsub.s32 0, %v1472_v28 }
  0x1c   :  { %736 = vmatpush1.bf16.msra.mxu0 %v1093_v31  ;;  %v77_v31 = vld [vmem:[%s1639_s2] sm:$0x3] }
  0x1d   :  { %737 = vmatprep.subr.bf16.mxu0 %v1097_v34  ;;  %v86_v34 = vrot.slane %v77_v31, %v1475_v29 }
  0x1e   :  { %779 = vmatpush1.bf16.msra.mxu1 %v1096_v33 }
  0x1f   :  { %780 = vmatprep.subr.bf16.mxu1 %v1100_v35  ;;  %v93_v35 = vld [vmem:[%s1640_s3] sm:$0x3] }
  0x20   :  { %738 = vmatpush1.bf16.msra.mxu0 %v1099_v36 }
  0x21   :  { %739 = vmatprep.subr.bf16.mxu0 %v1103_v37  ;;  %v82_v37 = vrot.slane %v77_v31, %v1478_v30 }
  0x22   :  { %781 = vmatpush1.bf16.msra.mxu1 %v1102_v38 }
  0x23   :  { %782 = vmatprep.subr.bf16.mxu1 %v1106_v39  ;;  %v102_v39 = vrot.slane %v93_v35, %v1475_v29 }
  0x24   :  { %740 = vmatpush2.bf16.msra.mxu0 %v1105_v40  ;;  %v98_v40 = vrot.slane %v93_v35, %v1478_v30 }
  0x25   :  { %741 = vmatprep.subr.bf16.mxu0 %v1109_v56  ;;  %v1159_v56 = vld [vmem:[%s1638_s1 + $0x104] ss:$24 sps:$4 sm:$0xff]  }
  0x26   :  { %783 = vmatpush2.bf16.msra.mxu1 %v1108_v55 }
  0x27   :  { %784 = vmatprep.subr.bf16.mxu1 %v1112_v58  ;;  %v1162_v58 = vld [vmem:[%s1638_s1 + $0xd4] ss:$24 sps:$4 sm:$0xff]  }
  0x28   :  { %742 = vmatpush2.bf16.msra.mxu0 %v1111_v57  ;;  %v1157_v57 = vld [vmem:[%s1638_s1 + $0x100] ss:$24 sps:$4 sm:$0xff]  }
  0x29   :  { %743 = vmatprep.subr.bf16.mxu0 %v1115_v60  ;;  %v1165_v60 = vld [vmem:[%s1638_s1 + $0xa4] ss:$24 sps:$4 sm:$0xff]  }
  0x2a   :  { %785 = vmatpush2.bf16.msra.mxu1 %v1114_v59  ;;  %v1160_v59 = vld [vmem:[%s1638_s1 + $0xd0] ss:$24 sps:$4 sm:$0xff]  }
  0x2b   :  { %786 = vmatprep.subr.bf16.mxu1 %v1118_v62  ;;  %v1168_v62 = vld [vmem:[%s1638_s1 + $0x74] ss:$24 sps:$4 sm:$0xff]  }
  0x2c   :  { %744 = vmatpush2.bf16.msra.mxu0 %v1117_v61  ;;  %v1163_v61 = vld [vmem:[%s1638_s1 + $0xa0] ss:$24 sps:$4 sm:$0xff]  }
  0x2e   :  { %787 = vmatpush2.bf16.msra.mxu1 %v1120_v63  ;;  %v1166_v63 = vld [vmem:[%s1638_s1 + $0x70] ss:$24 sps:$4 sm:$0xff]  }
  0x8d   :  { %v46_v41 = vpop.xlane.xlu0 %45 }
  0x8e   :  { %v51_v42 = vmul.f32 0.00390625, %v46_v41 }
  0x90   :  { %v1363_v43 = vsub.f32 %v1236_v0, %v51_v42  ;;  %v1366_v44 = vsub.f32 %v1241_v1, %v51_v42  ;;  %v1121_v0 = vld [vmem:[%s1638_s1 + $0x244] ss:$24 sps:$4 sm:$0xff]   ;;  %v1123_v1 = vld [vmem:[%s1638_s1 + $0x240] ss:$24 sps:$4 sm:$0xff]  }
  0x91   :  { %v49_v45 = vpop.xlane.xlu0 %48  ;;  %745 = vmatprep.subr.bf16.mxu0 %v1121_v0  ;;  %v1171_v0 = vld [vmem:[%s1638_s1 + $0x44] ss:$24 sps:$4 sm:$0xff]  }
  0x92   :  { %v52_v46 = vmul.f32 0.00390625, %v49_v45  ;;  %v57_v47 = vmul.f32 %v1363_v43, %v1363_v43  ;;  %v58_v48 = vmul.f32 %v1366_v44, %v1366_v44  ;;  %746 = vmatpush2.bf16.msra.mxu0 %v1123_v1  ;;  %v1169_v1 = vld [vmem:[%s1638_s1 + $0x40] ss:$24 sps:$4 sm:$0xff]  }
  0x94   :  { %v1373_v49 = vsub.f32 %v1246_v2, %v52_v46  ;;  %v1376_v50 = vsub.f32 %v1253_v4, %v52_v46  ;;  %v61_v51 = vadd.f32 %v58_v48, %v57_v47  ;;  %v1124_v2 = vld [vmem:[%s1638_s1 + $0x24c] ss:$24 sps:$4 sm:$0xff]  }
  0x95   :  { %v1127_v4 = vld [vmem:[%s1638_s1 + $0x214] ss:$24 sps:$4 sm:$0xff]   ;;  %788 = vmatprep.subr.bf16.mxu1 %v1124_v2 }
  0x96   :  { %62 = vadd.xlane.f32.xlu1 %v61_v51  ;;  %v59_v52 = vmul.f32 %v1373_v49, %v1373_v49  ;;  %v60_v53 = vmul.f32 %v1376_v50, %v1376_v50  ;;  %789 = vmatpush2.bf16.msra.mxu1 %v1126_v3  ;;  %v1174_v2 = vld [vmem:[%s1638_s1 + $0x14] ss:$24 sps:$4 sm:$0xff]   ;;  %v1172_v3 = vld [vmem:[%s1638_s1 + $0x10] ss:$24 sps:$4 sm:$0xff]  }
  0x97   :  { %747 = vmatprep.subr.bf16.mxu0 %v1127_v4  ;;  %790 = vmatprep.subr.bf16.mxu1 %v1130_v5  ;;  %v1177_v4 = vld [vmem:[%s1638_s1 + $0x2e4] ss:$24 sps:$4 sm:$0xff]   ;;  %v1175_v5 = vld [vmem:[%s1638_s1 + $0x2e0] ss:$24 sps:$4 sm:$0xff]  }
  0x98   :  { %v64_v54 = vadd.f32 %v60_v53, %v59_v52  ;;  %748 = vmatpush2.bf16.msra.mxu0 %v1129_v6  ;;  %v1180_v6 = vld [vmem:[%s1638_s1 + $0x2b4] ss:$24 sps:$4 sm:$0xff]  }
  0x99   :  { %749 = vmatprep.subr.bf16.mxu0 %v1133_v8  ;;  %v1183_v8 = vld [vmem:[%s1638_s1 + $0x284] ss:$24 sps:$4 sm:$0xff]  }
  0x9a   :  { %65 = vadd.xlane.f32.xlu1 %v64_v54  ;;  %791 = vmatpush2.bf16.msra.mxu1 %v1132_v7  ;;  %v1151_v54 = vld [vmem:[%s1638_s1 + $0x160] ss:$24 sps:$4 sm:$0xff]   ;;  %v1178_v7 = vld [vmem:[%s1638_s1 + $0x2b0] ss:$24 sps:$4 sm:$0xff]  }
  0x9b   :  { %792 = vmatprep.subr.bf16.mxu1 %v1136_v9  ;;  %v1181_v9 = vld [vmem:[%s1638_s1 + $0x280] ss:$24 sps:$4 sm:$0xff]  }
  0x9c   :  { %750 = vmatpush2.bf16.msra.mxu0 %v1135_v10  ;;  %v1186_v10 = vld [vmem:[%s1638_s1 + $0x254] ss:$24 sps:$4 sm:$0xff]  }
  0x9d   :  { %751 = vmatprep.subr.bf16.mxu0 %v1139_v12  ;;  %v1189_v12 = vld [vmem:[%s1638_s1 + $0x224] ss:$24 sps:$4 sm:$0xff]  }
  0x9e   :  { %793 = vmatpush2.bf16.msra.mxu1 %v1138_v11  ;;  %v1184_v11 = vld [vmem:[%s1638_s1 + $0x250] ss:$24 sps:$4 sm:$0xff]  }
  0x9f   :  { %794 = vmatprep.subr.bf16.mxu1 %v1142_v13  ;;  %v1187_v13 = vld [vmem:[%s1638_s1 + $0x220] ss:$24 sps:$4 sm:$0xff]  }
  0xa0   :  { %752 = vmatpush2.bf16.msra.mxu0 %v1141_v14  ;;  %v1192_v14 = vld [vmem:[%s1638_s1 + $0x1f4] ss:$24 sps:$4 sm:$0xff]  }
  0xa1   :  { %753 = vmatprep.subr.bf16.mxu0 %v1145_v16  ;;  %v1195_v16 = vld [vmem:[%s1638_s1 + $0x1c4] ss:$24 sps:$4 sm:$0xff]  }
  0xa2   :  { %795 = vmatpush2.bf16.msra.mxu1 %v1144_v15  ;;  %v1190_v15 = vld [vmem:[%s1638_s1 + $0x1f0] ss:$24 sps:$4 sm:$0xff]  }
  0xa3   :  { %796 = vmatprep.subr.bf16.mxu1 %v1148_v17  ;;  %v1193_v17 = vld [vmem:[%s1638_s1 + $0x1c0] ss:$24 sps:$4 sm:$0xff]  }
  0xa4   :  { %754 = vmatpush2.bf16.msra.mxu0 %v1147_v18  ;;  %v1198_v18 = vld [vmem:[%s1638_s1 + $0x194] ss:$24 sps:$4 sm:$0xff]  }
  0xa5   :  { %809 = vmatprep.subr.bf16.mxu0 %v1153_v20  ;;  %v903_v20 = vsub.s32 2, %v1472_v28 }
  0xa6   :  { %797 = vmatpush2.bf16.msra.mxu1 %v1150_v19  ;;  %v1196_v19 = vld [vmem:[%s1638_s1 + $0x190] ss:$24 sps:$4 sm:$0xff]  }
 0x11f   :  { %v63_v21 = vpop.xlane.xlu1 %62 }
 0x120   :  { %v67_v22 = vmul.f32 0.00390625, %v63_v21  ;;  %v891_v21 = vld [vmem:[%s1641_s4] sm:$0x3f] }
 0x122   :  { %v69_v23 = vadd.f32 1e-05, %v67_v22  ;;  %v907_v22 = vsub.s32 3, %v1472_v28 }
 0x123   :  { %v66_v24 = vpop.xlane.xlu1 %65 }
 0x124   :  { %1199 = vrsqrt.f32 %v69_v23  ;;  %v68_v25 = vmul.f32 0.00390625, %v66_v24  ;;  %v896_v23 = vrot.slane %v891_v21, %v1478_v30  ;;  %v904_v24 = vrot.slane %v891_v21, %v903_v20 }
 0x126   :  { %v70_v26 = vadd.f32 1e-05, %v68_v25  ;;  %v900_v25 = vrot.slane %v891_v21, %v1475_v29 }
 0x128   :  { %1201 = vrsqrt.f32 %v70_v26  ;;  %v908_v26 = vrot.slane %v891_v21, %v907_v22 }
 0x131   :  { %v1200_v32 = vpop.eup %1199 }
 0x132   :  { %v74_v33 = vmul.f32 %v1200_v32, %v1366_v44  ;;  %v73_v36 = vmul.f32 %v1200_v32, %v1363_v43 }
 0x134   :  { %v90_v42 = vmul.f32 %v86_v34, %v74_v33  ;;  %v89_v45 = vmul.f32 %v82_v37, %v73_v36 }
 0x135   :  { %v1202_v38 = vpop.eup %1201 }
 0x136   :  { %v76_v41 = vmul.f32 %v1202_v38, %v1376_v50  ;;  %v75_v44 = vmul.f32 %v1202_v38, %v1373_v49  ;;  %v106_v48 = vadd.f32 %v102_v39, %v90_v42  ;;  %v105_v52 = vadd.f32 %v98_v40, %v89_v45  ;;  %v1156_v50 = vld [vmem:[%s1638_s1 + $0x134] ss:$24 sps:$4 sm:$0xff]   ;;  %v1154_v49 = vld [vmem:[%s1638_s1 + $0x130] ss:$24 sps:$4 sm:$0xff]  }
 0x137   :  { %v911_v45 = vsub.s32 4, %v1472_v28 }
 0x138   :  { %v92_v46 = vmul.f32 %v86_v34, %v76_v41  ;;  %v91_v47 = vmul.f32 %v82_v37, %v75_v44 }
 0x13a   :  { %v108_v51 = vadd.f32 %v102_v39, %v92_v46  ;;  %v107_v53 = vadd.f32 %v98_v40, %v91_v47  ;;  %v915_v46 = vsub.s32 5, %v1472_v28  ;;  %v912_v47 = vrot.slane %v891_v21, %v911_v45 }
 0x13c   :  { %v1054_v43 = vpack.c.bf16 %v108_v51, %v106_v48  ;;  %v1497_v55 = vpack.c.bf16 %v107_v53, %v105_v52  ;;  %v916_v48 = vrot.slane %v891_v21, %v915_v46 }
 0x13e   :  { %755 = vmatprep.mubr.bf16.mxu0 %v1054_v43  ;;  %798 = vmatprep.mubr.bf16.mxu1 %v1054_v43 }
 0x13f   :  { %756 = vmatmul.mubr.bf16.vlgmr.msra.gmra.mxu0 %v1497_v55  ;;  %799 = vmatmul.mubr.bf16.vlgmr.msra.gmra.mxu1 %v1497_v55 }
 0x140   :  { %810 = vmatpush1.bf16.msra.mxu0 %v1151_v54  ;;  %841 = vmatprep.mubr.bf16.mxu0 %v1054_v43 }
 0x141   :  { %811 = vmatprep.subr.bf16.mxu0 %v1156_v50 }
 0x144   :  { %812 = vmatpush1.bf16.msra.mxu0 %v1154_v49 }
 0x145   :  { %813 = vmatprep.subr.bf16.mxu0 %v1159_v56 }
 0x148   :  { %814 = vmatpush1.bf16.msra.mxu0 %v1157_v57 }
 0x149   :  { %815 = vmatprep.subr.bf16.mxu0 %v1162_v58 }
 0x14c   :  { %816 = vmatpush1.bf16.msra.mxu0 %v1160_v59 }
 0x14d   :  { %817 = vmatprep.subr.bf16.mxu0 %v1165_v60 }
 0x150   :  { %818 = vmatpush1.bf16.msra.mxu0 %v1163_v61 }
 0x151   :  { %819 = vmatprep.subr.bf16.mxu0 %v1168_v62 }
 0x154   :  { %820 = vmatpush1.bf16.msra.mxu0 %v1166_v63 }
 0x155   :  { %821 = vmatprep.subr.bf16.mxu0 %v1171_v0 }
 0x158   :  { %822 = vmatpush1.bf16.msra.mxu0 %v1169_v1 }
 0x159   :  { %823 = vmatprep.subr.bf16.mxu0 %v1174_v2 }
 0x15c   :  { %824 = vmatpush1.bf16.msra.mxu0 %v1172_v3 }
 0x15d   :  { %825 = vmatprep.subr.bf16.mxu0 %v1177_v4 }
 0x160   :  { %826 = vmatpush2.bf16.msra.mxu0 %v1175_v5 }
 0x161   :  { %827 = vmatprep.subr.bf16.mxu0 %v1180_v6 }
 0x164   :  { %828 = vmatpush2.bf16.msra.mxu0 %v1178_v7 }
 0x165   :  { %829 = vmatprep.subr.bf16.mxu0 %v1183_v8 }
 0x168   :  { %830 = vmatpush2.bf16.msra.mxu0 %v1181_v9 }
 0x169   :  { %831 = vmatprep.subr.bf16.mxu0 %v1186_v10 }
 0x16c   :  { %832 = vmatpush2.bf16.msra.mxu0 %v1184_v11 }
 0x16d   :  { %833 = vmatprep.subr.bf16.mxu0 %v1189_v12 }
 0x170   :  { %834 = vmatpush2.bf16.msra.mxu0 %v1187_v13 }
 0x171   :  { %835 = vmatprep.subr.bf16.mxu0 %v1192_v14 }
 0x174   :  { %836 = vmatpush2.bf16.msra.mxu0 %v1190_v15 }
 0x175   :  { %837 = vmatprep.subr.bf16.mxu0 %v1195_v16 }
 0x178   :  { %838 = vmatpush2.bf16.msra.mxu0 %v1193_v17 }
 0x179   :  { %839 = vmatprep.subr.bf16.mxu0 %v1198_v18 }
 0x17c   :  { %840 = vmatpush2.bf16.msra.mxu0 %v1196_v19 }
 0x17f   :  { %842 = vmatmul.mubr.bf16.vlgmr.msra.gmra.mxu0 %v1497_v55 }
 0x1ff   :  { %v757_v27 = vpop.f32.mrf.mxu0  ;;  %v800_v31 = vpop.f32.mrf.mxu1 }
 0x200   :  { %v923_v32 = vadd.f32 %v896_v23, %v757_v27  ;;  %v925_v33 = vadd.f32 %v904_v24, %v800_v31 }
 0x201   :  { %v759_v34 = vpop.f32.mrf.mxu0  ;;  %v802_v35 = vpop.f32.mrf.mxu1 }
 0x202   :  { %935 = vst [vmem:[%s1642_s5] sm:$0xff] %v923_v32  ;;  %937 = vst [vmem:[%s1642_s5 + $0x10] sm:$0xff] %v925_v33  ;;  %v924_v36 = vadd.f32 %v900_v25, %v759_v34  ;;  %v926_v30 = vadd.f32 %v908_v26, %v802_v35 }
 0x203   :  { %v761_v37 = vpop.f32.mrf.mxu0  ;;  %v804_v38 = vpop.f32.mrf.mxu1 }
 0x204   :  { %936 = vst [vmem:[%s1642_s5 + $0x8] sm:$0xff] %v924_v36  ;;  %938 = vst [vmem:[%s1642_s5 + $0x18] sm:$0xff] %v926_v30  ;;  %v929_v29 = vadd.f32 %v896_v23, %v761_v37  ;;  %v931_v39 = vadd.f32 %v904_v24, %v804_v38 }
 0x205   :  { %v763_v40 = vpop.f32.mrf.mxu0  ;;  %v806_v41 = vpop.f32.mrf.mxu1 }
 0x206   :  { %941 = vst [vmem:[%s1642_s5 + $0x30] sm:$0xff] %v929_v29  ;;  %943 = vst [vmem:[%s1642_s5 + $0x40] sm:$0xff] %v931_v39  ;;  %v930_v42 = vadd.f32 %v900_v25, %v763_v40  ;;  %v932_v44 = vadd.f32 %v908_v26, %v806_v41 }
 0x208   :  { %942 = vst [vmem:[%s1642_s5 + $0x38] sm:$0xff] %v930_v42  ;;  %944 = vst [vmem:[%s1642_s5 + $0x48] sm:$0xff] %v932_v44 }
 0x23f   :  { %v843_v51 = vpop.f32.mrf.mxu0 }
 0x240   :  { %v927_v52 = vadd.f32 %v912_v47, %v843_v51 }
 0x241   :  { %v845_v53 = vpop.f32.mrf.mxu0 }
 0x242   :  { %939 = vst [vmem:[%s1642_s5 + $0x20] sm:$0xff] %v927_v52  ;;  %v928_v43 = vadd.f32 %v916_v48, %v845_v53 }
 0x243   :  { %v847_v54 = vpop.f32.mrf.mxu0 }
 0x244   :  { %940 = vst [vmem:[%s1642_s5 + $0x28] sm:$0xff] %v928_v43  ;;  %v933_v55 = vadd.f32 %v912_v47, %v847_v54 }
 0x245   :  { %v849_v50 = vpop.f32.mrf.mxu0 }
 0x246   :  { %945 = vst [vmem:[%s1642_s5 + $0x50] sm:$0xff] %v933_v55  ;;  %v934_v28 = vadd.f32 %v916_v48, %v849_v50 }
 0x248   :  { %946 = vst [vmem:[%s1642_s5 + $0x58] sm:$0xff] %v934_v28 }

// kernel: image_encoder_forward.17
= control target key start
LH: loop header
LB: loop body
LE: loop exit
PB: predicated region body
PF: predicated region fallthrough
CT: control target
= control target key end

     0   :  { %v287_v38 = vlaneseq  ;;  %s557_s1 = inlined_call_operand.vmem [shape: bf16[256,256], index: 1, kind: input, shape index: {}]   ;;  %s558_s0 = inlined_call_operand.vmem [shape: f32[16,256], index: 0, kind: input, shape index: {}]   ;;  %s559_s2 = inlined_call_operand.vmem [shape: f32[1,256], index: 2, kind: input, shape index: {}]   ;;  %s560_s3 = inlined_call_operand.vmem [shape: f32[16,256], index: 3, kind: input, shape index: {}]   ;;  %s561_s4 = inlined_call_operand.vmem [shape: f32[16,256], index: 4, kind: output, shape index: {}]  }
   0x1   :  { %v349_v0 = vld [vmem:[%s557_s1 + $0x74] ss:$8 sps:$4 sm:$0xff]   ;;  %v351_v1 = vld [vmem:[%s557_s1 + $0x70] ss:$8 sps:$4 sm:$0xff]   ;;  %v352_v2 = vld [vmem:[%s557_s1 + $0x64] ss:$8 sps:$4 sm:$0xff]  }
   0x2   :  { %227 = vmatprep.subr.bf16.mxu0 %v349_v0  ;;  %v354_v3 = vld [vmem:[%s557_s1 + $0x60] ss:$8 sps:$4 sm:$0xff]   ;;  %v355_v4 = vld [vmem:[%s557_s1 + $0x54] ss:$8 sps:$4 sm:$0xff]   ;;  %v357_v5 = vld [vmem:[%s557_s1 + $0x50] ss:$8 sps:$4 sm:$0xff]  }
   0x3   :  { %228 = vmatpush1.bf16.msra.mxu0 %v351_v1  ;;  %v358_v6 = vld [vmem:[%s557_s1 + $0x44] ss:$8 sps:$4 sm:$0xff]   ;;  %v360_v7 = vld [vmem:[%s557_s1 + $0x40] ss:$8 sps:$4 sm:$0xff]   ;;  %v361_v8 = vld [vmem:[%s557_s1 + $0x34] ss:$8 sps:$4 sm:$0xff]  }
   0x4   :  { %229 = vmatprep.subr.bf16.mxu0 %v352_v2  ;;  %v363_v9 = vld [vmem:[%s557_s1 + $0x30] ss:$8 sps:$4 sm:$0xff]   ;;  %v364_v10 = vld [vmem:[%s557_s1 + $0x24] ss:$8 sps:$4 sm:$0xff]   ;;  %v366_v11 = vld [vmem:[%s557_s1 + $0x20] ss:$8 sps:$4 sm:$0xff]  }
   0x5   :  { %v367_v12 = vld [vmem:[%s557_s1 + $0x14] ss:$8 sps:$4 sm:$0xff]   ;;  %v26_v13 = vld [vmem:[%s558_s0 + $0x8] sm:$0xff]  ;;  %v369_v16 = vld [vmem:[%s557_s1 + $0x10] ss:$8 sps:$4 sm:$0xff]   ;;  %v288_v39 = vshrl.u32 %v287_v38, 7 }
   0x6   :  { %v28_v14 = vld [vmem:[%s558_s0 + $0x18] sm:$0xff]  ;;  %v370_v17 = vld [vmem:[%s557_s1 + $0x4] ss:$8 sps:$4 sm:$0xff]   ;;  %v372_v18 = vld [vmem:[%s557_s1] ss:$8 sps:$4 sm:$0xff]  }
   0x7   :  { %230 = vmatpush1.bf16.msra.mxu0 %v354_v3  ;;  %v30_v15 = vpack.c.bf16 %v28_v14, %v26_v13  ;;  %v373_v19 = vld [vmem:[%s557_s1 + $0xf4] ss:$8 sps:$4 sm:$0xff]   ;;  %v375_v20 = vld [vmem:[%s557_s1 + $0xf0] ss:$8 sps:$4 sm:$0xff]   ;;  %v376_v21 = vld [vmem:[%s557_s1 + $0xe4] ss:$8 sps:$4 sm:$0xff]  }
   0x8   :  { %231 = vmatprep.subr.bf16.mxu0 %v355_v4  ;;  %v378_v22 = vld [vmem:[%s557_s1 + $0xe0] ss:$8 sps:$4 sm:$0xff]   ;;  %v379_v23 = vld [vmem:[%s557_s1 + $0xd4] ss:$8 sps:$4 sm:$0xff]   ;;  %v381_v24 = vld [vmem:[%s557_s1 + $0xd0] ss:$8 sps:$4 sm:$0xff]  }
   0x9   :  { %259 = vmatprep.mubr.bf16.mxu0 %v30_v15  ;;  %v382_v25 = vld [vmem:[%s557_s1 + $0xc4] ss:$8 sps:$4 sm:$0xff]   ;;  %v384_v26 = vld [vmem:[%s557_s1 + $0xc0] ss:$8 sps:$4 sm:$0xff]   ;;  %v385_v27 = vld [vmem:[%s557_s1 + $0xb4] ss:$8 sps:$4 sm:$0xff]  }
   0xa   :  { %v387_v28 = vld [vmem:[%s557_s1 + $0xb0] ss:$8 sps:$4 sm:$0xff]   ;;  %v388_v29 = vld [vmem:[%s557_s1 + $0xa4] ss:$8 sps:$4 sm:$0xff]   ;;  %v390_v30 = vld [vmem:[%s557_s1 + $0xa0] ss:$8 sps:$4 sm:$0xff]  }
   0xb   :  { %232 = vmatpush1.bf16.msra.mxu0 %v357_v5  ;;  %v391_v31 = vld [vmem:[%s557_s1 + $0x94] ss:$8 sps:$4 sm:$0xff]   ;;  %v393_v32 = vld [vmem:[%s557_s1 + $0x90] ss:$8 sps:$4 sm:$0xff]   ;;  %v394_v33 = vld [vmem:[%s557_s1 + $0x84] ss:$8 sps:$4 sm:$0xff]  }
   0xc   :  { %233 = vmatprep.subr.bf16.mxu0 %v358_v6  ;;  %v396_v34 = vld [vmem:[%s557_s1 + $0x80] ss:$8 sps:$4 sm:$0xff]   ;;  %v27_v36 = vld [vmem:[%s558_s0 + $0x10] sm:$0xff]  ;;  %v289_v40 = vsub.s32 0, %v288_v39  ;;  %v293_v42 = vsub.s32 1, %v288_v39  ;;  %v304_v57 = vld [vmem:[%s560_s3 + $0x18] sm:$0xff] }
   0xd   :  { %v25_v35 = vld [vmem:[%s558_s0] sm:$0xff]  ;;  %v302_v49 = vld [vmem:[%s560_s3 + $0x8] sm:$0xff]  ;;  %v303_v53 = vld [vmem:[%s560_s3 + $0x10] sm:$0xff] }
   0xe   :  { %v29_v37 = vpack.c.bf16 %v27_v36, %v25_v35  ;;  %v285_v41 = vld [vmem:[%s559_s2] sm:$0x3] }
   0xf   :  { %234 = vmatpush1.bf16.msra.mxu0 %v360_v7  ;;  %v290_v43 = vrot.slane %v285_v41, %v289_v40  ;;  %v294_v44 = vrot.slane %v285_v41, %v293_v42  ;;  %v301_v46 = vld [vmem:[%s560_s3] sm:$0xff] }
  0x10   :  { %235 = vmatprep.subr.bf16.mxu0 %v361_v8 }
  0x13   :  { %236 = vmatpush1.bf16.msra.mxu0 %v363_v9 }
  0x14   :  { %237 = vmatprep.subr.bf16.mxu0 %v364_v10 }
  0x17   :  { %238 = vmatpush1.bf16.msra.mxu0 %v366_v11 }
  0x18   :  { %239 = vmatprep.subr.bf16.mxu0 %v367_v12 }
  0x1b   :  { %240 = vmatpush1.bf16.msra.mxu0 %v369_v16 }
  0x1c   :  { %241 = vmatprep.subr.bf16.mxu0 %v370_v17 }
  0x1f   :  { %242 = vmatpush1.bf16.msra.mxu0 %v372_v18 }
  0x20   :  { %243 = vmatprep.subr.bf16.mxu0 %v373_v19 }
  0x23   :  { %244 = vmatpush2.bf16.msra.mxu0 %v375_v20 }
  0x24   :  { %245 = vmatprep.subr.bf16.mxu0 %v376_v21 }
  0x27   :  { %246 = vmatpush2.bf16.msra.mxu0 %v378_v22 }
  0x28   :  { %247 = vmatprep.subr.bf16.mxu0 %v379_v23 }
  0x2b   :  { %248 = vmatpush2.bf16.msra.mxu0 %v381_v24 }
  0x2c   :  { %249 = vmatprep.subr.bf16.mxu0 %v382_v25 }
  0x2f   :  { %250 = vmatpush2.bf16.msra.mxu0 %v384_v26 }
  0x30   :  { %251 = vmatprep.subr.bf16.mxu0 %v385_v27 }
  0x33   :  { %252 = vmatpush2.bf16.msra.mxu0 %v387_v28 }
  0x34   :  { %253 = vmatprep.subr.bf16.mxu0 %v388_v29 }
  0x37   :  { %254 = vmatpush2.bf16.msra.mxu0 %v390_v30 }
  0x38   :  { %255 = vmatprep.subr.bf16.mxu0 %v391_v31 }
  0x3b   :  { %256 = vmatpush2.bf16.msra.mxu0 %v393_v32 }
  0x3c   :  { %257 = vmatprep.subr.bf16.mxu0 %v394_v33 }
  0x3f   :  { %258 = vmatpush2.bf16.msra.mxu0 %v396_v34 }
  0x42   :  { %260 = vmatmul.mubr.bf16.vlgmr.msra.gmra.mxu0 %v29_v37 }
 0x102   :  { %v261_v45 = vpop.f32.mrf.mxu0 }
 0x103   :  { %v297_v47 = vadd.f32 %v290_v43, %v261_v45 }
 0x104   :  { %v263_v48 = vpop.f32.mrf.mxu0 }
 0x105   :  { %v305_v50 = vadd.f32 %v301_v46, %v297_v47  ;;  %v298_v51 = vadd.f32 %v294_v44, %v263_v48 }
 0x106   :  { %v265_v52 = vpop.f32.mrf.mxu0 }
 0x107   :  { %309 = vst [vmem:[%s561_s4] sm:$0xff] %v305_v50  ;;  %v306_v54 = vadd.f32 %v302_v49, %v298_v51  ;;  %v299_v55 = vadd.f32 %v290_v43, %v265_v52 }
 0x108   :  { %v267_v56 = vpop.f32.mrf.mxu0 }
 0x109   :  { %310 = vst [vmem:[%s561_s4 + $0x8] sm:$0xff] %v306_v54  ;;  %v307_v58 = vadd.f32 %v303_v53, %v299_v55  ;;  %v300_v59 = vadd.f32 %v294_v44, %v267_v56 }
 0x10b   :  { %311 = vst [vmem:[%s561_s4 + $0x10] sm:$0xff] %v307_v58  ;;  %v308_v60 = vadd.f32 %v304_v57, %v300_v59 }
 0x10d   :  { %312 = vst [vmem:[%s561_s4 + $0x18] sm:$0xff] %v308_v60 }

// kernel: image_encoder_forward.19
= control target key start
LH: loop header
LB: loop body
LE: loop exit
PB: predicated region body
PF: predicated region fallthrough
CT: control target
= control target key end

     0   :  { %s1343_s15 = smov 0   ;;  %s1345_s16 = smov 0   ;;  %s1513_s0 = inlined_call_operand.vmem [shape: f32[16,1024], index: 0, kind: input, shape index: {}]   ;;  %s1514_s1 = inlined_call_operand.vmem [shape: bf16[1024,256], index: 1, kind: input, shape index: {}]   ;;  %s1515_s2 = inlined_call_operand.vmem [shape: f32[1,256], index: 2, kind: input, shape index: {}]   ;;  %s1516_s3 = inlined_call_operand.vmem [shape: f32[16,256], index: 3, kind: input, shape index: {}]   ;;  %s1517_s4 = inlined_call_operand.vmem [shape: f32[16,256], index: 4, kind: output, shape index: {}]  }
   0x1   :  { %s1347_s17 = smov 0   ;;  %s1349_s18 = smov 0  }
   0x2   :  { %s1351_s19 = smov 0  }
   0x3 LB: > { %s26_s20 = sadd.s32 1, %s1311_s18  ;;  %p49_p1 = scmp.ne.s32.totalorder %s1303_s16, %s1299_s15  ;;  %s1315_s19 = sphi %s1351_s19, %s14_s19   ;;  %s1311_s18 = sphi %s1349_s18, %s1521_s18   ;;  %s1307_s17 = sphi %s1347_s17, %s1520_s17   ;;  %s1303_s16 = sphi %s1345_s16, %s1519_s16   ;;  %s1299_s15 = sphi %s1343_s15, %s1518_s15  }
   0x4   : > { %p27_p0 = scmp.ge.s32.totalorder %s26_s20, 2  ;;  %p50_p2 = scmp.eq.s32.totalorder %s1315_s19, 0 }
   0x5   : > { %s42_s22 = sadd.s32 1, %s1303_s16  ;;  %p1059_p5 = scmp.ge.s32.totalorder %s1315_s19, 2 }
   0x6   : > { %s1523_s20 = smov (%p27_p0, %s26_s20), 0  ;;  %p51_p3 = por %p50_p2, %p49_p1 }
   0x7   : > { %s38_s21 = ssub.s32 %s1311_s18, %s1523_s20  ;;  %208 = sbr.rel (%p1059_p5) target bundleno = 20 (0x14), region = 24 }
   0x8   : > { %p40_p4 = scmp.eq.s32.totalorder %s38_s21, 0 }
   0xa   : > { %s1378_s23 = scalar_select %p40_p4, %s1303_s16, %s42_s22  }
   0xc   : > { %211 = sbr.rel (!%p51_p3) target bundleno = 20 (0x14), region = 28  ;;  %s213_s24 = sand.u32 (%p51_p3), 1, %s1303_s16  }
   0xd   : > { %s1138_s25 = sshll.u32 (%p51_p3), %s1311_s18, 5  ;;  %s1060_s26 = sshll.u32 (%p51_p3), %s213_s24, 6 }
   0xe   : > { %s221_s29 = scalar_lea.vmem (%p51_p3), %s1513_s0, %s1138_s25  ;;  %s215_s30 = scalar_lea.vmem (%p51_p3), [#allocation3], %s1060_s26 }
   0xf   : > { %v234_v0 = vld [vmem:[%s221_s29] sm:$0xff] (%p51_p3)  ;;  %v236_v1 = vld [vmem:[%s221_s29 + $0x8] sm:$0xff] (%p51_p3)  ;;  %v238_v2 = vld [vmem:[%s221_s29 + $0x10] sm:$0xff] (%p51_p3) }
  0x10   : > { %235 = vst [vmem:[%s215_s30] sm:$0xff] (%p51_p3), %v234_v0  ;;  %237 = vst [vmem:[%s215_s30 + $0x8] sm:$0xff] (%p51_p3), %v236_v1  ;;  %v240_v3 = vld [vmem:[%s221_s29 + $0x18] sm:$0xff] (%p51_p3)  ;;  %v242_v4 = vld [vmem:[%s221_s29 + $0x40] sm:$0xff] (%p51_p3) }
  0x11   : > { %239 = vst [vmem:[%s215_s30 + $0x10] sm:$0xff] %v238_v2  ;;  %v244_v5 = vld [vmem:[%s221_s29 + $0x48] sm:$0xff]  ;;  %241 = vst [vmem:[%s215_s30 + $0x18] sm:$0xff] %v240_v3  ;;  %v246_v6 = vld [vmem:[%s221_s29 + $0x50] sm:$0xff] }
  0x12   : > { %243 = vst [vmem:[%s215_s30 + $0x20] sm:$0xff] %v242_v4  ;;  %245 = vst [vmem:[%s215_s30 + $0x28] sm:$0xff] %v244_v5  ;;  %v248_v7 = vld [vmem:[%s221_s29 + $0x58] sm:$0xff] }
  0x13   : > { %247 = vst [vmem:[%s215_s30 + $0x30] sm:$0xff] %v246_v6  ;;  %249 = vst [vmem:[%s215_s30 + $0x38] sm:$0xff] %v248_v7 }
  0x14 PF: > { %p1063_p6 = scmp.ge.s32.totalorder %s1315_s19, 1  ;;  %p269_p7 = scmp.lt.s32.totalorder %s1315_s19, 3 }
  0x16   : > { %p270_p8 = pnand %p1063_p6, %p269_p7 }
  0x17   : > { %s276_s5 = sand.u32 (!%p270_p8), 1, %s1299_s15   ;;  %s1065_s6 = sshll.u32 (!%p270_p8), %s1307_s17, 6 }
  0x18   : > { %273 = sbr.rel (%p270_p8) target bundleno = 321 (0x141), region = 55  ;;  %s1064_s7 = sshll.u32 (!%p270_p8), %s276_s5, 6 }
  0x19   : > { %p334_p9 = scmp.lt.s32.totalorder (!%p270_p8), %s1065_s6, 127  ;;  %s1395_s12 = scalar_lea.vmem (!%p270_p8), [#allocation3], %s1064_s7 }
  0x1a   : > { %p1068_p10 = scmp.ne.s32.totalorder (!%p270_p8), %s1307_s17, 0 }
  0x1d   : > { %s1525_s6 = smov (!%p334_p9, %s1065_s6), 127  ;;  %376 = sbr.rel (%p1068_p10) target bundleno = 37 (0x25), region = 63 }
  0x1e   : > { %s1139_s8 = sshll.u32 %s1525_s6, 3 }
  0x1f   : > { %s1393_s11 = scalar_lea.vmem %s1514_s1, %s1139_s8 }
  0x22   : > { %v1317_v8 = vmov 0.0  }
  0x23   : > { %377 = vst [vmem:[#allocation2 + $0x10] sm:$0xff] %v1317_v8  ;;  %378 = vst [vmem:[#allocation2] sm:$0xff] %v1317_v8 }
  0x24   : > { %379 = vst [vmem:[#allocation2 + $0x18] sm:$0xff] %v1317_v8  ;;  %380 = vst [vmem:[#allocation2 + $0x8] sm:$0xff] %v1317_v8 }
  0x25 PF: > { %v1181_v9 = vld [vmem:[%s1393_s11 + $0x74] ss:$8 sps:$4 sm:$0xff]   ;;  %v1185_v11 = vld [vmem:[%s1393_s11 + $0x70] ss:$8 sps:$4 sm:$0xff]   ;;  %v1187_v13 = vld [vmem:[%s1393_s11 + $0x64] ss:$8 sps:$4 sm:$0xff]  }
  0x26   : > { %v1183_v10 = vld [vmem:[%s1393_s11 + $0x174] ss:$8 sps:$4 sm:$0xff]   ;;  %781 = vmatprep.subr.bf16.mxu0 %v1181_v9  ;;  %v1186_v12 = vld [vmem:[%s1393_s11 + $0x170] ss:$8 sps:$4 sm:$0xff]   ;;  %v1189_v14 = vld [vmem:[%s1393_s11 + $0x164] ss:$8 sps:$4 sm:$0xff]  }
  0x27   : > { %824 = vmatprep.subr.bf16.mxu1 %v1183_v10  ;;  %782 = vmatpush1.bf16.msra.mxu0 %v1185_v11  ;;  %v1191_v15 = vld [vmem:[%s1393_s11 + $0x60] ss:$8 sps:$4 sm:$0xff]   ;;  %v1193_v17 = vld [vmem:[%s1393_s11 + $0x54] ss:$8 sps:$4 sm:$0xff]   ;;  %v1197_v19 = vld [vmem:[%s1393_s11 + $0x50] ss:$8 sps:$4 sm:$0xff]  }
  0x28   : > { %825 = vmatpush1.bf16.msra.mxu1 %v1186_v12  ;;  %783 = vmatprep.subr.bf16.mxu0 %v1187_v13  ;;  %v1192_v16 = vld [vmem:[%s1393_s11 + $0x160] ss:$8 sps:$4 sm:$0xff]   ;;  %v1195_v18 = vld [vmem:[%s1393_s11 + $0x154] ss:$8 sps:$4 sm:$0xff]   ;;  %v1198_v20 = vld [vmem:[%s1393_s11 + $0x150] ss:$8 sps:$4 sm:$0xff]  }
  0x29   : > { %826 = vmatprep.subr.bf16.mxu1 %v1189_v14  ;;  %v1199_v21 = vld [vmem:[%s1393_s11 + $0x44] ss:$8 sps:$4 sm:$0xff]   ;;  %v1203_v23 = vld [vmem:[%s1393_s11 + $0x40] ss:$8 sps:$4 sm:$0xff]   ;;  %v1205_v25 = vld [vmem:[%s1393_s11 + $0x34] ss:$8 sps:$4 sm:$0xff]  }
  0x2a   : > { %v1201_v22 = vld [vmem:[%s1393_s11 + $0x144] ss:$8 sps:$4 sm:$0xff]   ;;  %v1204_v24 = vld [vmem:[%s1393_s11 + $0x140] ss:$8 sps:$4 sm:$0xff]   ;;  %v1207_v26 = vld [vmem:[%s1393_s11 + $0x134] ss:$8 sps:$4 sm:$0xff]  }
  0x2b   : > { %784 = vmatpush1.bf16.msra.mxu0 %v1191_v15  ;;  %v1209_v27 = vld [vmem:[%s1393_s11 + $0x30] ss:$8 sps:$4 sm:$0xff]   ;;  %v1211_v29 = vld [vmem:[%s1393_s11 + $0x24] ss:$8 sps:$4 sm:$0xff]   ;;  %v1215_v31 = vld [vmem:[%s1393_s11 + $0x20] ss:$8 sps:$4 sm:$0xff]  }
  0x2c   : > { %827 = vmatpush1.bf16.msra.mxu1 %v1192_v16  ;;  %785 = vmatprep.subr.bf16.mxu0 %v1193_v17  ;;  %v1210_v28 = vld [vmem:[%s1393_s11 + $0x130] ss:$8 sps:$4 sm:$0xff]   ;;  %v1213_v30 = vld [vmem:[%s1393_s11 + $0x124] ss:$8 sps:$4 sm:$0xff]   ;;  %v1216_v32 = vld [vmem:[%s1393_s11 + $0x120] ss:$8 sps:$4 sm:$0xff]  }
  0x2d   : > { %828 = vmatprep.subr.bf16.mxu1 %v1195_v18  ;;  %v1217_v33 = vld [vmem:[%s1393_s11 + $0x14] ss:$8 sps:$4 sm:$0xff]   ;;  %v1221_v35 = vld [vmem:[%s1393_s11 + $0x10] ss:$8 sps:$4 sm:$0xff]   ;;  %v1223_v37 = vld [vmem:[%s1393_s11 + $0x4] ss:$8 sps:$4 sm:$0xff]  }
  0x2e   : > { %v1219_v34 = vld [vmem:[%s1393_s11 + $0x114] ss:$8 sps:$4 sm:$0xff]   ;;  %v1222_v36 = vld [vmem:[%s1393_s11 + $0x110] ss:$8 sps:$4 sm:$0xff]   ;;  %v1225_v38 = vld [vmem:[%s1393_s11 + $0x104] ss:$8 sps:$4 sm:$0xff]  }
  0x2f   : > { %786 = vmatpush1.bf16.msra.mxu0 %v1197_v19  ;;  %v1227_v39 = vld [vmem:[%s1393_s11] ss:$8 sps:$4 sm:$0xff]   ;;  %v1229_v41 = vld [vmem:[%s1393_s11 + $0xf4] ss:$8 sps:$4 sm:$0xff]   ;;  %v1233_v43 = vld [vmem:[%s1393_s11 + $0xf0] ss:$8 sps:$4 sm:$0xff]  }
  0x30   : > { %829 = vmatpush1.bf16.msra.mxu1 %v1198_v20  ;;  %787 = vmatprep.subr.bf16.mxu0 %v1199_v21  ;;  %v1228_v40 = vld [vmem:[%s1393_s11 + $0x100] ss:$8 sps:$4 sm:$0xff]   ;;  %v1231_v42 = vld [vmem:[%s1393_s11 + $0x1f4] ss:$8 sps:$4 sm:$0xff]   ;;  %v1234_v44 = vld [vmem:[%s1393_s11 + $0x1f0] ss:$8 sps:$4 sm:$0xff]  }
  0x31   : > { %830 = vmatprep.subr.bf16.mxu1 %v1201_v22  ;;  %v1235_v45 = vld [vmem:[%s1393_s11 + $0xe4] ss:$8 sps:$4 sm:$0xff]   ;;  %v1239_v47 = vld [vmem:[%s1393_s11 + $0xe0] ss:$8 sps:$4 sm:$0xff]   ;;  %v1241_v49 = vld [vmem:[%s1393_s11 + $0xd4] ss:$8 sps:$4 sm:$0xff]  }
  0x32   : > { %v1237_v46 = vld [vmem:[%s1393_s11 + $0x1e4] ss:$8 sps:$4 sm:$0xff]   ;;  %v1240_v48 = vld [vmem:[%s1393_s11 + $0x1e0] ss:$8 sps:$4 sm:$0xff]   ;;  %v1243_v50 = vld [vmem:[%s1393_s11 + $0x1d4] ss:$8 sps:$4 sm:$0xff]  }
  0x33   : > { %788 = vmatpush1.bf16.msra.mxu0 %v1203_v23  ;;  %v1245_v51 = vld [vmem:[%s1393_s11 + $0xd0] ss:$8 sps:$4 sm:$0xff]   ;;  %v1247_v53 = vld [vmem:[%s1393_s11 + $0xc4] ss:$8 sps:$4 sm:$0xff]   ;;  %v1251_v59 = vld [vmem:[%s1393_s11 + $0xc0] ss:$8 sps:$4 sm:$0xff]  }
  0x34   : > { %831 = vmatpush1.bf16.msra.mxu1 %v1204_v24  ;;  %789 = vmatprep.subr.bf16.mxu0 %v1205_v25  ;;  %v1246_v52 = vld [vmem:[%s1393_s11 + $0x1d0] ss:$8 sps:$4 sm:$0xff]   ;;  %v1249_v54 = vld [vmem:[%s1393_s11 + $0x1c4] ss:$8 sps:$4 sm:$0xff]   ;;  %v1252_v60 = vld [vmem:[%s1393_s11 + $0x1c0] ss:$8 sps:$4 sm:$0xff]  }
  0x35   : > { %832 = vmatprep.subr.bf16.mxu1 %v1207_v26  ;;  %v382_v55 = vld [vmem:[%s1395_s12 + $0x8] sm:$0xff]  ;;  %v384_v57 = vld [vmem:[%s1395_s12 + $0x18] sm:$0xff]  ;;  %v381_v15 = vld [vmem:[%s1395_s12] sm:$0xff]  ;;  %p1133_p11 = scmp.ne.s32.totalorder %s1307_s17, 1 }
  0x36   : > { %v386_v56 = vld [vmem:[%s1395_s12 + $0x28] sm:$0xff]  ;;  %v388_v58 = vld [vmem:[%s1395_s12 + $0x38] sm:$0xff]  ;;  %v385_v16 = vld [vmem:[%s1395_s12 + $0x20] sm:$0xff] }
  0x37   : > { %790 = vmatpush1.bf16.msra.mxu0 %v1209_v27  ;;  %v390_v61 = vpack.c.bf16 %v386_v56, %v382_v55  ;;  %v392_v62 = vpack.c.bf16 %v388_v58, %v384_v57  ;;  %v1253_v63 = vld [vmem:[%s1393_s11 + $0xb4] ss:$8 sps:$4 sm:$0xff]   ;;  %v1257_v1 = vld [vmem:[%s1393_s11 + $0xb0] ss:$8 sps:$4 sm:$0xff]   ;;  %v1259_v3 = vld [vmem:[%s1393_s11 + $0xa4] ss:$8 sps:$4 sm:$0xff]   ;;  %v389_v19 = vpack.c.bf16 %v385_v16, %v381_v15 }
  0x38   : > { %833 = vmatpush1.bf16.msra.mxu1 %v1210_v28  ;;  %791 = vmatprep.subr.bf16.mxu0 %v1211_v29  ;;  %v1255_v0 = vld [vmem:[%s1393_s11 + $0x1b4] ss:$8 sps:$4 sm:$0xff]   ;;  %v1258_v2 = vld [vmem:[%s1393_s11 + $0x1b0] ss:$8 sps:$4 sm:$0xff]   ;;  %v1261_v4 = vld [vmem:[%s1393_s11 + $0x1a4] ss:$8 sps:$4 sm:$0xff]  }
  0x39   : > { %834 = vmatprep.subr.bf16.mxu1 %v1213_v30  ;;  %813 = vmatprep.mubr.bf16.mxu0 %v390_v61  ;;  %v1263_v5 = vld [vmem:[%s1393_s11 + $0xa0] ss:$8 sps:$4 sm:$0xff]   ;;  %v1265_v7 = vld [vmem:[%s1393_s11 + $0x94] ss:$8 sps:$4 sm:$0xff]   ;;  %v1269_v9 = vld [vmem:[%s1393_s11 + $0x90] ss:$8 sps:$4 sm:$0xff]  }
  0x3a   : > { %856 = vmatprep.mubr.bf16.mxu1 %v392_v62  ;;  %v1264_v6 = vld [vmem:[%s1393_s11 + $0x1a0] ss:$8 sps:$4 sm:$0xff]   ;;  %v1267_v8 = vld [vmem:[%s1393_s11 + $0x194] ss:$8 sps:$4 sm:$0xff]   ;;  %v1270_v10 = vld [vmem:[%s1393_s11 + $0x190] ss:$8 sps:$4 sm:$0xff]  }
  0x3b   : > { %792 = vmatpush1.bf16.msra.mxu0 %v1215_v31  ;;  %v1271_v11 = vld [vmem:[%s1393_s11 + $0x84] ss:$8 sps:$4 sm:$0xff]   ;;  %v1275_v13 = vld [vmem:[%s1393_s11 + $0x80] ss:$8 sps:$4 sm:$0xff]   ;;  %v383_v17 = vld [vmem:[%s1395_s12 + $0x10] sm:$0xff] }
  0x3c   : > { %835 = vmatpush1.bf16.msra.mxu1 %v1216_v32  ;;  %793 = vmatprep.subr.bf16.mxu0 %v1217_v33  ;;  %v1273_v12 = vld [vmem:[%s1393_s11 + $0x184] ss:$8 sps:$4 sm:$0xff]   ;;  %v1276_v14 = vld [vmem:[%s1393_s11 + $0x180] ss:$8 sps:$4 sm:$0xff]   ;;  %v387_v18 = vld [vmem:[%s1395_s12 + $0x30] sm:$0xff] }
  0x3d   : > { %836 = vmatprep.subr.bf16.mxu1 %v1219_v34  ;;  %v391_v20 = vpack.c.bf16 %v387_v18, %v383_v17  ;;  %v393_v22 = vld [vmem:[#allocation2 + $0x10] sm:$0xff]  ;;  %v394_v26 = vld [vmem:[#allocation2] sm:$0xff]  ;;  %v395_v31 = vld [vmem:[#allocation2 + $0x18] sm:$0xff] }
  0x3f   : > { %794 = vmatpush1.bf16.msra.mxu0 %v1221_v35 }
  0x40   : > { %837 = vmatpush1.bf16.msra.mxu1 %v1222_v36  ;;  %795 = vmatprep.subr.bf16.mxu0 %v1223_v37  ;;  %v396_v36 = vld [vmem:[#allocation2 + $0x8] sm:$0xff] }
  0x41   : > { %838 = vmatprep.subr.bf16.mxu1 %v1225_v38 }
  0x43   : > { %796 = vmatpush1.bf16.msra.mxu0 %v1227_v39 }
  0x44   : > { %839 = vmatpush1.bf16.msra.mxu1 %v1228_v40  ;;  %797 = vmatprep.subr.bf16.mxu0 %v1229_v41 }
  0x45   : > { %840 = vmatprep.subr.bf16.mxu1 %v1231_v42 }
  0x47   : > { %798 = vmatpush2.bf16.msra.mxu0 %v1233_v43 }
  0x48   : > { %841 = vmatpush2.bf16.msra.mxu1 %v1234_v44  ;;  %799 = vmatprep.subr.bf16.mxu0 %v1235_v45 }
  0x49   : > { %842 = vmatprep.subr.bf16.mxu1 %v1237_v46 }
  0x4b   : > { %800 = vmatpush2.bf16.msra.mxu0 %v1239_v47 }
  0x4c   : > { %843 = vmatpush2.bf16.msra.mxu1 %v1240_v48  ;;  %801 = vmatprep.subr.bf16.mxu0 %v1241_v49 }
  0x4d   : > { %844 = vmatprep.subr.bf16.mxu1 %v1243_v50 }
  0x4f   : > { %802 = vmatpush2.bf16.msra.mxu0 %v1245_v51 }
  0x50   : > { %845 = vmatpush2.bf16.msra.mxu1 %v1246_v52  ;;  %803 = vmatprep.subr.bf16.mxu0 %v1247_v53 }
  0x51   : > { %846 = vmatprep.subr.bf16.mxu1 %v1249_v54 }
  0x53   : > { %804 = vmatpush2.bf16.msra.mxu0 %v1251_v59 }
  0x54   : > { %847 = vmatpush2.bf16.msra.mxu1 %v1252_v60  ;;  %805 = vmatprep.subr.bf16.mxu0 %v1253_v63 }
  0x55   : > { %848 = vmatprep.subr.bf16.mxu1 %v1255_v0 }
  0x57   : > { %806 = vmatpush2.bf16.msra.mxu0 %v1257_v1 }
  0x58   : > { %849 = vmatpush2.bf16.msra.mxu1 %v1258_v2  ;;  %807 = vmatprep.subr.bf16.mxu0 %v1259_v3 }
  0x59   : > { %850 = vmatprep.subr.bf16.mxu1 %v1261_v4 }
  0x5b   : > { %808 = vmatpush2.bf16.msra.mxu0 %v1263_v5 }
  0x5c   : > { %851 = vmatpush2.bf16.msra.mxu1 %v1264_v6  ;;  %809 = vmatprep.subr.bf16.mxu0 %v1265_v7 }
  0x5d   : > { %852 = vmatprep.subr.bf16.mxu1 %v1267_v8 }
  0x5f   : > { %810 = vmatpush2.bf16.msra.mxu0 %v1269_v9 }
  0x60   : > { %853 = vmatpush2.bf16.msra.mxu1 %v1270_v10  ;;  %811 = vmatprep.subr.bf16.mxu0 %v1271_v11 }
  0x61   : > { %854 = vmatprep.subr.bf16.mxu1 %v1273_v12 }
  0x63   : > { %812 = vmatpush2.bf16.msra.mxu0 %v1275_v13 }
  0x64   : > { %855 = vmatpush2.bf16.msra.mxu1 %v1276_v14 }
  0x66   : > { %814 = vmatmul.mubr.bf16.vlgmr.msra.gmra.mxu0 %v389_v19 }
  0x67   : > { %857 = vmatmul.mubr.bf16.vlgmr.msra.gmra.mxu1 %v391_v20 }
 0x126   : > { %v815_v21 = vpop.f32.mrf.mxu0 }
 0x127   : > { %v858_v23 = vpop.f32.mrf.mxu1 }
 0x128   : > { %v859_v24 = vadd.f32 %v858_v23, %v815_v21  ;;  %v817_v25 = vpop.f32.mrf.mxu0 }
 0x129   : > { %v860_v27 = vpop.f32.mrf.mxu1 }
 0x12a   : > { %v867_v28 = vadd.f32 %v859_v24, %v393_v22  ;;  %v861_v29 = vadd.f32 %v860_v27, %v817_v25  ;;  %v819_v30 = vpop.f32.mrf.mxu0 }
 0x12b   : > { %v862_v32 = vpop.f32.mrf.mxu1 }
 0x12c   : > { %871 = vst [vmem:[#allocation2 + $0x10] sm:$0xff] %v867_v28  ;;  %v868_v33 = vadd.f32 %v861_v29, %v394_v26  ;;  %v863_v34 = vadd.f32 %v862_v32, %v819_v30  ;;  %v821_v35 = vpop.f32.mrf.mxu0 }
 0x12d   : > { %v864_v37 = vpop.f32.mrf.mxu1 }
 0x12e   : > { %872 = vst [vmem:[#allocation2] sm:$0xff] %v868_v33  ;;  %v869_v38 = vadd.f32 %v863_v34, %v395_v31  ;;  %v865_v39 = vadd.f32 %v864_v37, %v821_v35  ;;  %878 = sbr.rel (%p1133_p11) target bundleno = 321 (0x141), region = 67 }
 0x130   : > { %873 = vst [vmem:[#allocation2 + $0x18] sm:$0xff] %v869_v38  ;;  %v870_v40 = vadd.f32 %v865_v39, %v396_v36 }
 0x132   : > { %874 = vst [vmem:[#allocation2 + $0x8] sm:$0xff] %v870_v40 }
 0x133   : > { %v885_v41 = vlaneseq  ;;  %v883_v43 = vld [vmem:[%s1515_s2] sm:$0x3]  ;;  %v879_v44 = vld [vmem:[#allocation2 + $0x10] sm:$0xff]  ;;  %v900_v53 = vld [vmem:[%s1516_s3 + $0x8] sm:$0xff] }
 0x134   : > { %v899_v51 = vld [vmem:[%s1516_s3] sm:$0xff]  ;;  %v901_v54 = vld [vmem:[%s1516_s3 + $0x10] sm:$0xff]  ;;  %v902_v55 = vld [vmem:[%s1516_s3 + $0x18] sm:$0xff] }
 0x135   : > { %v886_v42 = vshrl.u32 %v885_v41, 7  ;;  %v880_v47 = vld [vmem:[#allocation2] sm:$0xff] }
 0x137   : > { %v887_v45 = vsub.s32 0, %v886_v42  ;;  %v891_v46 = vsub.s32 1, %v886_v42  ;;  %v881_v48 = vld [vmem:[#allocation2 + $0x18] sm:$0xff] }
 0x139   : > { %v882_v49 = vld [vmem:[#allocation2 + $0x8] sm:$0xff]  ;;  %v888_v50 = vrot.slane %v883_v43, %v887_v45  ;;  %v892_v52 = vrot.slane %v883_v43, %v891_v46 }
 0x13b   : > { %v895_v56 = vadd.f32 %v888_v50, %v879_v44  ;;  %v896_v57 = vadd.f32 %v892_v52, %v880_v47  ;;  %v897_v58 = vadd.f32 %v888_v50, %v881_v48  ;;  %v898_v59 = vadd.f32 %v892_v52, %v882_v49 }
 0x13d   : > { %v903_v60 = vadd.f32 %v899_v51, %v895_v56  ;;  %v904_v61 = vadd.f32 %v900_v53, %v896_v57  ;;  %v905_v62 = vadd.f32 %v901_v54, %v897_v58  ;;  %v906_v63 = vadd.f32 %v902_v55, %v898_v59 }
 0x13f   : > { %907 = vst [vmem:[%s1517_s4] sm:$0xff] %v903_v60  ;;  %908 = vst [vmem:[%s1517_s4 + $0x8] sm:$0xff] %v904_v61 }
 0x140   : > { %909 = vst [vmem:[%s1517_s4 + $0x10] sm:$0xff] %v905_v62  ;;  %910 = vst [vmem:[%s1517_s4 + $0x18] sm:$0xff] %v906_v63 }
 0x141 PF: > { %s14_s19 = sadd.s32 1, %s1315_s19   ;;  %s1518_s15 = smov %s1303_s16 }
 0x142   : > { %p11_p12 = scmp.ge.s32.totalorder %s14_s19, 4   ;;  %s1519_s16 = smov %s1378_s23 }
 0x143   : > { %s1520_s17 = smov %s1311_s18  ;;  %s1521_s18 = smov %s1523_s20 }
 0x144   :  { %13 = sbr.rel (!%p11_p12) target bundleno = 3 (0x3), region = 111 }

// kernel: image_encoder_forward.18
= control target key start
LH: loop header
LB: loop body
LE: loop exit
PB: predicated region body
PF: predicated region fallthrough
CT: control target
= control target key end

     0   :  { %s2171_s0 = inlined_call_operand.vmem [shape: f32[16,256], index: 0, kind: input, shape index: {}]   ;;  %s2172_s1 = inlined_call_operand.vmem [shape: bf16[256,1024], index: 1, kind: input, shape index: {}]   ;;  %s2173_s2 = inlined_call_operand.vmem [shape: f32[1,256], index: 2, kind: input, shape index: {}]   ;;  %s2174_s3 = inlined_call_operand.vmem [shape: f32[1,256], index: 3, kind: input, shape index: {}]   ;;  %s2175_s4 = inlined_call_operand.vmem [shape: f32[1,1024], index: 4, kind: input, shape index: {}]   ;;  %s2176_s5 = inlined_call_operand.vmem [shape: f32[16,1024], index: 5, kind: output, shape index: {}]  }
   0x1   :  { %v1605_v0 = vld [vmem:[%s2171_s0] sm:$0xff]  ;;  %v1610_v1 = vld [vmem:[%s2171_s0 + $0x8] sm:$0xff]  ;;  %v1615_v2 = vld [vmem:[%s2171_s0 + $0x10] sm:$0xff] }
   0x2   :  { %v48_v3 = vadd.f32 %v1610_v1, %v1605_v0  ;;  %v1622_v4 = vld [vmem:[%s2171_s0 + $0x18] sm:$0xff]  ;;  %v201_v6 = vld [vmem:[%s2172_s1 + $0x1c0] sm:$0xff]  ;;  %v202_v8 = vld [vmem:[%s2172_s1 + $0x1c8] sm:$0xff] }
   0x3   :  { %v51_v5 = vadd.f32 %v1622_v4, %v1615_v2  ;;  %v205_v7 = vld [vmem:[%s2172_s1 + $0x1e0] sm:$0xff]  ;;  %v206_v10 = vld [vmem:[%s2172_s1 + $0x1e8] sm:$0xff] }
   0x4   :  { %49 = vadd.xlane.f32.xlu0 %v48_v3  ;;  %v1413_v9 = vcombine.high %v201_v6, %v205_v7  ;;  %v1412_v11 = vcombine.low %v201_v6, %v205_v7  ;;  %v193_v12 = vld [vmem:[%s2172_s1 + $0x180] sm:$0xff]  ;;  %v1415_v14 = vcombine.high %v202_v8, %v206_v10  ;;  %v1414_v15 = vcombine.low %v202_v8, %v206_v10  ;;  %v194_v17 = vld [vmem:[%s2172_s1 + $0x188] sm:$0xff] }
   0x5   :  { %v197_v13 = vld [vmem:[%s2172_s1 + $0x1a0] sm:$0xff]  ;;  %v198_v18 = vld [vmem:[%s2172_s1 + $0x1a8] sm:$0xff] }
   0x6   :  { %v1405_v16 = vcombine.high %v193_v12, %v197_v13  ;;  %v185_v19 = vld [vmem:[%s2172_s1 + $0x140] sm:$0xff]  ;;  %923 = vmatprep.subr.bf16.mxu0 %v1413_v9  ;;  %v1407_v20 = vcombine.high %v194_v17, %v198_v18  ;;  %v186_v22 = vld [vmem:[%s2172_s1 + $0x148] sm:$0xff]  ;;  %966 = vmatprep.subr.bf16.mxu1 %v1415_v14  ;;  %v1404_v24 = vcombine.low %v193_v12, %v197_v13 }
   0x7   :  { %v189_v21 = vld [vmem:[%s2172_s1 + $0x160] sm:$0xff]  ;;  %v190_v23 = vld [vmem:[%s2172_s1 + $0x168] sm:$0xff]  ;;  %924 = vmatpush1.bf16.msra.mxu0 %v1412_v11  ;;  %967 = vmatpush1.bf16.msra.mxu1 %v1414_v15  ;;  %v1406_v25 = vcombine.low %v194_v17, %v198_v18 }
   0x8   :  { %52 = vadd.xlane.f32.xlu0 %v51_v5  ;;  %925 = vmatprep.subr.bf16.mxu0 %v1405_v16  ;;  %v1397_v26 = vcombine.high %v185_v19, %v189_v21  ;;  %v1399_v27 = vcombine.high %v186_v22, %v190_v23  ;;  %v177_v28 = vld [vmem:[%s2172_s1 + $0x100] sm:$0xff]  ;;  %v178_v30 = vld [vmem:[%s2172_s1 + $0x108] sm:$0xff]  ;;  %v1396_v32 = vcombine.low %v185_v19, %v189_v21 }
   0x9   :  { %968 = vmatprep.subr.bf16.mxu1 %v1407_v20  ;;  %v181_v29 = vld [vmem:[%s2172_s1 + $0x120] sm:$0xff]  ;;  %v182_v31 = vld [vmem:[%s2172_s1 + $0x128] sm:$0xff]  ;;  %v1398_v33 = vcombine.low %v186_v22, %v190_v23 }
   0xa   :  { %v1389_v34 = vcombine.high %v177_v28, %v181_v29  ;;  %v1391_v35 = vcombine.high %v178_v30, %v182_v31  ;;  %v169_v36 = vld [vmem:[%s2172_s1 + $0xc0] sm:$0xff]  ;;  %v170_v38 = vld [vmem:[%s2172_s1 + $0xc8] sm:$0xff]  ;;  %v1388_v40 = vcombine.low %v177_v28, %v181_v29  ;;  %v1390_v41 = vcombine.low %v178_v30, %v182_v31 }
   0xb   :  { %926 = vmatpush1.bf16.msra.mxu0 %v1404_v24  ;;  %969 = vmatpush1.bf16.msra.mxu1 %v1406_v25  ;;  %v173_v37 = vld [vmem:[%s2172_s1 + $0xe0] sm:$0xff]  ;;  %v174_v39 = vld [vmem:[%s2172_s1 + $0xe8] sm:$0xff] }
   0xc   :  { %927 = vmatprep.subr.bf16.mxu0 %v1397_v26  ;;  %970 = vmatprep.subr.bf16.mxu1 %v1399_v27  ;;  %v1381_v42 = vcombine.high %v169_v36, %v173_v37  ;;  %v1383_v43 = vcombine.high %v170_v38, %v174_v39  ;;  %v161_v44 = vld [vmem:[%s2172_s1 + $0x80] sm:$0xff]  ;;  %v162_v46 = vld [vmem:[%s2172_s1 + $0x88] sm:$0xff]  ;;  %v1380_v48 = vcombine.low %v169_v36, %v173_v37 }
   0xd   :  { %v165_v45 = vld [vmem:[%s2172_s1 + $0xa0] sm:$0xff]  ;;  %v166_v47 = vld [vmem:[%s2172_s1 + $0xa8] sm:$0xff]  ;;  %v1382_v49 = vcombine.low %v170_v38, %v174_v39 }
   0xe   :  { %v1373_v50 = vcombine.high %v161_v44, %v165_v45  ;;  %v1375_v51 = vcombine.high %v162_v46, %v166_v47  ;;  %v153_v52 = vld [vmem:[%s2172_s1 + $0x40] sm:$0xff]  ;;  %v154_v54 = vld [vmem:[%s2172_s1 + $0x48] sm:$0xff]  ;;  %v1372_v56 = vcombine.low %v161_v44, %v165_v45  ;;  %v1374_v57 = vcombine.low %v162_v46, %v166_v47 }
   0xf   :  { %928 = vmatpush1.bf16.msra.mxu0 %v1396_v32  ;;  %971 = vmatpush1.bf16.msra.mxu1 %v1398_v33  ;;  %v157_v53 = vld [vmem:[%s2172_s1 + $0x60] sm:$0xff]  ;;  %v158_v55 = vld [vmem:[%s2172_s1 + $0x68] sm:$0xff] }
  0x10   :  { %929 = vmatprep.subr.bf16.mxu0 %v1389_v34  ;;  %972 = vmatprep.subr.bf16.mxu1 %v1391_v35  ;;  %v1365_v58 = vcombine.high %v153_v52, %v157_v53  ;;  %v1367_v59 = vcombine.high %v154_v54, %v158_v55  ;;  %v145_v60 = vld [vmem:[%s2172_s1] sm:$0xff]  ;;  %v146_v62 = vld [vmem:[%s2172_s1 + $0x8] sm:$0xff]  ;;  %v1364_v3 = vcombine.low %v153_v52, %v157_v53 }
  0x11   :  { %v149_v61 = vld [vmem:[%s2172_s1 + $0x20] sm:$0xff]  ;;  %v150_v63 = vld [vmem:[%s2172_s1 + $0x28] sm:$0xff]  ;;  %v1366_v5 = vcombine.low %v154_v54, %v158_v55 }
  0x12   :  { %v1357_v6 = vcombine.high %v145_v60, %v149_v61  ;;  %v1359_v7 = vcombine.high %v146_v62, %v150_v63  ;;  %v265_v8 = vld [vmem:[%s2172_s1 + $0x3c0] sm:$0xff]  ;;  %v266_v10 = vld [vmem:[%s2172_s1 + $0x3c8] sm:$0xff]  ;;  %v1356_v12 = vcombine.low %v145_v60, %v149_v61  ;;  %v1358_v13 = vcombine.low %v146_v62, %v150_v63 }
  0x13   :  { %930 = vmatpush1.bf16.msra.mxu0 %v1388_v40  ;;  %973 = vmatpush1.bf16.msra.mxu1 %v1390_v41  ;;  %v269_v9 = vld [vmem:[%s2172_s1 + $0x3e0] sm:$0xff]  ;;  %v270_v11 = vld [vmem:[%s2172_s1 + $0x3e8] sm:$0xff] }
  0x14   :  { %931 = vmatprep.subr.bf16.mxu0 %v1381_v42  ;;  %974 = vmatprep.subr.bf16.mxu1 %v1383_v43  ;;  %v1477_v14 = vcombine.high %v265_v8, %v269_v9  ;;  %v1479_v15 = vcombine.high %v266_v10, %v270_v11  ;;  %v1476_v16 = vcombine.low %v265_v8, %v269_v9  ;;  %v257_v30 = vld [vmem:[%s2172_s1 + $0x380] sm:$0xff]  ;;  %v262_v32 = vld [vmem:[%s2172_s1 + $0x3a8] sm:$0xff] }
  0x15   :  { %v1478_v17 = vcombine.low %v266_v10, %v270_v11  ;;  %v249_v36 = vld [vmem:[%s2172_s1 + $0x340] sm:$0xff]  ;;  %v250_v38 = vld [vmem:[%s2172_s1 + $0x348] sm:$0xff] }
  0x16   :  { %v253_v37 = vld [vmem:[%s2172_s1 + $0x360] sm:$0xff]  ;;  %v254_v40 = vld [vmem:[%s2172_s1 + $0x368] sm:$0xff] }
  0x17   :  { %932 = vmatpush1.bf16.msra.mxu0 %v1380_v48  ;;  %975 = vmatpush1.bf16.msra.mxu1 %v1382_v49  ;;  %v1461_v39 = vcombine.high %v249_v36, %v253_v37  ;;  %v1463_v41 = vcombine.high %v250_v38, %v254_v40  ;;  %v1460_v42 = vcombine.low %v249_v36, %v253_v37  ;;  %v241_v44 = vld [vmem:[%s2172_s1 + $0x300] sm:$0xff]  ;;  %v242_v46 = vld [vmem:[%s2172_s1 + $0x308] sm:$0xff] }
  0x18   :  { %933 = vmatprep.subr.bf16.mxu0 %v1373_v50  ;;  %976 = vmatprep.subr.bf16.mxu1 %v1375_v51  ;;  %v1462_v43 = vcombine.low %v250_v38, %v254_v40  ;;  %v245_v45 = vld [vmem:[%s2172_s1 + $0x320] sm:$0xff]  ;;  %v246_v48 = vld [vmem:[%s2172_s1 + $0x328] sm:$0xff]  ;;  %v83_v38 = vlaneseq }
  0x19   :  { %v1453_v47 = vcombine.high %v241_v44, %v245_v45  ;;  %v1452_v49 = vcombine.low %v241_v44, %v245_v45  ;;  %v233_v50 = vld [vmem:[%s2172_s1 + $0x2c0] sm:$0xff]  ;;  %v1455_v52 = vcombine.high %v242_v46, %v246_v48  ;;  %v1454_v53 = vcombine.low %v242_v46, %v246_v48  ;;  %v234_v55 = vld [vmem:[%s2172_s1 + $0x2c8] sm:$0xff] }
  0x1a   :  { %v237_v51 = vld [vmem:[%s2172_s1 + $0x2e0] sm:$0xff]  ;;  %v226_v60 = vld [vmem:[%s2172_s1 + $0x288] sm:$0xff] }
  0x1b   :  { %934 = vmatpush1.bf16.msra.mxu0 %v1372_v56  ;;  %977 = vmatpush1.bf16.msra.mxu1 %v1374_v57  ;;  %v1445_v54 = vcombine.high %v233_v50, %v237_v51  ;;  %v238_v56 = vld [vmem:[%s2172_s1 + $0x2e8] sm:$0xff]  ;;  %v225_v57 = vld [vmem:[%s2172_s1 + $0x280] sm:$0xff]  ;;  %v1444_v62 = vcombine.low %v233_v50, %v237_v51 }
  0x1c   :  { %935 = vmatprep.subr.bf16.mxu0 %v1365_v58  ;;  %978 = vmatprep.subr.bf16.mxu1 %v1367_v59  ;;  %v1447_v58 = vcombine.high %v234_v55, %v238_v56  ;;  %v229_v59 = vld [vmem:[%s2172_s1 + $0x2a0] sm:$0xff]  ;;  %v230_v61 = vld [vmem:[%s2172_s1 + $0x2a8] sm:$0xff]  ;;  %v1446_v63 = vcombine.low %v234_v55, %v238_v56 }
  0x1d   :  { %v218_v8 = vld [vmem:[%s2172_s1 + $0x248] sm:$0xff]  ;;  %v1436_v10 = vcombine.low %v225_v57, %v229_v59  ;;  %v1438_v11 = vcombine.low %v226_v60, %v230_v61  ;;  %v97_v46 = vld [vmem:[%s2174_s3] sm:$0x3] }
  0x1e   :  { %v222_v9 = vld [vmem:[%s2172_s1 + $0x268] sm:$0xff] }
  0x1f   :  { %936 = vmatpush1.bf16.msra.mxu0 %v1364_v3  ;;  %979 = vmatpush1.bf16.msra.mxu1 %v1366_v5  ;;  %v1437_v3 = vcombine.high %v225_v57, %v229_v59  ;;  %v1439_v5 = vcombine.high %v226_v60, %v230_v61  ;;  %v199_v61 = vld [vmem:[%s2172_s1 + $0x1b0] sm:$0xff] }
  0x20   :  { %937 = vmatprep.subr.bf16.mxu0 %v1357_v6  ;;  %980 = vmatprep.subr.bf16.mxu1 %v1359_v7  ;;  %v217_v6 = vld [vmem:[%s2172_s1 + $0x240] sm:$0xff] }
  0x21   :  { %v221_v7 = vld [vmem:[%s2172_s1 + $0x260] sm:$0xff] }
  0x23   :  { %938 = vmatpush1.bf16.msra.mxu0 %v1356_v12  ;;  %981 = vmatpush1.bf16.msra.mxu1 %v1358_v13  ;;  %v1429_v12 = vcombine.high %v217_v6, %v221_v7  ;;  %v1431_v13 = vcombine.high %v218_v8, %v222_v9 }
  0x24   :  { %939 = vmatprep.subr.bf16.mxu0 %v1477_v14  ;;  %982 = vmatprep.subr.bf16.mxu1 %v1479_v15  ;;  %v209_v14 = vld [vmem:[%s2172_s1 + $0x200] sm:$0xff] }
  0x25   :  { %v213_v15 = vld [vmem:[%s2172_s1 + $0x220] sm:$0xff] }
  0x27   :  { %940 = vmatpush2.bf16.msra.mxu0 %v1476_v16  ;;  %983 = vmatpush2.bf16.msra.mxu1 %v1478_v17  ;;  %v210_v16 = vld [vmem:[%s2172_s1 + $0x208] sm:$0xff] }
  0x28   :  { %v214_v17 = vld [vmem:[%s2172_s1 + $0x228] sm:$0xff] }
  0x8d   :  { %v50_v18 = vpop.xlane.xlu0 %49 }
  0x8e   :  { %v55_v19 = vmul.f32 0.00390625, %v50_v18  ;;  %v1428_v18 = vcombine.low %v217_v6, %v221_v7  ;;  %v191_v7 = vld [vmem:[%s2172_s1 + $0x170] sm:$0xff] }
  0x90   :  { %v1735_v20 = vsub.f32 %v1605_v0, %v55_v19  ;;  %v1738_v21 = vsub.f32 %v1610_v1, %v55_v19  ;;  %v1430_v19 = vcombine.low %v218_v8, %v222_v9  ;;  %v188_v8 = vld [vmem:[%s2172_s1 + $0x158] sm:$0xff] }
  0x91   :  { %v53_v22 = vpop.xlane.xlu0 %52  ;;  %v192_v9 = vld [vmem:[%s2172_s1 + $0x178] sm:$0xff] }
  0x92   :  { %v56_v23 = vmul.f32 0.00390625, %v53_v22  ;;  %v61_v24 = vmul.f32 %v1735_v20, %v1735_v20  ;;  %v62_v25 = vmul.f32 %v1738_v21, %v1738_v21  ;;  %v1421_v22 = vcombine.high %v209_v14, %v213_v15 }
  0x94   :  { %v1745_v26 = vsub.f32 %v1615_v2, %v56_v23  ;;  %v1748_v27 = vsub.f32 %v1622_v4, %v56_v23  ;;  %v65_v28 = vadd.f32 %v62_v25, %v61_v24  ;;  %v261_v2 = vld [vmem:[%s2172_s1 + $0x3a0] sm:$0xff]  ;;  %v258_v4 = vld [vmem:[%s2172_s1 + $0x388] sm:$0xff]  ;;  %v1423_v23 = vcombine.high %v210_v16, %v214_v17 }
  0x95   :  { %v1469_v31 = vcombine.high %v257_v30, %v261_v2  ;;  %v1471_v33 = vcombine.high %v258_v4, %v262_v32  ;;  %v1468_v34 = vcombine.low %v257_v30, %v261_v2  ;;  %v1470_v35 = vcombine.low %v258_v4, %v262_v32  ;;  %v208_v30 = vld [vmem:[%s2172_s1 + $0x1f8] sm:$0xff] }
  0x96   :  { %66 = vadd.xlane.f32.xlu1 %v65_v28  ;;  %v63_v0 = vmul.f32 %v1745_v26, %v1745_v26  ;;  %v64_v1 = vmul.f32 %v1748_v27, %v1748_v27  ;;  %v1420_v24 = vcombine.low %v209_v14, %v213_v15  ;;  %v1422_v25 = vcombine.low %v210_v16, %v214_v17  ;;  %v203_v28 = vld [vmem:[%s2172_s1 + $0x1d0] sm:$0xff]  ;;  %v180_v16 = vld [vmem:[%s2172_s1 + $0x118] sm:$0xff] }
  0x97   :  { %941 = vmatprep.subr.bf16.mxu0 %v1469_v31  ;;  %984 = vmatprep.subr.bf16.mxu1 %v1471_v33  ;;  %v179_v14 = vld [vmem:[%s2172_s1 + $0x110] sm:$0xff]  ;;  %v184_v17 = vld [vmem:[%s2172_s1 + $0x138] sm:$0xff] }
  0x98   :  { %v68_v29 = vadd.f32 %v64_v1, %v63_v0  ;;  %942 = vmatpush2.bf16.msra.mxu0 %v1468_v34  ;;  %985 = vmatpush2.bf16.msra.mxu1 %v1470_v35  ;;  %v207_v0 = vld [vmem:[%s2172_s1 + $0x1f0] sm:$0xff]  ;;  %v204_v1 = vld [vmem:[%s2172_s1 + $0x1d8] sm:$0xff] }
  0x99   :  { %943 = vmatprep.subr.bf16.mxu0 %v1461_v39  ;;  %986 = vmatprep.subr.bf16.mxu1 %v1463_v41  ;;  %v1416_v2 = vcombine.low %v203_v28, %v207_v0  ;;  %v1418_v4 = vcombine.low %v204_v1, %v208_v30  ;;  %v1419_v31 = vcombine.high %v204_v1, %v208_v30  ;;  %v1850_v39 = vshrl.u32 %v83_v38, 7  ;;  %v183_v15 = vld [vmem:[%s2172_s1 + $0x130] sm:$0xff] }
  0x9a   :  { %69 = vadd.xlane.f32.xlu1 %v68_v29  ;;  %v1417_v29 = vcombine.high %v203_v28, %v207_v0  ;;  %v172_v28 = vld [vmem:[%s2172_s1 + $0xd8] sm:$0xff]  ;;  %v1392_v1 = vcombine.low %v179_v14, %v183_v15  ;;  %v155_v38 = vld [vmem:[%s2172_s1 + $0x50] sm:$0xff] }
  0x9b   :  { %v1853_v40 = vsub.s32 1, %v1850_v39  ;;  %v1856_v41 = vsub.s32 0, %v1850_v39  ;;  %v176_v0 = vld [vmem:[%s2172_s1 + $0xf8] sm:$0xff] }
  0x9c   :  { %944 = vmatpush2.bf16.msra.mxu0 %v1460_v42  ;;  %987 = vmatpush2.bf16.msra.mxu1 %v1462_v43  ;;  %v81_v42 = vld [vmem:[%s2173_s2] sm:$0x3] }
  0x9d   :  { %945 = vmatprep.subr.bf16.mxu0 %v1453_v47  ;;  %988 = vmatprep.subr.bf16.mxu1 %v1455_v52  ;;  %v90_v45 = vrot.slane %v81_v42, %v1853_v40  ;;  %v86_v48 = vrot.slane %v81_v42, %v1856_v41  ;;  %v106_v50 = vrot.slane %v97_v46, %v1853_v40  ;;  %v159_v42 = vld [vmem:[%s2172_s1 + $0x70] sm:$0xff] }
  0x9e   :  { %v102_v51 = vrot.slane %v97_v46, %v1856_v41 }
  0xa0   :  { %946 = vmatpush2.bf16.msra.mxu0 %v1452_v49  ;;  %989 = vmatpush2.bf16.msra.mxu1 %v1454_v53 }
  0xa1   :  { %947 = vmatprep.subr.bf16.mxu0 %v1445_v54  ;;  %990 = vmatprep.subr.bf16.mxu1 %v1447_v58 }
  0xa4   :  { %948 = vmatpush2.bf16.msra.mxu0 %v1444_v62  ;;  %991 = vmatpush2.bf16.msra.mxu1 %v1446_v63 }
  0xa5   :  { %949 = vmatprep.subr.bf16.mxu0 %v1437_v3  ;;  %992 = vmatprep.subr.bf16.mxu1 %v1439_v5  ;;  %v187_v3 = vld [vmem:[%s2172_s1 + $0x150] sm:$0xff] }
  0xa8   :  { %950 = vmatpush2.bf16.msra.mxu0 %v1436_v10  ;;  %993 = vmatpush2.bf16.msra.mxu1 %v1438_v11 }
  0xa9   :  { %951 = vmatprep.subr.bf16.mxu0 %v1429_v12  ;;  %994 = vmatprep.subr.bf16.mxu1 %v1431_v13  ;;  %v1401_v12 = vcombine.high %v187_v3, %v191_v7  ;;  %v1403_v13 = vcombine.high %v188_v8, %v192_v9 }
  0xac   :  { %952 = vmatpush2.bf16.msra.mxu0 %v1428_v18  ;;  %995 = vmatpush2.bf16.msra.mxu1 %v1430_v19  ;;  %v1400_v18 = vcombine.low %v187_v3, %v191_v7  ;;  %v1402_v19 = vcombine.low %v188_v8, %v192_v9  ;;  %v260_v3 = vld [vmem:[%s2172_s1 + $0x398] sm:$0xff] }
  0xad   :  { %953 = vmatprep.subr.bf16.mxu0 %v1421_v22  ;;  %996 = vmatprep.subr.bf16.mxu1 %v1423_v23  ;;  %v1393_v22 = vcombine.high %v179_v14, %v183_v15  ;;  %v1395_v23 = vcombine.high %v180_v16, %v184_v17 }
  0xb0   :  { %954 = vmatpush2.bf16.msra.mxu0 %v1420_v24  ;;  %997 = vmatpush2.bf16.msra.mxu1 %v1422_v25  ;;  %v171_v24 = vld [vmem:[%s2172_s1 + $0xd0] sm:$0xff] }
  0xb1   :  { %1009 = vmatprep.subr.bf16.mxu0 %v1417_v29  ;;  %1052 = vmatprep.subr.bf16.mxu1 %v1419_v31  ;;  %v175_v25 = vld [vmem:[%s2172_s1 + $0xf0] sm:$0xff]  ;;  %v1394_v29 = vcombine.low %v180_v16, %v184_v17 }
  0xb2   :  { %v1385_v30 = vcombine.high %v171_v24, %v175_v25  ;;  %v167_v31 = vld [vmem:[%s2172_s1 + $0xb0] sm:$0xff] }
 0x11f   :  { %v67_v32 = vpop.xlane.xlu1 %66 }
 0x120   :  { %v71_v33 = vmul.f32 0.00390625, %v67_v32  ;;  %v164_v32 = vld [vmem:[%s2172_s1 + $0x98] sm:$0xff] }
 0x122   :  { %v73_v34 = vadd.f32 1e-05, %v71_v33  ;;  %v168_v33 = vld [vmem:[%s2172_s1 + $0xb8] sm:$0xff] }
 0x123   :  { %v70_v35 = vpop.xlane.xlu1 %69  ;;  %v1378_v46 = vcombine.low %v164_v32, %v168_v33 }
 0x124   :  { %1504 = vrsqrt.f32 %v73_v34  ;;  %v72_v36 = vmul.f32 0.00390625, %v70_v35  ;;  %v1384_v34 = vcombine.low %v171_v24, %v175_v25  ;;  %v1386_v35 = vcombine.low %v172_v28, %v176_v0 }
 0x126   :  { %v74_v37 = vadd.f32 1e-05, %v72_v36 }
 0x128   :  { %1506 = vrsqrt.f32 %v74_v37  ;;  %v1379_v37 = vcombine.high %v164_v32, %v168_v33 }
 0x131   :  { %v1505_v43 = vpop.eup %1504 }
 0x132   :  { %v78_v44 = vmul.f32 %v1505_v43, %v1738_v21  ;;  %v77_v47 = vmul.f32 %v1505_v43, %v1735_v20  ;;  %v195_v20 = vld [vmem:[%s2172_s1 + $0x190] sm:$0xff]  ;;  %v156_v43 = vld [vmem:[%s2172_s1 + $0x58] sm:$0xff] }
 0x133   :  { %v1409_v5 = vcombine.high %v195_v20, %v199_v61  ;;  %v1408_v10 = vcombine.low %v195_v20, %v199_v61 }
 0x134   :  { %v94_v53 = vmul.f32 %v90_v45, %v78_v44  ;;  %v93_v54 = vmul.f32 %v86_v48, %v77_v47  ;;  %v160_v44 = vld [vmem:[%s2172_s1 + $0x78] sm:$0xff]  ;;  %v1369_v47 = vcombine.high %v155_v38, %v159_v42 }
 0x135   :  { %v1507_v49 = vpop.eup %1506 }
 0x136   :  { %v80_v52 = vmul.f32 %v1507_v49, %v1748_v27  ;;  %v79_v21 = vmul.f32 %v1507_v49, %v1745_v26  ;;  %v110_v57 = vadd.f32 %v106_v50, %v94_v53  ;;  %v109_v59 = vadd.f32 %v102_v51, %v93_v54  ;;  %v196_v27 = vld [vmem:[%s2172_s1 + $0x198] sm:$0xff]  ;;  %v147_v49 = vld [vmem:[%s2172_s1 + $0x10] sm:$0xff] }
 0x137   :  { %v200_v26 = vld [vmem:[%s2172_s1 + $0x1b8] sm:$0xff]  ;;  %v1368_v53 = vcombine.low %v155_v38, %v159_v42 }
 0x138   :  { %v96_v55 = vmul.f32 %v90_v45, %v80_v52  ;;  %v95_v56 = vmul.f32 %v86_v48, %v79_v21  ;;  %v1411_v6 = vcombine.high %v196_v27, %v200_v26  ;;  %v1410_v11 = vcombine.low %v196_v27, %v200_v26  ;;  %v152_v52 = vld [vmem:[%s2172_s1 + $0x38] sm:$0xff]  ;;  %v259_v26 = vld [vmem:[%s2172_s1 + $0x390] sm:$0xff] }
 0x139   :  { %v1371_v48 = vcombine.high %v156_v43, %v160_v44  ;;  %v1370_v21 = vcombine.low %v156_v43, %v160_v44 }
 0x13a   :  { %v112_v58 = vadd.f32 %v106_v50, %v96_v55  ;;  %v111_v60 = vadd.f32 %v102_v51, %v95_v56  ;;  %v151_v50 = vld [vmem:[%s2172_s1 + $0x30] sm:$0xff]  ;;  %v148_v51 = vld [vmem:[%s2172_s1 + $0x18] sm:$0xff] }
 0x13b   :  { %v1361_v54 = vcombine.high %v147_v49, %v151_v50  ;;  %v1363_v55 = vcombine.high %v148_v51, %v152_v52  ;;  %v267_v56 = vld [vmem:[%s2172_s1 + $0x3d0] sm:$0xff]  ;;  %v1362_v20 = vcombine.low %v148_v51, %v152_v52 }
 0x13c   :  { %v1503_v62 = vpack.c.bf16 %v112_v58, %v110_v57  ;;  %v1884_v63 = vpack.c.bf16 %v111_v60, %v109_v59  ;;  %v271_v57 = vld [vmem:[%s2172_s1 + $0x3f0] sm:$0xff]  ;;  %v268_v58 = vld [vmem:[%s2172_s1 + $0x3d8] sm:$0xff]  ;;  %v1360_v60 = vcombine.low %v147_v49, %v151_v50 }
 0x13d   :  { %v272_v59 = vld [vmem:[%s2172_s1 + $0x3f8] sm:$0xff]  ;;  %v1481_v61 = vcombine.high %v267_v56, %v271_v57 }
 0x13e   :  { %955 = vmatprep.mubr.bf16.mxu0 %v1503_v62  ;;  %998 = vmatprep.mubr.bf16.mxu1 %v1503_v62  ;;  %v1483_v27 = vcombine.high %v268_v58, %v272_v59  ;;  %v1482_v7 = vcombine.low %v268_v58, %v272_v59 }
 0x13f   :  { %956 = vmatmul.mubr.bf16.vlgmr.msra.gmra.mxu0 %v1884_v63  ;;  %999 = vmatmul.mubr.bf16.vlgmr.msra.gmra.mxu1 %v1884_v63 }
 0x140   :  { %1010 = vmatpush1.bf16.msra.mxu0 %v1416_v2  ;;  %1053 = vmatpush1.bf16.msra.mxu1 %v1418_v4  ;;  %v1387_v2 = vcombine.high %v172_v28, %v176_v0  ;;  %v163_v4 = vld [vmem:[%s2172_s1 + $0x90] sm:$0xff] }
 0x141   :  { %1041 = vmatprep.mubr.bf16.mxu0 %v1503_v62  ;;  %1084 = vmatprep.mubr.bf16.mxu1 %v1503_v62  ;;  %v1377_v36 = vcombine.high %v163_v4, %v167_v31  ;;  %v1376_v45 = vcombine.low %v163_v4, %v167_v31  ;;  %v263_v62 = vld [vmem:[%s2172_s1 + $0x3b0] sm:$0xff] }
 0x142   :  { %1011 = vmatprep.subr.bf16.mxu0 %v1409_v5  ;;  %1054 = vmatprep.subr.bf16.mxu1 %v1411_v6  ;;  %v264_v5 = vld [vmem:[%s2172_s1 + $0x3b8] sm:$0xff]  ;;  %v1480_v6 = vcombine.low %v267_v56, %v271_v57  ;;  %v1473_v8 = vcombine.high %v259_v26, %v263_v62  ;;  %v1472_v14 = vcombine.low %v259_v26, %v263_v62  ;;  %v1162_v26 = vsub.s32 3, %v1850_v39 }
 0x143   :  { %v1475_v9 = vcombine.high %v260_v3, %v264_v5  ;;  %v1474_v15 = vcombine.low %v260_v3, %v264_v5 }
 0x144   :  { %1012 = vmatpush1.bf16.msra.mxu0 %v1408_v10  ;;  %1055 = vmatpush1.bf16.msra.mxu1 %v1410_v11  ;;  %v251_v10 = vld [vmem:[%s2172_s1 + $0x350] sm:$0xff] }
 0x145   :  { %1013 = vmatprep.subr.bf16.mxu0 %v1401_v12  ;;  %1056 = vmatprep.subr.bf16.mxu1 %v1403_v13  ;;  %v255_v11 = vld [vmem:[%s2172_s1 + $0x370] sm:$0xff]  ;;  %v252_v12 = vld [vmem:[%s2172_s1 + $0x358] sm:$0xff] }
 0x146   :  { %v256_v13 = vld [vmem:[%s2172_s1 + $0x378] sm:$0xff]  ;;  %v1465_v16 = vcombine.high %v251_v10, %v255_v11  ;;  %v1464_v24 = vcombine.low %v251_v10, %v255_v11 }
 0x147   :  { %v1467_v17 = vcombine.high %v252_v12, %v256_v13  ;;  %v1466_v25 = vcombine.low %v252_v12, %v256_v13 }
 0x148   :  { %1014 = vmatpush1.bf16.msra.mxu0 %v1400_v18  ;;  %1057 = vmatpush1.bf16.msra.mxu1 %v1402_v19  ;;  %v243_v18 = vld [vmem:[%s2172_s1 + $0x310] sm:$0xff] }
 0x149   :  { %1015 = vmatprep.subr.bf16.mxu0 %v1393_v22  ;;  %1058 = vmatprep.subr.bf16.mxu1 %v1395_v23  ;;  %v247_v19 = vld [vmem:[%s2172_s1 + $0x330] sm:$0xff]  ;;  %v244_v22 = vld [vmem:[%s2172_s1 + $0x318] sm:$0xff] }
 0x14a   :  { %v248_v23 = vld [vmem:[%s2172_s1 + $0x338] sm:$0xff]  ;;  %v1457_v28 = vcombine.high %v243_v18, %v247_v19  ;;  %v1456_v4 = vcombine.low %v243_v18, %v247_v19 }
 0x14b   :  { %v1459_v0 = vcombine.high %v244_v22, %v248_v23  ;;  %v1458_v31 = vcombine.low %v244_v22, %v248_v23 }
 0x14c   :  { %1016 = vmatpush1.bf16.msra.mxu0 %v1392_v1  ;;  %1059 = vmatpush1.bf16.msra.mxu1 %v1394_v29  ;;  %v235_v1 = vld [vmem:[%s2172_s1 + $0x2d0] sm:$0xff] }
 0x14d   :  { %1017 = vmatprep.subr.bf16.mxu0 %v1385_v30  ;;  %1060 = vmatprep.subr.bf16.mxu1 %v1387_v2  ;;  %v239_v29 = vld [vmem:[%s2172_s1 + $0x2f0] sm:$0xff]  ;;  %v236_v30 = vld [vmem:[%s2172_s1 + $0x2d8] sm:$0xff] }
 0x14e   :  { %v240_v2 = vld [vmem:[%s2172_s1 + $0x2f8] sm:$0xff]  ;;  %v1449_v32 = vcombine.high %v235_v1, %v239_v29  ;;  %v1448_v38 = vcombine.low %v235_v1, %v239_v29 }
 0x14f   :  { %v1451_v33 = vcombine.high %v236_v30, %v240_v2  ;;  %v1450_v42 = vcombine.low %v236_v30, %v240_v2 }
 0x150   :  { %1018 = vmatpush1.bf16.msra.mxu0 %v1384_v34  ;;  %1061 = vmatpush1.bf16.msra.mxu1 %v1386_v35  ;;  %v227_v34 = vld [vmem:[%s2172_s1 + $0x290] sm:$0xff] }
 0x151   :  { %1019 = vmatprep.subr.bf16.mxu0 %v1377_v36  ;;  %1062 = vmatprep.subr.bf16.mxu1 %v1379_v37  ;;  %v231_v35 = vld [vmem:[%s2172_s1 + $0x2b0] sm:$0xff]  ;;  %v228_v36 = vld [vmem:[%s2172_s1 + $0x298] sm:$0xff] }
 0x152   :  { %v232_v37 = vld [vmem:[%s2172_s1 + $0x2b8] sm:$0xff]  ;;  %v1441_v43 = vcombine.high %v227_v34, %v231_v35  ;;  %v1440_v49 = vcombine.low %v227_v34, %v231_v35 }
 0x153   :  { %v1443_v44 = vcombine.high %v228_v36, %v232_v37  ;;  %v1442_v50 = vcombine.low %v228_v36, %v232_v37 }
 0x154   :  { %1020 = vmatpush1.bf16.msra.mxu0 %v1376_v45  ;;  %1063 = vmatpush1.bf16.msra.mxu1 %v1378_v46  ;;  %v219_v45 = vld [vmem:[%s2172_s1 + $0x250] sm:$0xff] }
 0x155   :  { %1021 = vmatprep.subr.bf16.mxu0 %v1369_v47  ;;  %1064 = vmatprep.subr.bf16.mxu1 %v1371_v48  ;;  %v223_v46 = vld [vmem:[%s2172_s1 + $0x270] sm:$0xff]  ;;  %v220_v47 = vld [vmem:[%s2172_s1 + $0x258] sm:$0xff] }
 0x156   :  { %v224_v48 = vld [vmem:[%s2172_s1 + $0x278] sm:$0xff]  ;;  %v1433_v51 = vcombine.high %v219_v45, %v223_v46  ;;  %v1432_v56 = vcombine.low %v219_v45, %v223_v46 }
 0x157   :  { %v1435_v52 = vcombine.high %v220_v47, %v224_v48  ;;  %v1434_v57 = vcombine.low %v220_v47, %v224_v48 }
 0x158   :  { %1022 = vmatpush1.bf16.msra.mxu0 %v1368_v53  ;;  %1065 = vmatpush1.bf16.msra.mxu1 %v1370_v21  ;;  %v211_v53 = vld [vmem:[%s2172_s1 + $0x210] sm:$0xff] }
 0x159   :  { %1023 = vmatprep.subr.bf16.mxu0 %v1361_v54  ;;  %1066 = vmatprep.subr.bf16.mxu1 %v1363_v55  ;;  %v215_v21 = vld [vmem:[%s2172_s1 + $0x230] sm:$0xff]  ;;  %v212_v54 = vld [vmem:[%s2172_s1 + $0x218] sm:$0xff] }
 0x15a   :  { %v216_v55 = vld [vmem:[%s2172_s1 + $0x238] sm:$0xff]  ;;  %v1425_v58 = vcombine.high %v211_v53, %v215_v21 }
 0x15b   :  { %v1427_v59 = vcombine.high %v212_v54, %v216_v55 }
 0x15c   :  { %1024 = vmatpush1.bf16.msra.mxu0 %v1360_v60  ;;  %1067 = vmatpush1.bf16.msra.mxu1 %v1362_v20  ;;  %v1424_v60 = vcombine.low %v211_v53, %v215_v21  ;;  %v1426_v20 = vcombine.low %v212_v54, %v216_v55 }
 0x15d   :  { %1025 = vmatprep.subr.bf16.mxu0 %v1481_v61  ;;  %1068 = vmatprep.subr.bf16.mxu1 %v1483_v27  ;;  %v1158_v61 = vsub.s32 2, %v1850_v39  ;;  %v2062_v27 = vld [vmem:[%s2175_s4] sm:$0xff] }
 0x15e   :  { %v1151_v62 = vrot.slane %v2062_v27, %v1856_v41  ;;  %v1155_v5 = vrot.slane %v2062_v27, %v1853_v40 }
 0x15f   :  { %v1159_v3 = vrot.slane %v2062_v27, %v1158_v61 }
 0x160   :  { %1026 = vmatpush2.bf16.msra.mxu0 %v1480_v6  ;;  %1069 = vmatpush2.bf16.msra.mxu1 %v1482_v7  ;;  %v1163_v6 = vrot.slane %v2062_v27, %v1162_v26 }
 0x161   :  { %1027 = vmatprep.subr.bf16.mxu0 %v1473_v8  ;;  %1070 = vmatprep.subr.bf16.mxu1 %v1475_v9 }
 0x164   :  { %1028 = vmatpush2.bf16.msra.mxu0 %v1472_v14  ;;  %1071 = vmatpush2.bf16.msra.mxu1 %v1474_v15 }
 0x165   :  { %1029 = vmatprep.subr.bf16.mxu0 %v1465_v16  ;;  %1072 = vmatprep.subr.bf16.mxu1 %v1467_v17 }
 0x168   :  { %1030 = vmatpush2.bf16.msra.mxu0 %v1464_v24  ;;  %1073 = vmatpush2.bf16.msra.mxu1 %v1466_v25 }
 0x169   :  { %1031 = vmatprep.subr.bf16.mxu0 %v1457_v28  ;;  %1074 = vmatprep.subr.bf16.mxu1 %v1459_v0 }
 0x16c   :  { %1032 = vmatpush2.bf16.msra.mxu0 %v1456_v4  ;;  %1075 = vmatpush2.bf16.msra.mxu1 %v1458_v31 }
 0x16d   :  { %1033 = vmatprep.subr.bf16.mxu0 %v1449_v32  ;;  %1076 = vmatprep.subr.bf16.mxu1 %v1451_v33 }
 0x170   :  { %1034 = vmatpush2.bf16.msra.mxu0 %v1448_v38  ;;  %1077 = vmatpush2.bf16.msra.mxu1 %v1450_v42 }
 0x171   :  { %1035 = vmatprep.subr.bf16.mxu0 %v1441_v43  ;;  %1078 = vmatprep.subr.bf16.mxu1 %v1443_v44 }
 0x174   :  { %1036 = vmatpush2.bf16.msra.mxu0 %v1440_v49  ;;  %1079 = vmatpush2.bf16.msra.mxu1 %v1442_v50 }
 0x175   :  { %1037 = vmatprep.subr.bf16.mxu0 %v1433_v51  ;;  %1080 = vmatprep.subr.bf16.mxu1 %v1435_v52 }
 0x178   :  { %1038 = vmatpush2.bf16.msra.mxu0 %v1432_v56  ;;  %1081 = vmatpush2.bf16.msra.mxu1 %v1434_v57 }
 0x179   :  { %1039 = vmatprep.subr.bf16.mxu0 %v1425_v58  ;;  %1082 = vmatprep.subr.bf16.mxu1 %v1427_v59 }
 0x17c   :  { %1040 = vmatpush2.bf16.msra.mxu0 %v1424_v60  ;;  %1083 = vmatpush2.bf16.msra.mxu1 %v1426_v20 }
 0x17f   :  { %1042 = vmatmul.mubr.bf16.vlgmr.msra.gmra.mxu0 %v1884_v63  ;;  %1085 = vmatmul.mubr.bf16.vlgmr.msra.gmra.mxu1 %v1884_v63 }
 0x1ff   :  { %v957_v63 = vpop.f32.mrf.mxu0  ;;  %v1000_v7 = vpop.f32.mrf.mxu1 }
 0x200   :  { %v2071_v8 = vadd.f32 %v1151_v62, %v957_v63  ;;  %v2073_v9 = vadd.f32 %v1159_v3, %v1000_v7 }
 0x201   :  { %v959_v10 = vpop.f32.mrf.mxu0  ;;  %v1002_v11 = vpop.f32.mrf.mxu1 }
 0x202   :  { %v1484_v12 = vmul.f32 -1.702, %v2071_v8  ;;  %v1486_v13 = vmul.f32 -1.702, %v2073_v9  ;;  %v2077_v41 = vadd.f32 %v1155_v5, %v959_v10  ;;  %v2079_v14 = vadd.f32 %v1163_v6, %v1002_v11 }
 0x203   :  { %v961_v15 = vpop.f32.mrf.mxu0  ;;  %v1004_v40 = vpop.f32.mrf.mxu1  ;;  %v1170_v10 = vsub.s32 5, %v1850_v39  ;;  %v1178_v11 = vsub.s32 7, %v1850_v39 }
 0x204   :  { %v1236_v16 = vmul.f32 1.442695, %v1484_v12  ;;  %v1240_v17 = vmul.f32 1.442695, %v1486_v13  ;;  %v1485_v18 = vmul.f32 -1.702, %v2077_v41  ;;  %v2082_v19 = vadd.f32 %v1151_v62, %v961_v15 }
 0x205   :  { %v1487_v22 = vmul.f32 -1.702, %v2079_v14  ;;  %v2085_v23 = vadd.f32 %v1159_v3, %v1004_v40  ;;  %v963_v24 = vpop.f32.mrf.mxu0  ;;  %v1006_v25 = vpop.f32.mrf.mxu1 }
 0x206   :  { %1508 = vpow2.f32 %v1236_v16  ;;  %v1238_v28 = vmul.f32 1.442695, %v1485_v18  ;;  %v1492_v0 = vmul.f32 -1.702, %v2082_v19  ;;  %v1197_v1 = vadd.f32 %v1155_v5, %v963_v24 }
 0x207   :  { %1510 = vpow2.f32 %v1240_v17  ;;  %v1242_v29 = vmul.f32 1.442695, %v1487_v22  ;;  %v1494_v30 = vmul.f32 -1.702, %v2085_v23  ;;  %v1199_v2 = vadd.f32 %v1163_v6, %v1006_v25 }
 0x208   :  { %1512 = vpow2.f32 %v1238_v28  ;;  %v1252_v4 = vmul.f32 1.442695, %v1492_v0  ;;  %v1493_v31 = vmul.f32 -1.702, %v1197_v1 }
 0x209   :  { %1514 = vpow2.f32 %v1242_v29  ;;  %v1256_v32 = vmul.f32 1.442695, %v1494_v30  ;;  %v1495_v33 = vmul.f32 -1.702, %v1199_v2 }
 0x20a   :  { %1516 = vpow2.f32 %v1252_v4  ;;  %v1254_v34 = vmul.f32 1.442695, %v1493_v31 }
 0x20b   :  { %1518 = vpow2.f32 %v1256_v32  ;;  %v1258_v35 = vmul.f32 1.442695, %v1495_v33 }
 0x20c   :  { %1520 = vpow2.f32 %v1254_v34 }
 0x20d   :  { %1522 = vpow2.f32 %v1258_v35 }
 0x213   :  { %v1509_v36 = vpop.eup %1508 }
 0x214   :  { %v1511_v37 = vpop.eup %1510  ;;  %v1268_v38 = vadd.f32 1.0, %v1509_v36 }
 0x215   :  { %v1513_v42 = vpop.eup %1512  ;;  %v1270_v43 = vadd.f32 1.0, %v1511_v37 }
 0x216   :  { %v1515_v44 = vpop.eup %1514  ;;  %1524 = vrcp.f32 %v1268_v38  ;;  %v1269_v45 = vadd.f32 1.0, %v1513_v42 }
 0x217   :  { %v1517_v46 = vpop.eup %1516  ;;  %1526 = vrcp.f32 %v1270_v43  ;;  %v1271_v47 = vadd.f32 1.0, %v1515_v44 }
 0x218   :  { %v1519_v48 = vpop.eup %1518  ;;  %1528 = vrcp.f32 %v1269_v45  ;;  %v1276_v49 = vadd.f32 1.0, %v1517_v46 }
 0x219   :  { %v1521_v50 = vpop.eup %1520  ;;  %1530 = vrcp.f32 %v1271_v47  ;;  %v1278_v51 = vadd.f32 1.0, %v1519_v48 }
 0x21a   :  { %v1523_v52 = vpop.eup %1522  ;;  %1532 = vrcp.f32 %v1276_v49  ;;  %v1277_v53 = vadd.f32 1.0, %v1521_v50 }
 0x21b   :  { %1534 = vrcp.f32 %v1278_v51  ;;  %v1279_v21 = vadd.f32 1.0, %v1523_v52 }
 0x21c   :  { %1536 = vrcp.f32 %v1277_v53 }
 0x21d   :  { %1538 = vrcp.f32 %v1279_v21 }
 0x223   :  { %v1525_v54 = vpop.eup %1524 }
 0x224   :  { %v1527_v55 = vpop.eup %1526  ;;  %v1316_v56 = vmul.f32 %v1525_v54, %v2071_v8  ;;  %v1166_v8 = vsub.s32 4, %v1850_v39 }
 0x225   :  { %v1529_v57 = vpop.eup %1528  ;;  %v1318_v58 = vmul.f32 %v1527_v55, %v2073_v9  ;;  %v1174_v9 = vsub.s32 6, %v1850_v39 }
 0x226   :  { %v1531_v59 = vpop.eup %1530  ;;  %1332 = vst [vmem:[%s2176_s5] sm:$0xff] %v1316_v56  ;;  %v1317_v60 = vmul.f32 %v1529_v57, %v2077_v41  ;;  %v1167_v12 = vrot.slane %v2062_v27, %v1166_v8  ;;  %v1171_v41 = vrot.slane %v2062_v27, %v1170_v10 }
 0x227   :  { %v1533_v20 = vpop.eup %1532  ;;  %1334 = vst [vmem:[%s2176_s5 + $0x10] sm:$0xff] %v1318_v58  ;;  %v1319_v61 = vmul.f32 %v1531_v59, %v2079_v14  ;;  %v1175_v13 = vrot.slane %v2062_v27, %v1174_v9  ;;  %v1179_v14 = vrot.slane %v2062_v27, %v1178_v11 }
 0x228   :  { %v1535_v26 = vpop.eup %1534  ;;  %1333 = vst [vmem:[%s2176_s5 + $0x8] sm:$0xff] %v1317_v60  ;;  %v1324_v62 = vmul.f32 %v1533_v20, %v2082_v19 }
 0x229   :  { %v1537_v3 = vpop.eup %1536  ;;  %1335 = vst [vmem:[%s2176_s5 + $0x18] sm:$0xff] %v1319_v61  ;;  %v1326_v5 = vmul.f32 %v1535_v26, %v2085_v23 }
 0x22a   :  { %v1539_v6 = vpop.eup %1538  ;;  %1340 = vst [vmem:[%s2176_s5 + $0x40] sm:$0xff] %v1324_v62  ;;  %v1325_v63 = vmul.f32 %v1537_v3, %v1197_v1 }
 0x22b   :  { %1342 = vst [vmem:[%s2176_s5 + $0x50] sm:$0xff] %v1326_v5  ;;  %v1327_v7 = vmul.f32 %v1539_v6, %v1199_v2 }
 0x22c   :  { %1341 = vst [vmem:[%s2176_s5 + $0x48] sm:$0xff] %v1325_v63 }
 0x22d   :  { %1343 = vst [vmem:[%s2176_s5 + $0x58] sm:$0xff] %v1327_v7 }
 0x23f   :  { %v1043_v15 = vpop.f32.mrf.mxu0  ;;  %v1086_v40 = vpop.f32.mrf.mxu1 }
 0x240   :  { %v2127_v16 = vadd.f32 %v1167_v12, %v1043_v15  ;;  %v2129_v17 = vadd.f32 %v1175_v13, %v1086_v40 }
 0x241   :  { %v1045_v18 = vpop.f32.mrf.mxu0  ;;  %v1088_v19 = vpop.f32.mrf.mxu1 }
 0x242   :  { %v1488_v22 = vmul.f32 -1.702, %v2127_v16  ;;  %v1490_v39 = vmul.f32 -1.702, %v2129_v17  ;;  %v2133_v23 = vadd.f32 %v1171_v41, %v1045_v18  ;;  %v2135_v24 = vadd.f32 %v1179_v14, %v1088_v19 }
 0x243   :  { %v1047_v25 = vpop.f32.mrf.mxu0  ;;  %v1090_v28 = vpop.f32.mrf.mxu1 }
 0x244   :  { %v1244_v0 = vmul.f32 1.442695, %v1488_v22  ;;  %v1248_v27 = vmul.f32 1.442695, %v1490_v39  ;;  %v1489_v1 = vmul.f32 -1.702, %v2133_v23  ;;  %v1200_v29 = vadd.f32 %v1167_v12, %v1047_v25 }
 0x245   :  { %v1491_v30 = vmul.f32 -1.702, %v2135_v24  ;;  %v2139_v2 = vadd.f32 %v1175_v13, %v1090_v28  ;;  %v1049_v4 = vpop.f32.mrf.mxu0  ;;  %v1092_v31 = vpop.f32.mrf.mxu1 }
 0x246   :  { %1540 = vpow2.f32 %v1244_v0  ;;  %v1246_v32 = vmul.f32 1.442695, %v1489_v1  ;;  %v1496_v33 = vmul.f32 -1.702, %v1200_v29  ;;  %v1201_v34 = vadd.f32 %v1171_v41, %v1049_v4 }
 0x247   :  { %1542 = vpow2.f32 %v1248_v27  ;;  %v1250_v35 = vmul.f32 1.442695, %v1491_v30  ;;  %v1498_v36 = vmul.f32 -1.702, %v2139_v2  ;;  %v1203_v37 = vadd.f32 %v1179_v14, %v1092_v31 }
 0x248   :  { %1544 = vpow2.f32 %v1246_v32  ;;  %v1260_v38 = vmul.f32 1.442695, %v1496_v33  ;;  %v1497_v42 = vmul.f32 -1.702, %v1201_v34 }
 0x249   :  { %1546 = vpow2.f32 %v1250_v35  ;;  %v1264_v43 = vmul.f32 1.442695, %v1498_v36  ;;  %v1499_v44 = vmul.f32 -1.702, %v1203_v37 }
 0x24a   :  { %1548 = vpow2.f32 %v1260_v38  ;;  %v1262_v45 = vmul.f32 1.442695, %v1497_v42 }
 0x24b   :  { %1550 = vpow2.f32 %v1264_v43  ;;  %v1266_v46 = vmul.f32 1.442695, %v1499_v44 }
 0x24c   :  { %1552 = vpow2.f32 %v1262_v45 }
 0x24d   :  { %1554 = vpow2.f32 %v1266_v46 }
 0x253   :  { %v1541_v47 = vpop.eup %1540 }
 0x254   :  { %v1543_v48 = vpop.eup %1542  ;;  %v1272_v49 = vadd.f32 1.0, %v1541_v47 }
 0x255   :  { %v1545_v50 = vpop.eup %1544  ;;  %v1274_v51 = vadd.f32 1.0, %v1543_v48 }
 0x256   :  { %v1547_v52 = vpop.eup %1546  ;;  %1556 = vrcp.f32 %v1272_v49  ;;  %v1273_v53 = vadd.f32 1.0, %v1545_v50 }
 0x257   :  { %v1549_v21 = vpop.eup %1548  ;;  %1558 = vrcp.f32 %v1274_v51  ;;  %v1275_v54 = vadd.f32 1.0, %v1547_v52 }
 0x258   :  { %v1551_v55 = vpop.eup %1550  ;;  %1560 = vrcp.f32 %v1273_v53  ;;  %v1280_v56 = vadd.f32 1.0, %v1549_v21 }
 0x259   :  { %v1553_v57 = vpop.eup %1552  ;;  %1562 = vrcp.f32 %v1275_v54  ;;  %v1282_v58 = vadd.f32 1.0, %v1551_v55 }
 0x25a   :  { %v1555_v59 = vpop.eup %1554  ;;  %1564 = vrcp.f32 %v1280_v56  ;;  %v1281_v60 = vadd.f32 1.0, %v1553_v57 }
 0x25b   :  { %1566 = vrcp.f32 %v1282_v58  ;;  %v1283_v20 = vadd.f32 1.0, %v1555_v59 }
 0x25c   :  { %1568 = vrcp.f32 %v1281_v60 }
 0x25d   :  { %1570 = vrcp.f32 %v1283_v20 }
 0x263   :  { %v1557_v61 = vpop.eup %1556 }
 0x264   :  { %v1559_v26 = vpop.eup %1558  ;;  %v1320_v62 = vmul.f32 %v1557_v61, %v2127_v16 }
 0x265   :  { %v1561_v3 = vpop.eup %1560  ;;  %v1322_v5 = vmul.f32 %v1559_v26, %v2129_v17 }
 0x266   :  { %v1563_v6 = vpop.eup %1562  ;;  %1336 = vst [vmem:[%s2176_s5 + $0x20] sm:$0xff] %v1320_v62  ;;  %v1321_v63 = vmul.f32 %v1561_v3, %v2133_v23 }
 0x267   :  { %v1565_v7 = vpop.eup %1564  ;;  %1338 = vst [vmem:[%s2176_s5 + $0x30] sm:$0xff] %v1322_v5  ;;  %v1323_v8 = vmul.f32 %v1563_v6, %v2135_v24 }
 0x268   :  { %v1567_v9 = vpop.eup %1566  ;;  %1337 = vst [vmem:[%s2176_s5 + $0x28] sm:$0xff] %v1321_v63  ;;  %v1328_v10 = vmul.f32 %v1565_v7, %v1200_v29 }
 0x269   :  { %v1569_v11 = vpop.eup %1568  ;;  %1339 = vst [vmem:[%s2176_s5 + $0x38] sm:$0xff] %v1323_v8  ;;  %v1330_v12 = vmul.f32 %v1567_v9, %v2139_v2 }
 0x26a   :  { %v1571_v13 = vpop.eup %1570  ;;  %1344 = vst [vmem:[%s2176_s5 + $0x60] sm:$0xff] %v1328_v10  ;;  %v1329_v41 = vmul.f32 %v1569_v11, %v1201_v34 }
 0x26b   :  { %1346 = vst [vmem:[%s2176_s5 + $0x70] sm:$0xff] %v1330_v12  ;;  %v1331_v14 = vmul.f32 %v1571_v13, %v1203_v37 }
 0x26c   :  { %1345 = vst [vmem:[%s2176_s5 + $0x68] sm:$0xff] %v1329_v41 }
 0x26d   :  { %1347 = vst [vmem:[%s2176_s5 + $0x78] sm:$0xff] %v1331_v14 }

// kernel: image_encoder_forward.25
= control target key start
LH: loop header
LB: loop body
LE: loop exit
PB: predicated region body
PF: predicated region fallthrough
CT: control target
= control target key end

     0   :  { %v48_v29 = vlaneseq  ;;  %s421_s0 = inlined_call_operand.vmem [shape: f32[8,256], index: 0, kind: input, shape index: {}]   ;;  %s422_s1 = inlined_call_operand.vmem [shape: bf16[256,128], index: 1, kind: input, shape index: {}]   ;;  %s423_s2 = inlined_call_operand.vmem [shape: f32[1,256], index: 2, kind: input, shape index: {}]   ;;  %s424_s3 = inlined_call_operand.vmem [shape: f32[1,256], index: 3, kind: input, shape index: {}]   ;;  %s425_s4 = inlined_call_operand.vmem [shape: f32[8,128], index: 4, kind: output, shape index: {}]  }
   0x1   :  { %v27_v0 = vld [vmem:[%s421_s0] sm:$0xff]  ;;  %v28_v1 = vld [vmem:[%s421_s0 + $0x8] sm:$0xff]  ;;  %v315_v3 = vld [vmem:[%s422_s1 + $0x78] sm:$0xff]  }
   0x2   :  { %v29_v2 = vadd.f32 %v28_v1, %v27_v0  ;;  %v316_v4 = vld [vmem:[%s422_s1 + $0x38] sm:$0xff]   ;;  %293 = vmatprep.subr.bf16.mxu0 %v315_v3  ;;  %v317_v5 = vld [vmem:[%s422_s1 + $0x70] sm:$0xff]   ;;  %v319_v14 = vld [vmem:[%s422_s1 + $0x68] sm:$0xff]   ;;  %v49_v30 = vshrl.u32 %v48_v29, 7 }
   0x3   :  { %294 = vmatpush3.bf16.msra.mxu0 %v316_v4  ;;  %v318_v13 = vld [vmem:[%s422_s1 + $0x30] sm:$0xff]   ;;  %v320_v15 = vld [vmem:[%s422_s1 + $0x28] sm:$0xff]   ;;  %v321_v16 = vld [vmem:[%s422_s1 + $0x60] sm:$0xff]  }
   0x4   :  { %30 = vadd.xlane.f32.xlu0 %v29_v2  ;;  %295 = vmatprep.subr.bf16.mxu0 %v317_v5  ;;  %v322_v17 = vld [vmem:[%s422_s1 + $0x20] sm:$0xff]   ;;  %v323_v18 = vld [vmem:[%s422_s1 + $0x58] sm:$0xff]   ;;  %v325_v20 = vld [vmem:[%s422_s1 + $0x50] sm:$0xff]   ;;  %v50_v31 = vsub.s32 0, %v49_v30  ;;  %v54_v32 = vsub.s32 1, %v49_v30 }
   0x5   :  { %v324_v19 = vld [vmem:[%s422_s1 + $0x18] sm:$0xff]   ;;  %v326_v21 = vld [vmem:[%s422_s1 + $0x10] sm:$0xff]   ;;  %v327_v22 = vld [vmem:[%s422_s1 + $0x48] sm:$0xff]  }
   0x6   :  { %v328_v23 = vld [vmem:[%s422_s1 + $0x8] sm:$0xff]   ;;  %v329_v24 = vld [vmem:[%s422_s1 + $0x40] sm:$0xff]  }
   0x7   :  { %296 = vmatpush3.bf16.msra.mxu0 %v318_v13  ;;  %v330_v25 = vld [vmem:[%s422_s1] sm:$0xff]  }
   0x8   :  { %297 = vmatprep.subr.bf16.mxu0 %v319_v14  ;;  %v46_v33 = vld [vmem:[%s423_s2] sm:$0x3] }
   0x9   :  { %v60_v34 = vld [vmem:[%s424_s3] sm:$0x3]  ;;  %v51_v35 = vrot.slane %v46_v33, %v50_v31  ;;  %v55_v36 = vrot.slane %v46_v33, %v54_v32 }
   0xa   :  { %v65_v39 = vrot.slane %v60_v34, %v50_v31  ;;  %v69_v40 = vrot.slane %v60_v34, %v54_v32 }
   0xb   :  { %298 = vmatpush3.bf16.msra.mxu0 %v320_v15 }
   0xc   :  { %299 = vmatprep.subr.bf16.mxu0 %v321_v16 }
   0xf   :  { %300 = vmatpush3.bf16.msra.mxu0 %v322_v17 }
  0x10   :  { %301 = vmatprep.subr.bf16.mxu0 %v323_v18 }
  0x13   :  { %302 = vmatpush3.bf16.msra.mxu0 %v324_v19 }
  0x14   :  { %303 = vmatprep.subr.bf16.mxu0 %v325_v20 }
  0x17   :  { %304 = vmatpush3.bf16.msra.mxu0 %v326_v21 }
  0x18   :  { %305 = vmatprep.subr.bf16.mxu0 %v327_v22 }
  0x1b   :  { %306 = vmatpush3.bf16.msra.mxu0 %v328_v23 }
  0x1c   :  { %307 = vmatprep.subr.bf16.mxu0 %v329_v24 }
  0x1f   :  { %308 = vmatpush3.bf16.msra.mxu0 %v330_v25 }
  0x8d   :  { %v31_v6 = vpop.xlane.xlu0 %30 }
  0x8e   :  { %v33_v7 = vmul.f32 0.00390625, %v31_v6 }
  0x90   :  { %v34_v8 = vsub.f32 %v27_v0, %v33_v7  ;;  %v35_v9 = vsub.f32 %v28_v1, %v33_v7 }
  0x92   :  { %v36_v10 = vmul.f32 %v34_v8, %v34_v8  ;;  %v37_v11 = vmul.f32 %v35_v9, %v35_v9 }
  0x94   :  { %v38_v12 = vadd.f32 %v37_v11, %v36_v10 }
  0x96   :  { %39 = vadd.xlane.f32.xlu0 %v38_v12 }
 0x11f   :  { %v40_v26 = vpop.xlane.xlu0 %39 }
 0x120   :  { %v41_v27 = vmul.f32 0.00390625, %v40_v26 }
 0x122   :  { %v42_v28 = vadd.f32 1e-05, %v41_v27 }
 0x124   :  { %331 = vrsqrt.f32 %v42_v28 }
 0x131   :  { %v332_v37 = vpop.eup %331 }
 0x132   :  { %v45_v38 = vmul.f32 %v332_v37, %v35_v9  ;;  %v44_v41 = vmul.f32 %v332_v37, %v34_v8 }
 0x134   :  { %v59_v42 = vmul.f32 %v55_v36, %v45_v38  ;;  %v58_v43 = vmul.f32 %v51_v35, %v44_v41 }
 0x136   :  { %v73_v44 = vadd.f32 %v69_v40, %v59_v42  ;;  %v72_v45 = vadd.f32 %v65_v39, %v58_v43 }
 0x138   :  { %v292_v46 = vpack.c.bf16 %v73_v44, %v73_v44  ;;  %v291_v47 = vpack.c.bf16 %v72_v45, %v72_v45 }
 0x13a   :  { %252 = vmatprep.mubr.bf16.mxu0 %v292_v46 }
 0x13b   :  { %253 = vmatmul.mubr.bf16.vlgmr.msra.gmra.mxu0 %v291_v47 }
 0x1fb   :  { %v309_v48 = vpop.f32.mrf.mxu0 }
 0x1fd   :  { %v310_v49 = vpop.f32.mrf.mxu0 }
 0x1fe   :  { %v311_v50 = vadd.f32 %v310_v49, %v309_v48 }
 0x1ff   :  { %v312_v51 = vpop.f32.mrf.mxu0 }
 0x200   :  { %266 = vst [vmem:[%s425_s4] sm:$0xff] %v311_v50 }
 0x201   :  { %v313_v52 = vpop.f32.mrf.mxu0 }

</bundles_post_ra>
